<compile_context>
chip_gen: v6e
topology: v6e:2x2x1
jax: 0.10.0
libtpu: 0.0.40
codegen_flags: <defaults>
</compile_context>

<pallas_src>
import jax
import jax.numpy as jnp
from jax import lax
from jax.experimental import pallas as pl
from jax.experimental.pallas import tpu as pltpu

# ---- hyper-parameters (module dicts unspecified -> our choice) -------------
NUM_STAGES = 2
NUM_SPKS = 2
WIN = 16          # encoder kernel size
HOP = 8           # encoder stride (WIN == 2*HOP -> exactly 2 overlap phases)
ENC_DIM = 64      # N (encoder channels)
FEAT_DIM = 32     # D (projected / separator feature dim)

PACK = 4          # frame-rows packed per kernel row -> 128-lane-dense stores
ROW_TILE = 512    # packed rows per grid step, encoder kernel  (= 2048 frames)
HEAD_TILE = 512   # packed rows per grid step, heads kernel    (= 2048 frames)
STAGE_TILE = 32   # frames per SSM chunk (bounds the (C,C,D) decay tensor)
SBLK = 8          # s-block size for the blocked EMA contraction


# ================== fused AudioEncoder + FeatureProjector ===================
# Operates on 4-row-packed frames; all weights are block-diagonal bf16 so the
# outputs are 256/128 lanes wide (fully dense vector stores).
def _enc_proj_kernel(f_ref, ew_ref, eb_ref, avg_ref, g_ref, be_ref,
                     pw_ref, pb_ref, enc_ref, proj_ref):
    f = f_ref[...]                                                  # (RT, 4*WIN)
    e = jnp.maximum(
        jnp.dot(f, ew_ref[...], preferred_element_type=jnp.float32)
        + eb_ref[...], 0.0)                                         # (RT, 4*N)
    e_bf = e.astype(jnp.bfloat16)
    # per-frame LayerNorm stats via a block-diagonal averaging matmul (MXU is
    # idle, avoids lane-slice/concat relayouts entirely).
    mu = jnp.dot(e_bf, avg_ref[...], preferred_element_type=jnp.float32)
    d = e - mu
    var = jnp.dot(jnp.square(d).astype(jnp.bfloat16), avg_ref[...],
                  preferred_element_type=jnp.float32)
    en = d * lax.rsqrt(var + 1e-5) * g_ref[...] + be_ref[...]
    p = jnp.dot(en.astype(jnp.bfloat16), pw_ref[...],
                preferred_element_type=jnp.float32) + pb_ref[...]   # (RT, 4*D)
    enc_ref[...] = e_bf
    proj_ref[...] = p.astype(proj_ref.dtype)


def encoder_projector(x, p):
    B, T = x.shape
    Tp = (T - WIN) // HOP + 1
    nblk = Tp + 1
    # frame t = samples [t*HOP, t*HOP+WIN) = blocks[t] ++ blocks[t+1]
    blocks = x[:, :nblk * HOP].reshape(B, nblk, HOP)
    frames = jnp.concatenate([blocks[:, :Tp], blocks[:, 1:Tp + 1]], axis=-1)
    R = B * Tp
    R4 = pl.cdiv(R, PACK)
    frames2d = frames.reshape(R, WIN).astype(jnp.bfloat16)
    if R4 * PACK != R:
        frames2d = jnp.pad(frames2d, ((0, R4 * PACK - R), (0, 0)))
    fpack = frames2d.reshape(R4, PACK * WIN)                 # free row-major reshape
    rt = min(R4, ROW_TILE)

    enc4, proj4 = pl.pallas_call(
        _enc_proj_kernel,
        grid=(pl.cdiv(R4, rt),),
        in_specs=[pl.BlockSpec((rt, PACK * WIN), lambda i: (i, 0)),
                  pl.BlockSpec((PACK * WIN, PACK * ENC_DIM), lambda i: (0, 0)),
                  pl.BlockSpec((1, PACK * ENC_DIM), lambda i: (0, 0)),
                  pl.BlockSpec((PACK * ENC_DIM, PACK * ENC_DIM), lambda i: (0, 0)),
                  pl.BlockSpec((1, PACK * ENC_DIM), lambda i: (0, 0)),
                  pl.BlockSpec((1, PACK * ENC_DIM), lambda i: (0, 0)),
                  pl.BlockSpec((PACK * ENC_DIM, PACK * FEAT_DIM), lambda i: (0, 0)),
                  pl.BlockSpec((1, PACK * FEAT_DIM), lambda i: (0, 0))],
        out_specs=[pl.BlockSpec((rt, PACK * ENC_DIM), lambda i: (i, 0)),
                   pl.BlockSpec((rt, PACK * FEAT_DIM), lambda i: (i, 0))],
        out_shape=[jax.ShapeDtypeStruct((R4, PACK * ENC_DIM), jnp.bfloat16),
                   jax.ShapeDtypeStruct((R4, PACK * FEAT_DIM), jnp.bfloat16)],
        compiler_params=pltpu.CompilerParams(
            dimension_semantics=("parallel",),
            vmem_limit_bytes=32 * 1024 * 1024),
    )(fpack, p['enc_w4'], p['enc_b4'], p['avg4'], p['ln_g4'], p['ln_b4'],
      p['proj_w4'], p['proj_b4'])

    proj = proj4.reshape(R4 * PACK, FEAT_DIM)[:R].reshape(B, Tp, FEAT_DIM)
    return enc4, proj, Tp, R, R4


# ================== Separator stage block (gated diagonal SSM) ==============
def _decay_tables(decay, tile):
    """Parameter-only decay tables, computed once per stage in XLA glue."""
    a = jnp.clip(jax.nn.sigmoid(decay[0]), 1e-6, 1.0 - 1e-6)        # (D,)
    log_a = jnp.log(a)
    d = jnp.arange(tile)[:, None] - jnp.arange(tile)[None, :]       # (tile, tile)
    L = jnp.where(d[:, :, None] >= 0,
                  jnp.exp(jnp.maximum(d, 0).astype(jnp.float32)[:, :, None] * log_a),
                  0.0) * (1.0 - a)                                   # (tile, tile, D)
    cp = jnp.exp((jnp.arange(tile, dtype=jnp.float32)[:, None] + 1.0) * log_a)
    return L.astype(jnp.float32), cp.astype(jnp.float32)


def _stage_kernel(x_ref, lg_ref, lb_ref, w1u_ref, b1u_ref, w1g_ref, b1g_ref,
                  L_ref, cp_ref, w2_ref, b2_ref, o_ref, h_carry):
    @pl.when(pl.program_id(1) == 0)
    def _():
        h_carry[...] = jnp.zeros_like(h_carry)

    gb, C, D = x_ref.shape
    lg, lb = lg_ref[...], lb_ref[...]
    w1u, b1u = w1u_ref[...], b1u_ref[...]
    w1g, b1g = w1g_ref[...], b1g_ref[...]
    w2, b2 = w2_ref[...], b2_ref[...]
    cp = cp_ref[...]                                                 # (C, D) = a^(t+1)

    for b in range(gb):                 # small static loop over batch rows in this block
        x = x_ref[b].astype(jnp.float32)                             # (C, D)
        mu = jnp.mean(x, axis=-1, keepdims=True)
        var = jnp.mean(jnp.square(x - mu), axis=-1, keepdims=True)
        xn = ((x - mu) * lax.rsqrt(var + 1e-5) * lg + lb).astype(jnp.bfloat16)

        u = jnp.dot(xn, w1u, preferred_element_type=jnp.float32) + b1u
        gz = jnp.dot(xn, w1g, preferred_element_type=jnp.float32) + b1g
        g = gz * jax.nn.sigmoid(gz)                                  # SiLU gate

        # causal EMA with the PRECOMPUTED decay tensor:
        #   h[t] = sum_{s<=t} a^(t-s)(1-a) u[s] + a^(t+1) h_carry
        if C > SBLK and C % SBLK == 0:
            def body(sb, acc):
                s0 = pl.multiple_of(sb * SBLK, SBLK)
                Lb = L_ref[:, pl.ds(s0, SBLK), :]                    # (C, SBLK, D)
                ub = lax.dynamic_slice_in_dim(u, s0, SBLK, axis=0)   # (SBLK, D)
                return acc + jnp.sum(Lb * ub[None, :, :], axis=1)
            h = lax.fori_loop(0, C // SBLK, body,
                              jnp.zeros((C, D), jnp.float32))
        else:
            h = jnp.sum(L_ref[...] * u[None, :, :], axis=1)          # (C, D)
        h = h + cp * h_carry[b:b + 1, :]
        h_carry[b:b + 1, :] = h[C - 1:C, :]                          # carry across chunks

        y = (h * g).astype(jnp.bfloat16)
        out = jnp.dot(y, w2, preferred_element_type=jnp.float32) + b2
        o_ref[b, :, :] = (x + out).astype(o_ref.dtype)               # residual


def _group_size(b, cap=8):
    g = min(b, cap)
    while b % g:
        g -= 1
    return g


def stage_block(x, sp):
    B, Ts, D = x.shape
    if Ts <= STAGE_TILE:
        tile, Tpad = Ts, Ts
    else:
        tile = STAGE_TILE
        Tpad = pl.cdiv(Ts, tile) * tile
    xp = x if Tpad == Ts else jnp.pad(x, ((0, 0), (0, Tpad - Ts), (0, 0)))
    L, cp = _decay_tables(sp['decay'], tile)          # hoisted out of the kernel
    gb = _group_size(B)                               # batch rows per grid step

    out = pl.pallas_call(
        _stage_kernel,
        grid=(B // gb, Tpad // tile),
        in_specs=[pl.BlockSpec((gb, tile, D), lambda b, t: (b, t, 0)),
                  pl.BlockSpec((1, D), lambda b, t: (0, 0)),
                  pl.BlockSpec((1, D), lambda b, t: (0, 0)),
                  pl.BlockSpec((D, D), lambda b, t: (0, 0)),
                  pl.BlockSpec((1, D), lambda b, t: (0, 0)),
                  pl.BlockSpec((D, D), lambda b, t: (0, 0)),
                  pl.BlockSpec((1, D), lambda b, t: (0, 0)),
                  pl.BlockSpec((tile, tile, D), lambda b, t: (0, 0, 0)),
                  pl.BlockSpec((tile, D), lambda b, t: (0, 0)),
                  pl.BlockSpec((D, D), lambda b, t: (0, 0)),
                  pl.BlockSpec((1, D), lambda b, t: (0, 0))],
        out_specs=pl.BlockSpec((gb, tile, D), lambda b, t: (b, t, 0)),
        out_shape=jax.ShapeDtypeStruct((B, Tpad, D), jnp.bfloat16),
        scratch_shapes=[pltpu.VMEM((gb, D), jnp.float32)],
        compiler_params=pltpu.CompilerParams(
            dimension_semantics=("parallel", "arbitrary")),
    )(xp, sp['ln_gamma'], sp['ln_beta'], sp['w1u'], sp['b1u'],
      sp['w1g'], sp['b1g'], L, cp, sp['w2'], sp['b2'])
    return out[:, :Ts]


def downsample2(x):                       # avg-pool stride 2 (explicit truncation)
    B, T, D = x.shape
    T2 = (T // 2) * 2
    return x[:, :T2].reshape(B, T2 // 2, 2, D).mean(axis=2)


def upsample_nearest(s, t_out):           # nearest upsample; repeat when exact
    t_in = s.shape[1]
    if t_out % t_in == 0:
        return jnp.repeat(s, t_out // t_in, axis=1)
    src = (jnp.arange(t_out) * t_in) // t_out
    return s[:, src, :]


# ============ fused OutputLayer (3 heads) + AudioDecoder (2 spks) ============
# Works on 4-row-packed features: s (128 lanes), enc (256), mask (512),
# decoder output (128) -- all unmasked lane-dense vector stores.
def _heads_kernel(alpha_ref, s_ref, e_ref, mw_ref, mb_ref, rep_ref, dw_ref, o_ref):
    h = pl.program_id(1)
    alpha = alpha_ref[h]                                           # SMEM scalar
    s = s_ref[0].astype(jnp.float32)                               # (FT, 4*D)
    y = jnp.where(s > 0, s, alpha * s).astype(jnp.bfloat16)        # PReLU
    m = jnp.maximum(
        jnp.dot(y, mw_ref[0], preferred_element_type=jnp.float32)
        + mb_ref[0], 0.0)                                          # (FT, 4*S*N)
    # replicate the encoder features per speaker via a 0/1 matmul (MXU is idle)
    e_rep = jnp.dot(e_ref[...], rep_ref[...],
                    preferred_element_type=jnp.float32)            # (FT, 4*S*N)
    masked = (m * e_rep).astype(jnp.bfloat16)
    dec = jnp.dot(masked, dw_ref[0], preferred_element_type=jnp.float32)
    o_ref[0] = dec.astype(o_ref.dtype)                             # (FT, 4*S*WIN)


def heads_forward(s4, enc4, hp):
    H, R4, _ = s4.shape
    ft = min(R4, HEAD_TILE)
    nt = pl.cdiv(R4, ft)
    return pl.pallas_call(
        _heads_kernel,
        grid=(nt, H),      # even row axis leads (v7x megacore); enc block re-used over h
        in_specs=[pl.BlockSpec(memory_space=pltpu.MemorySpace.SMEM),
                  pl.BlockSpec((1, ft, PACK * FEAT_DIM), lambda t, h: (h, t, 0)),
                  pl.BlockSpec((ft, PACK * ENC_DIM), lambda t, h: (t, 0)),
                  pl.BlockSpec((1, PACK * FEAT_DIM, PACK * NUM_SPKS * ENC_DIM),
                               lambda t, h: (h, 0, 0)),
                  pl.BlockSpec((1, 1, PACK * NUM_SPKS * ENC_DIM),
                               lambda t, h: (h, 0, 0)),
                  pl.BlockSpec((PACK * ENC_DIM, PACK * NUM_SPKS * ENC_DIM),
                               lambda t, h: (0, 0)),
                  pl.BlockSpec((1, PACK * NUM_SPKS * ENC_DIM, PACK * NUM_SPKS * WIN),
                               lambda t, h: (h, 0, 0))],
        out_specs=pl.BlockSpec((1, ft, PACK * NUM_SPKS * WIN),
                               lambda t, h: (h, t, 0)),
        out_shape=jax.ShapeDtypeStruct((H, R4, PACK * NUM_SPKS * WIN), jnp.float32),
        compiler_params=pltpu.CompilerParams(
            dimension_semantics=("parallel", "arbitrary"),
            vmem_limit_bytes=32 * 1024 * 1024),
    )(hp['alpha'], s4, enc4, hp['mask_w4'], hp['mask_b4'], hp['rep4'], hp['dec_w4'])


def overlap_add(y, bias):
    """Transposed-conv overlap-add; WIN == 2*HOP -> two phases, no scatter."""
    B, Tp, _ = y.shape
    left, right = y[..., :HOP], y[..., HOP:]
    z = jnp.zeros((B, 1, HOP), y.dtype)
    acc = jnp.concatenate([left, z], axis=1) + jnp.concatenate([z, right], axis=1)
    return acc.reshape(B, (Tp + 1) * HOP) + bias


# ============================ full Model.forward =============================
def model_forward(params, x):
    B, T = x.shape
    enc4, proj, Tp, R, R4 = encoder_projector(x, params)

    cur = proj
    each_stage = []
    for i in range(NUM_STAGES):
        cur = downsample2(cur)
        cur = stage_block(cur, params['stages'][i])
        each_stage.append(cur)
    last = upsample_nearest(cur, Tp)

    H = 1 + NUM_STAGES
    # head 0 = main output layer/decoder; heads 1.. = auxiliary per-stage heads
    s_list = [last] + [upsample_nearest(s, Tp) for s in each_stage]
    s_flat = jnp.stack(s_list, axis=0).reshape(H, R, FEAT_DIM)
    if R4 * PACK != R:
        s_flat = jnp.pad(s_flat, ((0, 0), (0, R4 * PACK - R), (0, 0)))
    s4 = s_flat.reshape(H, R4, PACK * FEAT_DIM).astype(jnp.bfloat16)

    dec4 = heads_forward(s4, enc4, params['heads'])        # (H, R4, 4*S*WIN)
    dec = dec4.reshape(H, R4 * PACK, NUM_SPKS, WIN)[:, :R]
    dec = dec.reshape(H, B, Tp, NUM_SPKS, WIN)
    dec_b = params['heads']['dec_b']

    audio = [overlap_add(dec[0, :, :, s], dec_b[0]) for s in range(NUM_SPKS)]
    audio_aux = []
    for i in range(NUM_STAGES):
        audio_aux.append(
            [overlap_add(dec[1 + i, :, :, s], dec_b[1 + i])[..., :T]
             for s in range(NUM_SPKS)])
    return audio, audio_aux


# ========================= deterministic parameters ==========================
def _block_diag(w, k):                    # (K, N) -> (k*K, k*N) block diagonal
    K, N = w.shape
    out = jnp.zeros((k, K, k, N), w.dtype)
    for i in range(k):
        out = out.at[i, :, i, :].set(w)
    return out.reshape(k * K, k * N)


def init_params(key):
    keys = iter(jax.random.split(key, 64))

    def rnd(shape, scale=0.2):
        return (scale * jax.random.normal(next(keys), shape)).astype(jnp.float32)

    # --- encoder / projector: kernel-ready 4-packed block-diagonal bf16 weights
    enc_w, enc_b = rnd((WIN, ENC_DIM)), rnd((1, ENC_DIM))
    proj_w, proj_b = rnd((ENC_DIM, FEAT_DIM)), rnd((1, FEAT_DIM))
    ln_g = jnp.ones((1, ENC_DIM), jnp.float32)
    ln_b = jnp.zeros((1, ENC_DIM), jnp.float32)
    avg = jnp.full((ENC_DIM, ENC_DIM), 1.0 / ENC_DIM, jnp.float32)

    def stage_params():
        return {'ln_gamma': jnp.ones((1, FEAT_DIM), jnp.float32),
                'ln_beta': jnp.zeros((1, FEAT_DIM), jnp.float32),
                'w1u': rnd((FEAT_DIM, FEAT_DIM)).astype(jnp.bfloat16),
                'b1u': rnd((1, FEAT_DIM)),
                'w1g': rnd((FEAT_DIM, FEAT_DIM)).astype(jnp.bfloat16),
                'b1g': rnd((1, FEAT_DIM)),
                'decay': rnd((1, FEAT_DIM)),
                'w2': rnd((FEAT_DIM, FEAT_DIM)).astype(jnp.bfloat16),
                'b2': rnd((1, FEAT_DIM))}

    H = 1 + NUM_STAGES
    mask_w = rnd((H, FEAT_DIM, NUM_SPKS * ENC_DIM))
    mask_b = rnd((H, 1, NUM_SPKS * ENC_DIM))
    dec_w = rnd((H, ENC_DIM, WIN))
    rep = jnp.tile(jnp.eye(ENC_DIM, dtype=jnp.float32), (1, NUM_SPKS))   # (N, S*N)

    heads = {
        'alpha': jnp.full((H,), 0.25, jnp.float32),
        'mask_w4': jnp.stack([_block_diag(mask_w[h], PACK)
                              for h in range(H)]).astype(jnp.bfloat16),
        'mask_b4': jnp.tile(mask_b, (1, 1, PACK)),
        'rep4': _block_diag(rep, PACK).astype(jnp.bfloat16),
        'dec_w4': jnp.stack([_block_diag(dec_w[h], NUM_SPKS * PACK)
                             for h in range(H)]).astype(jnp.bfloat16),
        'dec_b': jnp.zeros((H,), jnp.float32)}

    return {'enc_w4': _block_diag(enc_w, PACK).astype(jnp.bfloat16),
            'enc_b4': jnp.tile(enc_b, (1, PACK)),
            'avg4': _block_diag(avg, PACK).astype(jnp.bfloat16),
            'ln_g4': jnp.tile(ln_g, (1, PACK)),
            'ln_b4': jnp.tile(ln_b, (1, PACK)),
            'proj_w4': _block_diag(proj_w, PACK).astype(jnp.bfloat16),
            'proj_b4': jnp.tile(proj_b, (1, PACK)),
            'stages': [stage_params() for _ in range(NUM_STAGES)],
            'heads': heads}


if __name__ == "__main__":
    key = jax.random.PRNGKey(0)
    pkey, xkey = jax.random.split(key)
    params = init_params(pkey)

    B, T = 2, 136                        # -> Tp = (136-16)//8 + 1 = 16 frames
    x = jax.random.normal(xkey, (B, T), jnp.float32)

    audio, audio_aux = jax.jit(model_forward)(params, x)
    jax.block_until_ready((audio, audio_aux))

    Tp = (T - WIN) // HOP + 1
    assert len(audio) == NUM_SPKS and audio[0].shape == (B, (Tp - 1) * HOP + WIN)
    assert len(audio_aux) == NUM_STAGES and audio_aux[0][0].shape == (B, T)
    print("KERNEL_OK")
</pallas_src>

<mosaic_0001>
module attributes {stable_mosaic.version = 11 : i64} {
  func.func @_enc_proj_kernel(%arg0: i32, %arg1: memref<8x64xbf16, #tpu.memory_space<vmem>>, %arg2: memref<64x256xbf16, #tpu.memory_space<vmem>>, %arg3: memref<1x256xf32, #tpu.memory_space<vmem>>, %arg4: memref<256x256xbf16, #tpu.memory_space<vmem>>, %arg5: memref<1x256xf32, #tpu.memory_space<vmem>>, %arg6: memref<1x256xf32, #tpu.memory_space<vmem>>, %arg7: memref<256x128xbf16, #tpu.memory_space<vmem>>, %arg8: memref<1x128xf32, #tpu.memory_space<vmem>>, %arg9: memref<8x256xbf16, #tpu.memory_space<vmem>>, %arg10: memref<8x128xbf16, #tpu.memory_space<vmem>>) attributes {dimension_semantics = [#tpu.dimension_semantics<parallel>], iteration_bounds = array<i64: 1>, scalar_prefetch = 0 : i64, scratch_operands = 0 : i64, tpu.core_type = #tpu.core_type<tc>, window_params = [{transform_indices = @transform_0, window_bounds = array<i64: 8, 64>}, {pipeline_mode = #tpu.pipeline_mode<synchronous>, transform_indices = @transform_1, window_bounds = array<i64: 64, 256>}, {pipeline_mode = #tpu.pipeline_mode<synchronous>, transform_indices = @transform_2, window_bounds = array<i64: 1, 256>}, {pipeline_mode = #tpu.pipeline_mode<synchronous>, transform_indices = @transform_3, window_bounds = array<i64: 256, 256>}, {pipeline_mode = #tpu.pipeline_mode<synchronous>, transform_indices = @transform_4, window_bounds = array<i64: 1, 256>}, {pipeline_mode = #tpu.pipeline_mode<synchronous>, transform_indices = @transform_5, window_bounds = array<i64: 1, 256>}, {pipeline_mode = #tpu.pipeline_mode<synchronous>, transform_indices = @transform_6, window_bounds = array<i64: 256, 128>}, {pipeline_mode = #tpu.pipeline_mode<synchronous>, transform_indices = @transform_7, window_bounds = array<i64: 1, 128>}, {transform_indices = @transform_8, window_bounds = array<i64: 8, 256>}, {transform_indices = @transform_9, window_bounds = array<i64: 8, 128>}]} {
    %c0 = arith.constant 0 : index
    %c0_0 = arith.constant 0 : index
    %0 = vector.load %arg1[%c0, %c0_0] : memref<8x64xbf16, #tpu.memory_space<vmem>>, vector<8x64xbf16>
    %c0_1 = arith.constant 0 : index
    %c0_2 = arith.constant 0 : index
    %1 = vector.load %arg2[%c0_1, %c0_2] : memref<64x256xbf16, #tpu.memory_space<vmem>>, vector<64x256xbf16>
    %cst = arith.constant dense<0.000000e+00> : vector<8x256xf32>
    %2 = tpu.matmul %0, %1, %cst {dimension_numbers = #tpu.dot_dimension_numbers<[1], [0], [0], [1], [0, 0, 1, 1], [], []>} : vector<8x64xbf16>, vector<64x256xbf16>, vector<8x256xf32> -> vector<8x256xf32>
    %c0_3 = arith.constant 0 : index
    %c0_4 = arith.constant 0 : index
    %3 = vector.load %arg3[%c0_3, %c0_4] : memref<1x256xf32, #tpu.memory_space<vmem>>, vector<1x256xf32>
    %4 = vector.broadcast %3 : vector<1x256xf32> to vector<8x256xf32>
    %5 = arith.addf %2, %4 : vector<8x256xf32>
    %cst_5 = arith.constant 0.000000e+00 : f32
    %6 = vector.broadcast %cst_5 : f32 to vector<8x256xf32>
    %7 = arith.maximumf %5, %6 : vector<8x256xf32>
    %8 = arith.truncf %7 : vector<8x256xf32> to vector<8x256xbf16>
    %c0_6 = arith.constant 0 : index
    %c0_7 = arith.constant 0 : index
    %9 = vector.load %arg4[%c0_6, %c0_7] : memref<256x256xbf16, #tpu.memory_space<vmem>>, vector<256x256xbf16>
    %cst_8 = arith.constant dense<0.000000e+00> : vector<8x256xf32>
    %10 = tpu.matmul %8, %9, %cst_8 {dimension_numbers = #tpu.dot_dimension_numbers<[1], [0], [0], [1], [0, 0, 1, 1], [], []>} : vector<8x256xbf16>, vector<256x256xbf16>, vector<8x256xf32> -> vector<8x256xf32>
    %11 = arith.subf %7, %10 : vector<8x256xf32>
    %12 = arith.mulf %11, %11 : vector<8x256xf32>
    %13 = arith.truncf %12 : vector<8x256xf32> to vector<8x256xbf16>
    %c0_9 = arith.constant 0 : index
    %c0_10 = arith.constant 0 : index
    %14 = vector.load %arg4[%c0_9, %c0_10] : memref<256x256xbf16, #tpu.memory_space<vmem>>, vector<256x256xbf16>
    %cst_11 = arith.constant dense<0.000000e+00> : vector<8x256xf32>
    %15 = tpu.matmul %13, %14, %cst_11 {dimension_numbers = #tpu.dot_dimension_numbers<[1], [0], [0], [1], [0, 0, 1, 1], [], []>} : vector<8x256xbf16>, vector<256x256xbf16>, vector<8x256xf32> -> vector<8x256xf32>
    %cst_12 = arith.constant 9.99999974E-6 : f32
    %16 = vector.broadcast %cst_12 : f32 to vector<8x256xf32>
    %17 = arith.addf %15, %16 : vector<8x256xf32>
    %18 = math.rsqrt %17 : vector<8x256xf32>
    %19 = arith.mulf %11, %18 : vector<8x256xf32>
    %c0_13 = arith.constant 0 : index
    %c0_14 = arith.constant 0 : index
    %20 = vector.load %arg5[%c0_13, %c0_14] : memref<1x256xf32, #tpu.memory_space<vmem>>, vector<1x256xf32>
    %21 = vector.broadcast %20 : vector<1x256xf32> to vector<8x256xf32>
    %22 = arith.mulf %19, %21 : vector<8x256xf32>
    %c0_15 = arith.constant 0 : index
    %c0_16 = arith.constant 0 : index
    %23 = vector.load %arg6[%c0_15, %c0_16] : memref<1x256xf32, #tpu.memory_space<vmem>>, vector<1x256xf32>
    %24 = vector.broadcast %23 : vector<1x256xf32> to vector<8x256xf32>
    %25 = arith.addf %22, %24 : vector<8x256xf32>
    %26 = arith.truncf %25 : vector<8x256xf32> to vector<8x256xbf16>
    %c0_17 = arith.constant 0 : index
    %c0_18 = arith.constant 0 : index
    %27 = vector.load %arg7[%c0_17, %c0_18] : memref<256x128xbf16, #tpu.memory_space<vmem>>, vector<256x128xbf16>
    %cst_19 = arith.constant dense<0.000000e+00> : vector<8x128xf32>
    %28 = tpu.matmul %26, %27, %cst_19 {dimension_numbers = #tpu.dot_dimension_numbers<[1], [0], [0], [1], [0, 0, 1, 1], [], []>} : vector<8x256xbf16>, vector<256x128xbf16>, vector<8x128xf32> -> vector<8x128xf32>
    %c0_20 = arith.constant 0 : index
    %c0_21 = arith.constant 0 : index
    %29 = vector.load %arg8[%c0_20, %c0_21] : memref<1x128xf32, #tpu.memory_space<vmem>>, vector<1x128xf32>
    %30 = vector.broadcast %29 : vector<1x128xf32> to vector<8x128xf32>
    %31 = arith.addf %28, %30 : vector<8x128xf32>
    %c0_22 = arith.constant 0 : index
    %c0_23 = arith.constant 0 : index
    %32 = vector.load %arg9[%c0_22, %c0_23] : memref<8x256xbf16, #tpu.memory_space<vmem>>, vector<8x256xbf16>
    tpu.vector_store %arg9[%c0_22, %c0_23], %8 {strides = array<i32>} : memref<8x256xbf16, #tpu.memory_space<vmem>>, vector<8x256xbf16>,
    %33 = arith.truncf %31 : vector<8x128xf32> to vector<8x128xbf16>
    %c0_24 = arith.constant 0 : index
    %c0_25 = arith.constant 0 : index
    %34 = vector.load %arg10[%c0_24, %c0_25] : memref<8x128xbf16, #tpu.memory_space<vmem>>, vector<8x128xbf16>
    tpu.vector_store %arg10[%c0_24, %c0_25], %33 {strides = array<i32>} : memref<8x128xbf16, #tpu.memory_space<vmem>>, vector<8x128xbf16>,
    return
  }
  func.func @transform_0(%arg0: i32) -> (i32, i32) {
    %c0_i32 = arith.constant 0 : i32
    %c0_i32_0 = arith.constant 0 : i32
    return %arg0, %c0_i32 : i32, i32
  }
  func.func @transform_1(%arg0: i32) -> (i32, i32) {
    %c0_i32 = arith.constant 0 : i32
    %c0_i32_0 = arith.constant 0 : i32
    %c0_i32_1 = arith.constant 0 : i32
    return %c0_i32, %c0_i32_0 : i32, i32
  }
  func.func @transform_2(%arg0: i32) -> (i32, i32) {
    %c0_i32 = arith.constant 0 : i32
    %c0_i32_0 = arith.constant 0 : i32
    %c0_i32_1 = arith.constant 0 : i32
    return %c0_i32, %c0_i32_0 : i32, i32
  }
  func.func @transform_3(%arg0: i32) -> (i32, i32) {
    %c0_i32 = arith.constant 0 : i32
    %c0_i32_0 = arith.constant 0 : i32
    %c0_i32_1 = arith.constant 0 : i32
    return %c0_i32, %c0_i32_0 : i32, i32
  }
  func.func @transform_4(%arg0: i32) -> (i32, i32) {
    %c0_i32 = arith.constant 0 : i32
    %c0_i32_0 = arith.constant 0 : i32
    %c0_i32_1 = arith.constant 0 : i32
    return %c0_i32, %c0_i32_0 : i32, i32
  }
  func.func @transform_5(%arg0: i32) -> (i32, i32) {
    %c0_i32 = arith.constant 0 : i32
    %c0_i32_0 = arith.constant 0 : i32
    %c0_i32_1 = arith.constant 0 : i32
    return %c0_i32, %c0_i32_0 : i32, i32
  }
  func.func @transform_6(%arg0: i32) -> (i32, i32) {
    %c0_i32 = arith.constant 0 : i32
    %c0_i32_0 = arith.constant 0 : i32
    %c0_i32_1 = arith.constant 0 : i32
    return %c0_i32, %c0_i32_0 : i32, i32
  }
  func.func @transform_7(%arg0: i32) -> (i32, i32) {
    %c0_i32 = arith.constant 0 : i32
    %c0_i32_0 = arith.constant 0 : i32
    %c0_i32_1 = arith.constant 0 : i32
    return %c0_i32, %c0_i32_0 : i32, i32
  }
  func.func @transform_8(%arg0: i32) -> (i32, i32) {
    %c0_i32 = arith.constant 0 : i32
    %c0_i32_0 = arith.constant 0 : i32
    return %arg0, %c0_i32 : i32, i32
  }
  func.func @transform_9(%arg0: i32) -> (i32, i32) {
    %c0_i32 = arith.constant 0 : i32
    %c0_i32_0 = arith.constant 0 : i32
    return %arg0, %c0_i32 : i32, i32
  }
}

module attributes {stable_mosaic.version = 11 : i64} {
  func.func @_stage_kernel(%arg0: i32, %arg1: i32, %arg2: memref<2x8x32xbf16, #tpu.memory_space<vmem>>, %arg3: memref<1x32xf32, #tpu.memory_space<vmem>>, %arg4: memref<1x32xf32, #tpu.memory_space<vmem>>, %arg5: memref<32x32xbf16, #tpu.memory_space<vmem>>, %arg6: memref<1x32xf32, #tpu.memory_space<vmem>>, %arg7: memref<32x32xbf16, #tpu.memory_space<vmem>>, %arg8: memref<1x32xf32, #tpu.memory_space<vmem>>, %arg9: memref<8x8x32xf32, #tpu.memory_space<vmem>>, %arg10: memref<8x32xf32, #tpu.memory_space<vmem>>, %arg11: memref<32x32xbf16, #tpu.memory_space<vmem>>, %arg12: memref<1x32xf32, #tpu.memory_space<vmem>>, %arg13: memref<2x8x32xbf16, #tpu.memory_space<vmem>>, %arg14: memref<2x32xf32, #tpu.memory_space<vmem>>) attributes {dimension_semantics = [#tpu.dimension_semantics<parallel>, #tpu.dimension_semantics<arbitrary>], iteration_bounds = array<i64: 1, 1>, scalar_prefetch = 0 : i64, scratch_operands = 1 : i64, tpu.core_type = #tpu.core_type<tc>, window_params = [{transform_indices = @transform_0, window_bounds = array<i64: 2, 8, 32>}, {pipeline_mode = #tpu.pipeline_mode<synchronous>, transform_indices = @transform_1, window_bounds = array<i64: 1, 32>}, {pipeline_mode = #tpu.pipeline_mode<synchronous>, transform_indices = @transform_2, window_bounds = array<i64: 1, 32>}, {pipeline_mode = #tpu.pipeline_mode<synchronous>, transform_indices = @transform_3, window_bounds = array<i64: 32, 32>}, {pipeline_mode = #tpu.pipeline_mode<synchronous>, transform_indices = @transform_4, window_bounds = array<i64: 1, 32>}, {pipeline_mode = #tpu.pipeline_mode<synchronous>, transform_indices = @transform_5, window_bounds = array<i64: 32, 32>}, {pipeline_mode = #tpu.pipeline_mode<synchronous>, transform_indices = @transform_6, window_bounds = array<i64: 1, 32>}, {pipeline_mode = #tpu.pipeline_mode<synchronous>, transform_indices = @transform_7, window_bounds = array<i64: 8, 8, 32>}, {pipeline_mode = #tpu.pipeline_mode<synchronous>, transform_indices = @transform_8, window_bounds = array<i64: 8, 32>}, {pipeline_mode = #tpu.pipeline_mode<synchronous>, transform_indices = @transform_9, window_bounds = array<i64: 32, 32>}, {pipeline_mode = #tpu.pipeline_mode<synchronous>, transform_indices = @transform_10, window_bounds = array<i64: 1, 32>}, {transform_indices = @transform_11, window_bounds = array<i64: 2, 8, 32>}]} {
    %c0_i32 = arith.constant 0 : i32
    %0 = arith.cmpi eq, %arg1, %c0_i32 : i32
    %1 = arith.extui %0 : i1 to i32
    %c0_i32_0 = arith.constant 0 : i32
    %2 = arith.cmpi ne, %1, %c0_i32_0 : i32
    scf.if %2 {
      %cst_62 = arith.constant 0.000000e+00 : f32
      %130 = vector.broadcast %cst_62 : f32 to vector<2x32xf32>
      %c0_63 = arith.constant 0 : index
      %c0_64 = arith.constant 0 : index
      %131 = vector.load %arg14[%c0_63, %c0_64] : memref<2x32xf32, #tpu.memory_space<vmem>>, vector<2x32xf32>
      tpu.vector_store %arg14[%c0_63, %c0_64], %130 {strides = array<i32>} : memref<2x32xf32, #tpu.memory_space<vmem>>, vector<2x32xf32>,
    } else {
    }
    %c0 = arith.constant 0 : index
    %c0_1 = arith.constant 0 : index
    %3 = vector.load %arg3[%c0, %c0_1] : memref<1x32xf32, #tpu.memory_space<vmem>>, vector<1x32xf32>
    %c0_2 = arith.constant 0 : index
    %c0_3 = arith.constant 0 : index
    %4 = vector.load %arg4[%c0_2, %c0_3] : memref<1x32xf32, #tpu.memory_space<vmem>>, vector<1x32xf32>
    %c0_4 = arith.constant 0 : index
    %c0_5 = arith.constant 0 : index
    %5 = vector.load %arg5[%c0_4, %c0_5] : memref<32x32xbf16, #tpu.memory_space<vmem>>, vector<32x32xbf16>
    %c0_6 = arith.constant 0 : index
    %c0_7 = arith.constant 0 : index
    %6 = vector.load %arg6[%c0_6, %c0_7] : memref<1x32xf32, #tpu.memory_space<vmem>>, vector<1x32xf32>
    %c0_8 = arith.constant 0 : index
    %c0_9 = arith.constant 0 : index
    %7 = vector.load %arg7[%c0_8, %c0_9] : memref<32x32xbf16, #tpu.memory_space<vmem>>, vector<32x32xbf16>
    %c0_10 = arith.constant 0 : index
    %c0_11 = arith.constant 0 : index
    %8 = vector.load %arg8[%c0_10, %c0_11] : memref<1x32xf32, #tpu.memory_space<vmem>>, vector<1x32xf32>
    %c0_12 = arith.constant 0 : index
    %c0_13 = arith.constant 0 : index
    %9 = vector.load %arg11[%c0_12, %c0_13] : memref<32x32xbf16, #tpu.memory_space<vmem>>, vector<32x32xbf16>
    %c0_14 = arith.constant 0 : index
    %c0_15 = arith.constant 0 : index
    %10 = vector.load %arg12[%c0_14, %c0_15] : memref<1x32xf32, #tpu.memory_space<vmem>>, vector<1x32xf32>
    %c0_16 = arith.constant 0 : index
    %c0_17 = arith.constant 0 : index
    %11 = vector.load %arg10[%c0_16, %c0_17] : memref<8x32xf32, #tpu.memory_space<vmem>>, vector<8x32xf32>
    %c0_18 = arith.constant 0 : index
    %c0_19 = arith.constant 0 : index
    %c0_20 = arith.constant 0 : index
    %12 = vector.load %arg2[%c0_18, %c0_19, %c0_20] : memref<2x8x32xbf16, #tpu.memory_space<vmem>>, vector<1x8x32xbf16>
    %13 = vector.shape_cast %12 : vector<1x8x32xbf16> to vector<8x32xbf16>
    %14 = arith.extf %13 : vector<8x32xbf16> to vector<8x32xf32>
    %cst = arith.constant dense<0.000000e+00> : vector<8xf32>
    %15 = vector.multi_reduction <add>, %14, %cst [1] : vector<8x32xf32> to vector<8xf32>
    %16 = vector.shape_cast %15 : vector<8xf32> to vector<8x1xf32>
    %cst_21 = arith.constant 3.200000e+01 : f32
    %17 = vector.broadcast %cst_21 : f32 to vector<8x1xf32>
    %18 = arith.divf %16, %17 : vector<8x1xf32>
    %19 = vector.broadcast %18 : vector<8x1xf32> to vector<8x32xf32>
    %20 = arith.subf %14, %19 : vector<8x32xf32>
    %21 = arith.mulf %20, %20 : vector<8x32xf32>
    %cst_22 = arith.constant dense<0.000000e+00> : vector<8xf32>
    %22 = vector.multi_reduction <add>, %21, %cst_22 [1] : vector<8x32xf32> to vector<8xf32>
    %23 = vector.shape_cast %22 : vector<8xf32> to vector<8x1xf32>
    %cst_23 = arith.constant 3.200000e+01 : f32
    %24 = vector.broadcast %cst_23 : f32 to vector<8x1xf32>
    %25 = arith.divf %23, %24 : vector<8x1xf32>
    %26 = vector.broadcast %18 : vector<8x1xf32> to vector<8x32xf32>
    %27 = arith.subf %14, %26 : vector<8x32xf32>
    %cst_24 = arith.constant 9.99999974E-6 : f32
    %28 = vector.broadcast %cst_24 : f32 to vector<8x1xf32>
    %29 = arith.addf %25, %28 : vector<8x1xf32>
    %30 = math.rsqrt %29 : vector<8x1xf32>
    %31 = vector.broadcast %30 : vector<8x1xf32> to vector<8x32xf32>
    %32 = arith.mulf %27, %31 : vector<8x32xf32>
    %33 = vector.broadcast %3 : vector<1x32xf32> to vector<8x32xf32>
    %34 = arith.mulf %32, %33 : vector<8x32xf32>
    %35 = vector.broadcast %4 : vector<1x32xf32> to vector<8x32xf32>
    %36 = arith.addf %34, %35 : vector<8x32xf32>
    %37 = arith.truncf %36 : vector<8x32xf32> to vector<8x32xbf16>
    %cst_25 = arith.constant dense<0.000000e+00> : vector<8x32xf32>
    %38 = tpu.matmul %37, %5, %cst_25 {dimension_numbers = #tpu.dot_dimension_numbers<[1], [0], [0], [1], [0, 0, 1, 1], [], []>} : vector<8x32xbf16>, vector<32x32xbf16>, vector<8x32xf32> -> vector<8x32xf32>
    %39 = vector.broadcast %6 : vector<1x32xf32> to vector<8x32xf32>
    %40 = arith.addf %38, %39 : vector<8x32xf32>
    %cst_26 = arith.constant dense<0.000000e+00> : vector<8x32xf32>
    %41 = tpu.matmul %37, %7, %cst_26 {dimension_numbers = #tpu.dot_dimension_numbers<[1], [0], [0], [1], [0, 0, 1, 1], [], []>} : vector<8x32xbf16>, vector<32x32xbf16>, vector<8x32xf32> -> vector<8x32xf32>
    %42 = vector.broadcast %8 : vector<1x32xf32> to vector<8x32xf32>
    %43 = arith.addf %41, %42 : vector<8x32xf32>
    %44 = arith.negf %43 : vector<8x32xf32>
    %45 = math.exp %44 : vector<8x32xf32>
    %cst_27 = arith.constant 1.000000e+00 : f32
    %46 = vector.broadcast %cst_27 : f32 to vector<8x32xf32>
    %47 = arith.addf %46, %45 : vector<8x32xf32>
    %48 = arith.divf %46, %47 : vector<8x32xf32>
    %49 = arith.mulf %43, %48 : vector<8x32xf32>
    %c0_28 = arith.constant 0 : index
    %c0_29 = arith.constant 0 : index
    %c0_30 = arith.constant 0 : index
    %50 = vector.load %arg9[%c0_28, %c0_29, %c0_30] : memref<8x8x32xf32, #tpu.memory_space<vmem>>, vector<8x8x32xf32>
    %51 = vector.shape_cast %40 : vector<8x32xf32> to vector<1x8x32xf32>
    %52 = vector.broadcast %51 : vector<1x8x32xf32> to vector<8x8x32xf32>
    %53 = arith.mulf %50, %52 : vector<8x8x32xf32>
    %cst_31 = arith.constant dense<0.000000e+00> : vector<8x32xf32>
    %54 = vector.multi_reduction <add>, %53, %cst_31 [1] : vector<8x8x32xf32> to vector<8x32xf32>
    %c0_32 = arith.constant 0 : index
    %c0_33 = arith.constant 0 : index
    %55 = vector.load %arg14[%c0_32, %c0_33] : memref<2x32xf32, #tpu.memory_space<vmem>>, vector<1x32xf32>
    %56 = vector.broadcast %55 : vector<1x32xf32> to vector<8x32xf32>
    %57 = arith.mulf %11, %56 : vector<8x32xf32>
    %58 = arith.addf %54, %57 : vector<8x32xf32>
    %59 = vector.extract_strided_slice %58 {offsets = [7, 0], sizes = [1, 32], strides = [1, 1]} : vector<8x32xf32> to vector<1x32xf32>
    %c0_34 = arith.constant 0 : index
    %c0_35 = arith.constant 0 : index
    %60 = vector.load %arg14[%c0_34, %c0_35] : memref<2x32xf32, #tpu.memory_space<vmem>>, vector<1x32xf32>
    tpu.vector_store %arg14[%c0_34, %c0_35], %59 {strides = array<i32>} : memref<2x32xf32, #tpu.memory_space<vmem>>, vector<1x32xf32>,
    %61 = arith.mulf %58, %49 : vector<8x32xf32>
    %62 = arith.truncf %61 : vector<8x32xf32> to vector<8x32xbf16>
    %cst_36 = arith.constant dense<0.000000e+00> : vector<8x32xf32>
    %63 = tpu.matmul %62, %9, %cst_36 {dimension_numbers = #tpu.dot_dimension_numbers<[1], [0], [0], [1], [0, 0, 1, 1], [], []>} : vector<8x32xbf16>, vector<32x32xbf16>, vector<8x32xf32> -> vector<8x32xf32>
    %64 = vector.broadcast %10 : vector<1x32xf32> to vector<8x32xf32>
    %65 = arith.addf %63, %64 : vector<8x32xf32>
    %66 = arith.addf %14, %65 : vector<8x32xf32>
    %67 = arith.truncf %66 : vector<8x32xf32> to vector<8x32xbf16>
    %c0_37 = arith.constant 0 : index
    %c0_38 = arith.constant 0 : index
    %c0_39 = arith.constant 0 : index
    %68 = vector.load %arg13[%c0_37, %c0_38, %c0_39] : memref<2x8x32xbf16, #tpu.memory_space<vmem>>, vector<1x8x32xbf16>
    %69 = vector.shape_cast %68 : vector<1x8x32xbf16> to vector<8x32xbf16>
    %70 = vector.shape_cast %67 : vector<8x32xbf16> to vector<1x8x32xbf16>
    tpu.vector_store %arg13[%c0_37, %c0_38, %c0_39], %70 {strides = array<i32>} : memref<2x8x32xbf16, #tpu.memory_space<vmem>>, vector<1x8x32xbf16>,
    %c1 = arith.constant 1 : index
    %c0_40 = arith.constant 0 : index
    %c0_41 = arith.constant 0 : index
    %71 = vector.load %arg2[%c1, %c0_40, %c0_41] : memref<2x8x32xbf16, #tpu.memory_space<vmem>>, vector<1x8x32xbf16>
    %72 = vector.shape_cast %71 : vector<1x8x32xbf16> to vector<8x32xbf16>
    %73 = arith.extf %72 : vector<8x32xbf16> to vector<8x32xf32>
    %cst_42 = arith.constant dense<0.000000e+00> : vector<8xf32>
    %74 = vector.multi_reduction <add>, %73, %cst_42 [1] : vector<8x32xf32> to vector<8xf32>
    %75 = vector.shape_cast %74 : vector<8xf32> to vector<8x1xf32>
    %cst_43 = arith.constant 3.200000e+01 : f32
    %76 = vector.broadcast %cst_43 : f32 to vector<8x1xf32>
    %77 = arith.divf %75, %76 : vector<8x1xf32>
    %78 = vector.broadcast %77 : vector<8x1xf32> to vector<8x32xf32>
    %79 = arith.subf %73, %78 : vector<8x32xf32>
    %80 = arith.mulf %79, %79 : vector<8x32xf32>
    %cst_44 = arith.constant dense<0.000000e+00> : vector<8xf32>
    %81 = vector.multi_reduction <add>, %80, %cst_44 [1] : vector<8x32xf32> to vector<8xf32>
    %82 = vector.shape_cast %81 : vector<8xf32> to vector<8x1xf32>
    %cst_45 = arith.constant 3.200000e+01 : f32
    %83 = vector.broadcast %cst_45 : f32 to vector<8x1xf32>
    %84 = arith.divf %82, %83 : vector<8x1xf32>
    %85 = vector.broadcast %77 : vector<8x1xf32> to vector<8x32xf32>
    %86 = arith.subf %73, %85 : vector<8x32xf32>
    %cst_46 = arith.constant 9.99999974E-6 : f32
    %87 = vector.broadcast %cst_46 : f32 to vector<8x1xf32>
    %88 = arith.addf %84, %87 : vector<8x1xf32>
    %89 = math.rsqrt %88 : vector<8x1xf32>
    %90 = vector.broadcast %89 : vector<8x1xf32> to vector<8x32xf32>
    %91 = arith.mulf %86, %90 : vector<8x32xf32>
    %92 = vector.broadcast %3 : vector<1x32xf32> to vector<8x32xf32>
    %93 = arith.mulf %91, %92 : vector<8x32xf32>
    %94 = vector.broadcast %4 : vector<1x32xf32> to vector<8x32xf32>
    %95 = arith.addf %93, %94 : vector<8x32xf32>
    %96 = arith.truncf %95 : vector<8x32xf32> to vector<8x32xbf16>
    %cst_47 = arith.constant dense<0.000000e+00> : vector<8x32xf32>
    %97 = tpu.matmul %96, %5, %cst_47 {dimension_numbers = #tpu.dot_dimension_numbers<[1], [0], [0], [1], [0, 0, 1, 1], [], []>} : vector<8x32xbf16>, vector<32x32xbf16>, vector<8x32xf32> -> vector<8x32xf32>
    %98 = vector.broadcast %6 : vector<1x32xf32> to vector<8x32xf32>
    %99 = arith.addf %97, %98 : vector<8x32xf32>
    %cst_48 = arith.constant dense<0.000000e+00> : vector<8x32xf32>
    %100 = tpu.matmul %96, %7, %cst_48 {dimension_numbers = #tpu.dot_dimension_numbers<[1], [0], [0], [1], [0, 0, 1, 1], [], []>} : vector<8x32xbf16>, vector<32x32xbf16>, vector<8x32xf32> -> vector<8x32xf32>
    %101 = vector.broadcast %8 : vector<1x32xf32> to vector<8x32xf32>
    %102 = arith.addf %100, %101 : vector<8x32xf32>
    %103 = arith.negf %102 : vector<8x32xf32>
    %104 = math.exp %103 : vector<8x32xf32>
    %cst_49 = arith.constant 1.000000e+00 : f32
    %105 = vector.broadcast %cst_49 : f32 to vector<8x32xf32>
    %106 = arith.addf %105, %104 : vector<8x32xf32>
    %107 = arith.divf %105, %106 : vector<8x32xf32>
    %108 = arith.mulf %102, %107 : vector<8x32xf32>
    %c0_50 = arith.constant 0 : index
    %c0_51 = arith.constant 0 : index
    %c0_52 = arith.constant 0 : index
    %109 = vector.load %arg9[%c0_50, %c0_51, %c0_52] : memref<8x8x32xf32, #tpu.memory_space<vmem>>, vector<8x8x32xf32>
    %110 = vector.shape_cast %99 : vector<8x32xf32> to vector<1x8x32xf32>
    %111 = vector.broadcast %110 : vector<1x8x32xf32> to vector<8x8x32xf32>
    %112 = arith.mulf %109, %111 : vector<8x8x32xf32>
    %cst_53 = arith.constant dense<0.000000e+00> : vector<8x32xf32>
    %113 = vector.multi_reduction <add>, %112, %cst_53 [1] : vector<8x8x32xf32> to vector<8x32xf32>
    %c1_54 = arith.constant 1 : index
    %c0_55 = arith.constant 0 : index
    %114 = vector.load %arg14[%c1_54, %c0_55] : memref<2x32xf32, #tpu.memory_space<vmem>>, vector<1x32xf32>
    %115 = vector.broadcast %114 : vector<1x32xf32> to vector<8x32xf32>
    %116 = arith.mulf %11, %115 : vector<8x32xf32>
    %117 = arith.addf %113, %116 : vector<8x32xf32>
    %118 = vector.extract_strided_slice %117 {offsets = [7, 0], sizes = [1, 32], strides = [1, 1]} : vector<8x32xf32> to vector<1x32xf32>
    %c1_56 = arith.constant 1 : index
    %c0_57 = arith.constant 0 : index
    %119 = vector.load %arg14[%c1_56, %c0_57] : memref<2x32xf32, #tpu.memory_space<vmem>>, vector<1x32xf32>
    tpu.vector_store %arg14[%c1_56, %c0_57], %118 {strides = array<i32>} : memref<2x32xf32, #tpu.memory_space<vmem>>, vector<1x32xf32>,
    %120 = arith.mulf %117, %108 : vector<8x32xf32>
    %121 = arith.truncf %120 : vector<8x32xf32> to vector<8x32xbf16>
    %cst_58 = arith.constant dense<0.000000e+00> : vector<8x32xf32>
    %122 = tpu.matmul %121, %9, %cst_58 {dimension_numbers = #tpu.dot_dimension_numbers<[1], [0], [0], [1], [0, 0, 1, 1], [], []>} : vector<8x32xbf16>, vector<32x32xbf16>, vector<8x32xf32> -> vector<8x32xf32>
    %123 = vector.broadcast %10 : vector<1x32xf32> to vector<8x32xf32>
    %124 = arith.addf %122, %123 : vector<8x32xf32>
    %125 = arith.addf %73, %124 : vector<8x32xf32>
    %126 = arith.truncf %125 : vector<8x32xf32> to vector<8x32xbf16>
    %c1_59 = arith.constant 1 : index
    %c0_60 = arith.constant 0 : index
    %c0_61 = arith.constant 0 : index
    %127 = vector.load %arg13[%c1_59, %c0_60, %c0_61] : memref<2x8x32xbf16, #tpu.memory_space<vmem>>, vector<1x8x32xbf16>
    %128 = vector.shape_cast %127 : vector<1x8x32xbf16> to vector<8x32xbf16>
    %129 = vector.shape_cast %126 : vector<8x32xbf16> to vector<1x8x32xbf16>
    tpu.vector_store %arg13[%c1_59, %c0_60, %c0_61], %129 {strides = array<i32>} : memref<2x8x32xbf16, #tpu.memory_space<vmem>>, vector<1x8x32xbf16>,
    return
  }
  func.func @transform_0(%arg0: i32, %arg1: i32) -> (i32, i32, i32) {
    %c0_i32 = arith.constant 0 : i32
    %c0_i32_0 = arith.constant 0 : i32
    return %arg0, %arg1, %c0_i32 : i32, i32, i32
  }
  func.func @transform_1(%arg0: i32, %arg1: i32) -> (i32, i32) {
    %c0_i32 = arith.constant 0 : i32
    %c0_i32_0 = arith.constant 0 : i32
    %c0_i32_1 = arith.constant 0 : i32
    return %c0_i32, %c0_i32_0 : i32, i32
  }
  func.func @transform_2(%arg0: i32, %arg1: i32) -> (i32, i32) {
    %c0_i32 = arith.constant 0 : i32
    %c0_i32_0 = arith.constant 0 : i32
    %c0_i32_1 = arith.constant 0 : i32
    return %c0_i32, %c0_i32_0 : i32, i32
  }
  func.func @transform_3(%arg0: i32, %arg1: i32) -> (i32, i32) {
    %c0_i32 = arith.constant 0 : i32
    %c0_i32_0 = arith.constant 0 : i32
    %c0_i32_1 = arith.constant 0 : i32
    return %c0_i32, %c0_i32_0 : i32, i32
  }
  func.func @transform_4(%arg0: i32, %arg1: i32) -> (i32, i32) {
    %c0_i32 = arith.constant 0 : i32
    %c0_i32_0 = arith.constant 0 : i32
    %c0_i32_1 = arith.constant 0 : i32
    return %c0_i32, %c0_i32_0 : i32, i32
  }
  func.func @transform_5(%arg0: i32, %arg1: i32) -> (i32, i32) {
    %c0_i32 = arith.constant 0 : i32
    %c0_i32_0 = arith.constant 0 : i32
    %c0_i32_1 = arith.constant 0 : i32
    return %c0_i32, %c0_i32_0 : i32, i32
  }
  func.func @transform_6(%arg0: i32, %arg1: i32) -> (i32, i32) {
    %c0_i32 = arith.constant 0 : i32
    %c0_i32_0 = arith.constant 0 : i32
    %c0_i32_1 = arith.constant 0 : i32
    return %c0_i32, %c0_i32_0 : i32, i32
  }
  func.func @transform_7(%arg0: i32, %arg1: i32) -> (i32, i32, i32) {
    %c0_i32 = arith.constant 0 : i32
    %c0_i32_0 = arith.constant 0 : i32
    %c0_i32_1 = arith.constant 0 : i32
    %c0_i32_2 = arith.constant 0 : i32
    return %c0_i32, %c0_i32_0, %c0_i32_1 : i32, i32, i32
  }
  func.func @transform_8(%arg0: i32, %arg1: i32) -> (i32, i32) {
    %c0_i32 = arith.constant 0 : i32
    %c0_i32_0 = arith.constant 0 : i32
    %c0_i32_1 = arith.constant 0 : i32
    return %c0_i32, %c0_i32_0 : i32, i32
  }
  func.func @transform_9(%arg0: i32, %arg1: i32) -> (i32, i32) {
    %c0_i32 = arith.constant 0 : i32
    %c0_i32_0 = arith.constant 0 : i32
    %c0_i32_1 = arith.constant 0 : i32
    return %c0_i32, %c0_i32_0 : i32, i32
  }
  func.func @transform_10(%arg0: i32, %arg1: i32) -> (i32, i32) {
    %c0_i32 = arith.constant 0 : i32
    %c0_i32_0 = arith.constant 0 : i32
    %c0_i32_1 = arith.constant 0 : i32
    return %c0_i32, %c0_i32_0 : i32, i32
  }
  func.func @transform_11(%arg0: i32, %arg1: i32) -> (i32, i32, i32) {
    %c0_i32 = arith.constant 0 : i32
    %c0_i32_0 = arith.constant 0 : i32
    return %arg0, %arg1, %c0_i32 : i32, i32, i32
  }
}

module attributes {stable_mosaic.version = 11 : i64} {
  func.func @_stage_kernel(%arg0: i32, %arg1: i32, %arg2: memref<2x4x32xbf16, #tpu.memory_space<vmem>>, %arg3: memref<1x32xf32, #tpu.memory_space<vmem>>, %arg4: memref<1x32xf32, #tpu.memory_space<vmem>>, %arg5: memref<32x32xbf16, #tpu.memory_space<vmem>>, %arg6: memref<1x32xf32, #tpu.memory_space<vmem>>, %arg7: memref<32x32xbf16, #tpu.memory_space<vmem>>, %arg8: memref<1x32xf32, #tpu.memory_space<vmem>>, %arg9: memref<4x4x32xf32, #tpu.memory_space<vmem>>, %arg10: memref<4x32xf32, #tpu.memory_space<vmem>>, %arg11: memref<32x32xbf16, #tpu.memory_space<vmem>>, %arg12: memref<1x32xf32, #tpu.memory_space<vmem>>, %arg13: memref<2x4x32xbf16, #tpu.memory_space<vmem>>, %arg14: memref<2x32xf32, #tpu.memory_space<vmem>>) attributes {dimension_semantics = [#tpu.dimension_semantics<parallel>, #tpu.dimension_semantics<arbitrary>], iteration_bounds = array<i64: 1, 1>, scalar_prefetch = 0 : i64, scratch_operands = 1 : i64, tpu.core_type = #tpu.core_type<tc>, window_params = [{transform_indices = @transform_0, window_bounds = array<i64: 2, 4, 32>}, {pipeline_mode = #tpu.pipeline_mode<synchronous>, transform_indices = @transform_1, window_bounds = array<i64: 1, 32>}, {pipeline_mode = #tpu.pipeline_mode<synchronous>, transform_indices = @transform_2, window_bounds = array<i64: 1, 32>}, {pipeline_mode = #tpu.pipeline_mode<synchronous>, transform_indices = @transform_3, window_bounds = array<i64: 32, 32>}, {pipeline_mode = #tpu.pipeline_mode<synchronous>, transform_indices = @transform_4, window_bounds = array<i64: 1, 32>}, {pipeline_mode = #tpu.pipeline_mode<synchronous>, transform_indices = @transform_5, window_bounds = array<i64: 32, 32>}, {pipeline_mode = #tpu.pipeline_mode<synchronous>, transform_indices = @transform_6, window_bounds = array<i64: 1, 32>}, {pipeline_mode = #tpu.pipeline_mode<synchronous>, transform_indices = @transform_7, window_bounds = array<i64: 4, 4, 32>}, {pipeline_mode = #tpu.pipeline_mode<synchronous>, transform_indices = @transform_8, window_bounds = array<i64: 4, 32>}, {pipeline_mode = #tpu.pipeline_mode<synchronous>, transform_indices = @transform_9, window_bounds = array<i64: 32, 32>}, {pipeline_mode = #tpu.pipeline_mode<synchronous>, transform_indices = @transform_10, window_bounds = array<i64: 1, 32>}, {transform_indices = @transform_11, window_bounds = array<i64: 2, 4, 32>}]} {
    %c0_i32 = arith.constant 0 : i32
    %0 = arith.cmpi eq, %arg1, %c0_i32 : i32
    %1 = arith.extui %0 : i1 to i32
    %c0_i32_0 = arith.constant 0 : i32
    %2 = arith.cmpi ne, %1, %c0_i32_0 : i32
    scf.if %2 {
      %cst_62 = arith.constant 0.000000e+00 : f32
      %130 = vector.broadcast %cst_62 : f32 to vector<2x32xf32>
      %c0_63 = arith.constant 0 : index
      %c0_64 = arith.constant 0 : index
      %131 = vector.load %arg14[%c0_63, %c0_64] : memref<2x32xf32, #tpu.memory_space<vmem>>, vector<2x32xf32>
      tpu.vector_store %arg14[%c0_63, %c0_64], %130 {strides = array<i32>} : memref<2x32xf32, #tpu.memory_space<vmem>>, vector<2x32xf32>,
    } else {
    }
    %c0 = arith.constant 0 : index
    %c0_1 = arith.constant 0 : index
    %3 = vector.load %arg3[%c0, %c0_1] : memref<1x32xf32, #tpu.memory_space<vmem>>, vector<1x32xf32>
    %c0_2 = arith.constant 0 : index
    %c0_3 = arith.constant 0 : index
    %4 = vector.load %arg4[%c0_2, %c0_3] : memref<1x32xf32, #tpu.memory_space<vmem>>, vector<1x32xf32>
    %c0_4 = arith.constant 0 : index
    %c0_5 = arith.constant 0 : index
    %5 = vector.load %arg5[%c0_4, %c0_5] : memref<32x32xbf16, #tpu.memory_space<vmem>>, vector<32x32xbf16>
    %c0_6 = arith.constant 0 : index
    %c0_7 = arith.constant 0 : index
    %6 = vector.load %arg6[%c0_6, %c0_7] : memref<1x32xf32, #tpu.memory_space<vmem>>, vector<1x32xf32>
    %c0_8 = arith.constant 0 : index
    %c0_9 = arith.constant 0 : index
    %7 = vector.load %arg7[%c0_8, %c0_9] : memref<32x32xbf16, #tpu.memory_space<vmem>>, vector<32x32xbf16>
    %c0_10 = arith.constant 0 : index
    %c0_11 = arith.constant 0 : index
    %8 = vector.load %arg8[%c0_10, %c0_11] : memref<1x32xf32, #tpu.memory_space<vmem>>, vector<1x32xf32>
    %c0_12 = arith.constant 0 : index
    %c0_13 = arith.constant 0 : index
    %9 = vector.load %arg11[%c0_12, %c0_13] : memref<32x32xbf16, #tpu.memory_space<vmem>>, vector<32x32xbf16>
    %c0_14 = arith.constant 0 : index
    %c0_15 = arith.constant 0 : index
    %10 = vector.load %arg12[%c0_14, %c0_15] : memref<1x32xf32, #tpu.memory_space<vmem>>, vector<1x32xf32>
    %c0_16 = arith.constant 0 : index
    %c0_17 = arith.constant 0 : index
    %11 = vector.load %arg10[%c0_16, %c0_17] : memref<4x32xf32, #tpu.memory_space<vmem>>, vector<4x32xf32>
    %c0_18 = arith.constant 0 : index
    %c0_19 = arith.constant 0 : index
    %c0_20 = arith.constant 0 : index
    %12 = vector.load %arg2[%c0_18, %c0_19, %c0_20] : memref<2x4x32xbf16, #tpu.memory_space<vmem>>, vector<1x4x32xbf16>
    %13 = vector.shape_cast %12 : vector<1x4x32xbf16> to vector<4x32xbf16>
    %14 = arith.extf %13 : vector<4x32xbf16> to vector<4x32xf32>
    %cst = arith.constant dense<0.000000e+00> : vector<4xf32>
    %15 = vector.multi_reduction <add>, %14, %cst [1] : vector<4x32xf32> to vector<4xf32>
    %16 = vector.shape_cast %15 : vector<4xf32> to vector<4x1xf32>
    %cst_21 = arith.constant 3.200000e+01 : f32
    %17 = vector.broadcast %cst_21 : f32 to vector<4x1xf32>
    %18 = arith.divf %16, %17 : vector<4x1xf32>
    %19 = vector.broadcast %18 : vector<4x1xf32> to vector<4x32xf32>
    %20 = arith.subf %14, %19 : vector<4x32xf32>
    %21 = arith.mulf %20, %20 : vector<4x32xf32>
    %cst_22 = arith.constant dense<0.000000e+00> : vector<4xf32>
    %22 = vector.multi_reduction <add>, %21, %cst_22 [1] : vector<4x32xf32> to vector<4xf32>
    %23 = vector.shape_cast %22 : vector<4xf32> to vector<4x1xf32>
    %cst_23 = arith.constant 3.200000e+01 : f32
    %24 = vector.broadcast %cst_23 : f32 to vector<4x1xf32>
    %25 = arith.divf %23, %24 : vector<4x1xf32>
    %26 = vector.broadcast %18 : vector<4x1xf32> to vector<4x32xf32>
    %27 = arith.subf %14, %26 : vector<4x32xf32>
    %cst_24 = arith.constant 9.99999974E-6 : f32
    %28 = vector.broadcast %cst_24 : f32 to vector<4x1xf32>
    %29 = arith.addf %25, %28 : vector<4x1xf32>
    %30 = math.rsqrt %29 : vector<4x1xf32>
    %31 = vector.broadcast %30 : vector<4x1xf32> to vector<4x32xf32>
    %32 = arith.mulf %27, %31 : vector<4x32xf32>
    %33 = vector.broadcast %3 : vector<1x32xf32> to vector<4x32xf32>
    %34 = arith.mulf %32, %33 : vector<4x32xf32>
    %35 = vector.broadcast %4 : vector<1x32xf32> to vector<4x32xf32>
    %36 = arith.addf %34, %35 : vector<4x32xf32>
    %37 = arith.truncf %36 : vector<4x32xf32> to vector<4x32xbf16>
    %cst_25 = arith.constant dense<0.000000e+00> : vector<4x32xf32>
    %38 = tpu.matmul %37, %5, %cst_25 {dimension_numbers = #tpu.dot_dimension_numbers<[1], [0], [0], [1], [0, 0, 1, 1], [], []>} : vector<4x32xbf16>, vector<32x32xbf16>, vector<4x32xf32> -> vector<4x32xf32>
    %39 = vector.broadcast %6 : vector<1x32xf32> to vector<4x32xf32>
    %40 = arith.addf %38, %39 : vector<4x32xf32>
    %cst_26 = arith.constant dense<0.000000e+00> : vector<4x32xf32>
    %41 = tpu.matmul %37, %7, %cst_26 {dimension_numbers = #tpu.dot_dimension_numbers<[1], [0], [0], [1], [0, 0, 1, 1], [], []>} : vector<4x32xbf16>, vector<32x32xbf16>, vector<4x32xf32> -> vector<4x32xf32>
    %42 = vector.broadcast %8 : vector<1x32xf32> to vector<4x32xf32>
    %43 = arith.addf %41, %42 : vector<4x32xf32>
    %44 = arith.negf %43 : vector<4x32xf32>
    %45 = math.exp %44 : vector<4x32xf32>
    %cst_27 = arith.constant 1.000000e+00 : f32
    %46 = vector.broadcast %cst_27 : f32 to vector<4x32xf32>
    %47 = arith.addf %46, %45 : vector<4x32xf32>
    %48 = arith.divf %46, %47 : vector<4x32xf32>
    %49 = arith.mulf %43, %48 : vector<4x32xf32>
    %c0_28 = arith.constant 0 : index
    %c0_29 = arith.constant 0 : index
    %c0_30 = arith.constant 0 : index
    %50 = vector.load %arg9[%c0_28, %c0_29, %c0_30] : memref<4x4x32xf32, #tpu.memory_space<vmem>>, vector<4x4x32xf32>
    %51 = vector.shape_cast %40 : vector<4x32xf32> to vector<1x4x32xf32>
    %52 = vector.broadcast %51 : vector<1x4x32xf32> to vector<4x4x32xf32>
    %53 = arith.mulf %50, %52 : vector<4x4x32xf32>
    %cst_31 = arith.constant dense<0.000000e+00> : vector<4x32xf32>
    %54 = vector.multi_reduction <add>, %53, %cst_31 [1] : vector<4x4x32xf32> to vector<4x32xf32>
    %c0_32 = arith.constant 0 : index
    %c0_33 = arith.constant 0 : index
    %55 = vector.load %arg14[%c0_32, %c0_33] : memref<2x32xf32, #tpu.memory_space<vmem>>, vector<1x32xf32>
    %56 = vector.broadcast %55 : vector<1x32xf32> to vector<4x32xf32>
    %57 = arith.mulf %11, %56 : vector<4x32xf32>
    %58 = arith.addf %54, %57 : vector<4x32xf32>
    %59 = vector.extract_strided_slice %58 {offsets = [3, 0], sizes = [1, 32], strides = [1, 1]} : vector<4x32xf32> to vector<1x32xf32>
    %c0_34 = arith.constant 0 : index
    %c0_35 = arith.constant 0 : index
    %60 = vector.load %arg14[%c0_34, %c0_35] : memref<2x32xf32, #tpu.memory_space<vmem>>, vector<1x32xf32>
    tpu.vector_store %arg14[%c0_34, %c0_35], %59 {strides = array<i32>} : memref<2x32xf32, #tpu.memory_space<vmem>>, vector<1x32xf32>,
    %61 = arith.mulf %58, %49 : vector<4x32xf32>
    %62 = arith.truncf %61 : vector<4x32xf32> to vector<4x32xbf16>
    %cst_36 = arith.constant dense<0.000000e+00> : vector<4x32xf32>
    %63 = tpu.matmul %62, %9, %cst_36 {dimension_numbers = #tpu.dot_dimension_numbers<[1], [0], [0], [1], [0, 0, 1, 1], [], []>} : vector<4x32xbf16>, vector<32x32xbf16>, vector<4x32xf32> -> vector<4x32xf32>
    %64 = vector.broadcast %10 : vector<1x32xf32> to vector<4x32xf32>
    %65 = arith.addf %63, %64 : vector<4x32xf32>
    %66 = arith.addf %14, %65 : vector<4x32xf32>
    %67 = arith.truncf %66 : vector<4x32xf32> to vector<4x32xbf16>
    %c0_37 = arith.constant 0 : index
    %c0_38 = arith.constant 0 : index
    %c0_39 = arith.constant 0 : index
    %68 = vector.load %arg13[%c0_37, %c0_38, %c0_39] : memref<2x4x32xbf16, #tpu.memory_space<vmem>>, vector<1x4x32xbf16>
    %69 = vector.shape_cast %68 : vector<1x4x32xbf16> to vector<4x32xbf16>
    %70 = vector.shape_cast %67 : vector<4x32xbf16> to vector<1x4x32xbf16>
    tpu.vector_store %arg13[%c0_37, %c0_38, %c0_39], %70 {strides = array<i32>} : memref<2x4x32xbf16, #tpu.memory_space<vmem>>, vector<1x4x32xbf16>,
    %c1 = arith.constant 1 : index
    %c0_40 = arith.constant 0 : index
    %c0_41 = arith.constant 0 : index
    %71 = vector.load %arg2[%c1, %c0_40, %c0_41] : memref<2x4x32xbf16, #tpu.memory_space<vmem>>, vector<1x4x32xbf16>
    %72 = vector.shape_cast %71 : vector<1x4x32xbf16> to vector<4x32xbf16>
    %73 = arith.extf %72 : vector<4x32xbf16> to vector<4x32xf32>
    %cst_42 = arith.constant dense<0.000000e+00> : vector<4xf32>
    %74 = vector.multi_reduction <add>, %73, %cst_42 [1] : vector<4x32xf32> to vector<4xf32>
    %75 = vector.shape_cast %74 : vector<4xf32> to vector<4x1xf32>
    %cst_43 = arith.constant 3.200000e+01 : f32
    %76 = vector.broadcast %cst_43 : f32 to vector<4x1xf32>
    %77 = arith.divf %75, %76 : vector<4x1xf32>
    %78 = vector.broadcast %77 : vector<4x1xf32> to vector<4x32xf32>
    %79 = arith.subf %73, %78 : vector<4x32xf32>
    %80 = arith.mulf %79, %79 : vector<4x32xf32>
    %cst_44 = arith.constant dense<0.000000e+00> : vector<4xf32>
    %81 = vector.multi_reduction <add>, %80, %cst_44 [1] : vector<4x32xf32> to vector<4xf32>
    %82 = vector.shape_cast %81 : vector<4xf32> to vector<4x1xf32>
    %cst_45 = arith.constant 3.200000e+01 : f32
    %83 = vector.broadcast %cst_45 : f32 to vector<4x1xf32>
    %84 = arith.divf %82, %83 : vector<4x1xf32>
    %85 = vector.broadcast %77 : vector<4x1xf32> to vector<4x32xf32>
    %86 = arith.subf %73, %85 : vector<4x32xf32>
    %cst_46 = arith.constant 9.99999974E-6 : f32
    %87 = vector.broadcast %cst_46 : f32 to vector<4x1xf32>
    %88 = arith.addf %84, %87 : vector<4x1xf32>
    %89 = math.rsqrt %88 : vector<4x1xf32>
    %90 = vector.broadcast %89 : vector<4x1xf32> to vector<4x32xf32>
    %91 = arith.mulf %86, %90 : vector<4x32xf32>
    %92 = vector.broadcast %3 : vector<1x32xf32> to vector<4x32xf32>
    %93 = arith.mulf %91, %92 : vector<4x32xf32>
    %94 = vector.broadcast %4 : vector<1x32xf32> to vector<4x32xf32>
    %95 = arith.addf %93, %94 : vector<4x32xf32>
    %96 = arith.truncf %95 : vector<4x32xf32> to vector<4x32xbf16>
    %cst_47 = arith.constant dense<0.000000e+00> : vector<4x32xf32>
    %97 = tpu.matmul %96, %5, %cst_47 {dimension_numbers = #tpu.dot_dimension_numbers<[1], [0], [0], [1], [0, 0, 1, 1], [], []>} : vector<4x32xbf16>, vector<32x32xbf16>, vector<4x32xf32> -> vector<4x32xf32>
    %98 = vector.broadcast %6 : vector<1x32xf32> to vector<4x32xf32>
    %99 = arith.addf %97, %98 : vector<4x32xf32>
    %cst_48 = arith.constant dense<0.000000e+00> : vector<4x32xf32>
    %100 = tpu.matmul %96, %7, %cst_48 {dimension_numbers = #tpu.dot_dimension_numbers<[1], [0], [0], [1], [0, 0, 1, 1], [], []>} : vector<4x32xbf16>, vector<32x32xbf16>, vector<4x32xf32> -> vector<4x32xf32>
    %101 = vector.broadcast %8 : vector<1x32xf32> to vector<4x32xf32>
    %102 = arith.addf %100, %101 : vector<4x32xf32>
    %103 = arith.negf %102 : vector<4x32xf32>
    %104 = math.exp %103 : vector<4x32xf32>
    %cst_49 = arith.constant 1.000000e+00 : f32
    %105 = vector.broadcast %cst_49 : f32 to vector<4x32xf32>
    %106 = arith.addf %105, %104 : vector<4x32xf32>
    %107 = arith.divf %105, %106 : vector<4x32xf32>
    %108 = arith.mulf %102, %107 : vector<4x32xf32>
    %c0_50 = arith.constant 0 : index
    %c0_51 = arith.constant 0 : index
    %c0_52 = arith.constant 0 : index
    %109 = vector.load %arg9[%c0_50, %c0_51, %c0_52] : memref<4x4x32xf32, #tpu.memory_space<vmem>>, vector<4x4x32xf32>
    %110 = vector.shape_cast %99 : vector<4x32xf32> to vector<1x4x32xf32>
    %111 = vector.broadcast %110 : vector<1x4x32xf32> to vector<4x4x32xf32>
    %112 = arith.mulf %109, %111 : vector<4x4x32xf32>
    %cst_53 = arith.constant dense<0.000000e+00> : vector<4x32xf32>
    %113 = vector.multi_reduction <add>, %112, %cst_53 [1] : vector<4x4x32xf32> to vector<4x32xf32>
    %c1_54 = arith.constant 1 : index
    %c0_55 = arith.constant 0 : index
    %114 = vector.load %arg14[%c1_54, %c0_55] : memref<2x32xf32, #tpu.memory_space<vmem>>, vector<1x32xf32>
    %115 = vector.broadcast %114 : vector<1x32xf32> to vector<4x32xf32>
    %116 = arith.mulf %11, %115 : vector<4x32xf32>
    %117 = arith.addf %113, %116 : vector<4x32xf32>
    %118 = vector.extract_strided_slice %117 {offsets = [3, 0], sizes = [1, 32], strides = [1, 1]} : vector<4x32xf32> to vector<1x32xf32>
    %c1_56 = arith.constant 1 : index
    %c0_57 = arith.constant 0 : index
    %119 = vector.load %arg14[%c1_56, %c0_57] : memref<2x32xf32, #tpu.memory_space<vmem>>, vector<1x32xf32>
    tpu.vector_store %arg14[%c1_56, %c0_57], %118 {strides = array<i32>} : memref<2x32xf32, #tpu.memory_space<vmem>>, vector<1x32xf32>,
    %120 = arith.mulf %117, %108 : vector<4x32xf32>
    %121 = arith.truncf %120 : vector<4x32xf32> to vector<4x32xbf16>
    %cst_58 = arith.constant dense<0.000000e+00> : vector<4x32xf32>
    %122 = tpu.matmul %121, %9, %cst_58 {dimension_numbers = #tpu.dot_dimension_numbers<[1], [0], [0], [1], [0, 0, 1, 1], [], []>} : vector<4x32xbf16>, vector<32x32xbf16>, vector<4x32xf32> -> vector<4x32xf32>
    %123 = vector.broadcast %10 : vector<1x32xf32> to vector<4x32xf32>
    %124 = arith.addf %122, %123 : vector<4x32xf32>
    %125 = arith.addf %73, %124 : vector<4x32xf32>
    %126 = arith.truncf %125 : vector<4x32xf32> to vector<4x32xbf16>
    %c1_59 = arith.constant 1 : index
    %c0_60 = arith.constant 0 : index
    %c0_61 = arith.constant 0 : index
    %127 = vector.load %arg13[%c1_59, %c0_60, %c0_61] : memref<2x4x32xbf16, #tpu.memory_space<vmem>>, vector<1x4x32xbf16>
    %128 = vector.shape_cast %127 : vector<1x4x32xbf16> to vector<4x32xbf16>
    %129 = vector.shape_cast %126 : vector<4x32xbf16> to vector<1x4x32xbf16>
    tpu.vector_store %arg13[%c1_59, %c0_60, %c0_61], %129 {strides = array<i32>} : memref<2x4x32xbf16, #tpu.memory_space<vmem>>, vector<1x4x32xbf16>,
    return
  }
  func.func @transform_0(%arg0: i32, %arg1: i32) -> (i32, i32, i32) {
    %c0_i32 = arith.constant 0 : i32
    %c0_i32_0 = arith.constant 0 : i32
    return %arg0, %arg1, %c0_i32 : i32, i32, i32
  }
  func.func @transform_1(%arg0: i32, %arg1: i32) -> (i32, i32) {
    %c0_i32 = arith.constant 0 : i32
    %c0_i32_0 = arith.constant 0 : i32
    %c0_i32_1 = arith.constant 0 : i32
    return %c0_i32, %c0_i32_0 : i32, i32
  }
  func.func @transform_2(%arg0: i32, %arg1: i32) -> (i32, i32) {
    %c0_i32 = arith.constant 0 : i32
    %c0_i32_0 = arith.constant 0 : i32
    %c0_i32_1 = arith.constant 0 : i32
    return %c0_i32, %c0_i32_0 : i32, i32
  }
  func.func @transform_3(%arg0: i32, %arg1: i32) -> (i32, i32) {
    %c0_i32 = arith.constant 0 : i32
    %c0_i32_0 = arith.constant 0 : i32
    %c0_i32_1 = arith.constant 0 : i32
    return %c0_i32, %c0_i32_0 : i32, i32
  }
  func.func @transform_4(%arg0: i32, %arg1: i32) -> (i32, i32) {
    %c0_i32 = arith.constant 0 : i32
    %c0_i32_0 = arith.constant 0 : i32
    %c0_i32_1 = arith.constant 0 : i32
    return %c0_i32, %c0_i32_0 : i32, i32
  }
  func.func @transform_5(%arg0: i32, %arg1: i32) -> (i32, i32) {
    %c0_i32 = arith.constant 0 : i32
    %c0_i32_0 = arith.constant 0 : i32
    %c0_i32_1 = arith.constant 0 : i32
    return %c0_i32, %c0_i32_0 : i32, i32
  }
  func.func @transform_6(%arg0: i32, %arg1: i32) -> (i32, i32) {
    %c0_i32 = arith.constant 0 : i32
    %c0_i32_0 = arith.constant 0 : i32
    %c0_i32_1 = arith.constant 0 : i32
    return %c0_i32, %c0_i32_0 : i32, i32
  }
  func.func @transform_7(%arg0: i32, %arg1: i32) -> (i32, i32, i32) {
    %c0_i32 = arith.constant 0 : i32
    %c0_i32_0 = arith.constant 0 : i32
    %c0_i32_1 = arith.constant 0 : i32
    %c0_i32_2 = arith.constant 0 : i32
    return %c0_i32, %c0_i32_0, %c0_i32_1 : i32, i32, i32
  }
  func.func @transform_8(%arg0: i32, %arg1: i32) -> (i32, i32) {
    %c0_i32 = arith.constant 0 : i32
    %c0_i32_0 = arith.constant 0 : i32
    %c0_i32_1 = arith.constant 0 : i32
    return %c0_i32, %c0_i32_0 : i32, i32
  }
  func.func @transform_9(%arg0: i32, %arg1: i32) -> (i32, i32) {
    %c0_i32 = arith.constant 0 : i32
    %c0_i32_0 = arith.constant 0 : i32
    %c0_i32_1 = arith.constant 0 : i32
    return %c0_i32, %c0_i32_0 : i32, i32
  }
  func.func @transform_10(%arg0: i32, %arg1: i32) -> (i32, i32) {
    %c0_i32 = arith.constant 0 : i32
    %c0_i32_0 = arith.constant 0 : i32
    %c0_i32_1 = arith.constant 0 : i32
    return %c0_i32, %c0_i32_0 : i32, i32
  }
  func.func @transform_11(%arg0: i32, %arg1: i32) -> (i32, i32, i32) {
    %c0_i32 = arith.constant 0 : i32
    %c0_i32_0 = arith.constant 0 : i32
    return %arg0, %arg1, %c0_i32 : i32, i32, i32
  }
}

module attributes {stable_mosaic.version = 11 : i64} {
  func.func @_heads_kernel(%arg0: i32, %arg1: i32, %arg2: memref<3xf32, #tpu.memory_space<smem>>, %arg3: memref<1x8x128xbf16, #tpu.memory_space<vmem>>, %arg4: memref<8x256xbf16, #tpu.memory_space<vmem>>, %arg5: memref<1x128x512xbf16, #tpu.memory_space<vmem>>, %arg6: memref<1x1x512xf32, #tpu.memory_space<vmem>>, %arg7: memref<256x512xbf16, #tpu.memory_space<vmem>>, %arg8: memref<1x512x128xbf16, #tpu.memory_space<vmem>>, %arg9: memref<1x8x128xf32, #tpu.memory_space<vmem>>) attributes {dimension_semantics = [#tpu.dimension_semantics<parallel>, #tpu.dimension_semantics<arbitrary>], iteration_bounds = array<i64: 1, 3>, scalar_prefetch = 0 : i64, scratch_operands = 0 : i64, tpu.core_type = #tpu.core_type<tc>, window_params = [{transform_indices = @transform_0, window_bounds = array<i64: 3>}, {transform_indices = @transform_1, window_bounds = array<i64: 1, 8, 128>}, {transform_indices = @transform_2, window_bounds = array<i64: 8, 256>}, {transform_indices = @transform_3, window_bounds = array<i64: 1, 128, 512>}, {transform_indices = @transform_4, window_bounds = array<i64: 1, 1, 512>}, {pipeline_mode = #tpu.pipeline_mode<synchronous>, transform_indices = @transform_5, window_bounds = array<i64: 256, 512>}, {transform_indices = @transform_6, window_bounds = array<i64: 1, 512, 128>}, {transform_indices = @transform_7, window_bounds = array<i64: 1, 8, 128>}]} {
    %0 = arith.index_cast %arg1 : i32 to index
    %1 = memref.load %arg2[%0] : memref<3xf32, #tpu.memory_space<smem>>
    %c0 = arith.constant 0 : index
    %c0_0 = arith.constant 0 : index
    %c0_1 = arith.constant 0 : index
    %2 = vector.load %arg3[%c0, %c0_0, %c0_1] : memref<1x8x128xbf16, #tpu.memory_space<vmem>>, vector<1x8x128xbf16>
    %3 = vector.shape_cast %2 : vector<1x8x128xbf16> to vector<8x128xbf16>
    %4 = arith.extf %3 : vector<8x128xbf16> to vector<8x128xf32>
    %cst = arith.constant 0.000000e+00 : f32
    %5 = vector.broadcast %cst : f32 to vector<8x128xf32>
    %6 = arith.cmpf ogt, %4, %5 : vector<8x128xf32>
    %7 = vector.broadcast %1 : f32 to vector<8x128xf32>
    %8 = arith.mulf %7, %4 : vector<8x128xf32>
    %9 = arith.select %6, %4, %8 : vector<8x128xi1>, vector<8x128xf32>
    %10 = arith.truncf %9 : vector<8x128xf32> to vector<8x128xbf16>
    %c0_2 = arith.constant 0 : index
    %c0_3 = arith.constant 0 : index
    %c0_4 = arith.constant 0 : index
    %11 = vector.load %arg5[%c0_2, %c0_3, %c0_4] : memref<1x128x512xbf16, #tpu.memory_space<vmem>>, vector<1x128x512xbf16>
    %12 = vector.shape_cast %11 : vector<1x128x512xbf16> to vector<128x512xbf16>
    %cst_5 = arith.constant dense<0.000000e+00> : vector<8x512xf32>
    %13 = tpu.matmul %10, %12, %cst_5 {dimension_numbers = #tpu.dot_dimension_numbers<[1], [0], [0], [1], [0, 0, 1, 1], [], []>} : vector<8x128xbf16>, vector<128x512xbf16>, vector<8x512xf32> -> vector<8x512xf32>
    %c0_6 = arith.constant 0 : index
    %c0_7 = arith.constant 0 : index
    %c0_8 = arith.constant 0 : index
    %14 = vector.load %arg6[%c0_6, %c0_7, %c0_8] : memref<1x1x512xf32, #tpu.memory_space<vmem>>, vector<1x1x512xf32>
    %15 = vector.shape_cast %14 : vector<1x1x512xf32> to vector<1x512xf32>
    %16 = vector.broadcast %15 : vector<1x512xf32> to vector<8x512xf32>
    %17 = arith.addf %13, %16 : vector<8x512xf32>
    %cst_9 = arith.constant 0.000000e+00 : f32
    %18 = vector.broadcast %cst_9 : f32 to vector<8x512xf32>
    %19 = arith.maximumf %17, %18 : vector<8x512xf32>
    %c0_10 = arith.constant 0 : index
    %c0_11 = arith.constant 0 : index
    %20 = vector.load %arg4[%c0_10, %c0_11] : memref<8x256xbf16, #tpu.memory_space<vmem>>, vector<8x256xbf16>
    %c0_12 = arith.constant 0 : index
    %c0_13 = arith.constant 0 : index
    %21 = vector.load %arg7[%c0_12, %c0_13] : memref<256x512xbf16, #tpu.memory_space<vmem>>, vector<256x512xbf16>
    %cst_14 = arith.constant dense<0.000000e+00> : vector<8x512xf32>
    %22 = tpu.matmul %20, %21, %cst_14 {dimension_numbers = #tpu.dot_dimension_numbers<[1], [0], [0], [1], [0, 0, 1, 1], [], []>} : vector<8x256xbf16>, vector<256x512xbf16>, vector<8x512xf32> -> vector<8x512xf32>
    %23 = arith.mulf %19, %22 : vector<8x512xf32>
    %24 = arith.truncf %23 : vector<8x512xf32> to vector<8x512xbf16>
    %c0_15 = arith.constant 0 : index
    %c0_16 = arith.constant 0 : index
    %c0_17 = arith.constant 0 : index
    %25 = vector.load %arg8[%c0_15, %c0_16, %c0_17] : memref<1x512x128xbf16, #tpu.memory_space<vmem>>, vector<1x512x128xbf16>
    %26 = vector.shape_cast %25 : vector<1x512x128xbf16> to vector<512x128xbf16>
    %cst_18 = arith.constant dense<0.000000e+00> : vector<8x128xf32>
    %27 = tpu.matmul %24, %26, %cst_18 {dimension_numbers = #tpu.dot_dimension_numbers<[1], [0], [0], [1], [0, 0, 1, 1], [], []>} : vector<8x512xbf16>, vector<512x128xbf16>, vector<8x128xf32> -> vector<8x128xf32>
    %c0_19 = arith.constant 0 : index
    %c0_20 = arith.constant 0 : index
    %c0_21 = arith.constant 0 : index
    %28 = vector.load %arg9[%c0_19, %c0_20, %c0_21] : memref<1x8x128xf32, #tpu.memory_space<vmem>>, vector<1x8x128xf32>
    %29 = vector.shape_cast %28 : vector<1x8x128xf32> to vector<8x128xf32>
    %30 = vector.shape_cast %27 : vector<8x128xf32> to vector<1x8x128xf32>
    tpu.vector_store %arg9[%c0_19, %c0_20, %c0_21], %30 {strides = array<i32>} : memref<1x8x128xf32, #tpu.memory_space<vmem>>, vector<1x8x128xf32>,
    return
  }
  func.func @transform_0(%arg0: i32, %arg1: i32) -> i32 {
    %c0_i32 = arith.constant 0 : i32
    %c0_i32_0 = arith.constant 0 : i32
    return %c0_i32 : i32
  }
  func.func @transform_1(%arg0: i32, %arg1: i32) -> (i32, i32, i32) {
    %c0_i32 = arith.constant 0 : i32
    %c0_i32_0 = arith.constant 0 : i32
    return %arg1, %arg0, %c0_i32 : i32, i32, i32
  }
  func.func @transform_2(%arg0: i32, %arg1: i32) -> (i32, i32) {
    %c0_i32 = arith.constant 0 : i32
    %c0_i32_0 = arith.constant 0 : i32
    return %arg0, %c0_i32 : i32, i32
  }
  func.func @transform_3(%arg0: i32, %arg1: i32) -> (i32, i32, i32) {
    %c0_i32 = arith.constant 0 : i32
    %c0_i32_0 = arith.constant 0 : i32
    %c0_i32_1 = arith.constant 0 : i32
    return %arg1, %c0_i32, %c0_i32_0 : i32, i32, i32
  }
  func.func @transform_4(%arg0: i32, %arg1: i32) -> (i32, i32, i32) {
    %c0_i32 = arith.constant 0 : i32
    %c0_i32_0 = arith.constant 0 : i32
    %c0_i32_1 = arith.constant 0 : i32
    return %arg1, %c0_i32, %c0_i32_0 : i32, i32, i32
  }
  func.func @transform_5(%arg0: i32, %arg1: i32) -> (i32, i32) {
    %c0_i32 = arith.constant 0 : i32
    %c0_i32_0 = arith.constant 0 : i32
    %c0_i32_1 = arith.constant 0 : i32
    return %c0_i32, %c0_i32_0 : i32, i32
  }
  func.func @transform_6(%arg0: i32, %arg1: i32) -> (i32, i32, i32) {
    %c0_i32 = arith.constant 0 : i32
    %c0_i32_0 = arith.constant 0 : i32
    %c0_i32_1 = arith.constant 0 : i32
    return %arg1, %c0_i32, %c0_i32_0 : i32, i32, i32
  }
  func.func @transform_7(%arg0: i32, %arg1: i32) -> (i32, i32, i32) {
    %c0_i32 = arith.constant 0 : i32
    %c0_i32_0 = arith.constant 0 : i32
    return %arg1, %arg0, %c0_i32 : i32, i32, i32
  }
}

</mosaic_0001>

<bundles_post_ra>
// kernel: model_forward.4
= control target key start
LH: loop header
LB: loop body
LE: loop exit
PB: predicated region body
PF: predicated region fallthrough
CT: control target
= control target key end

     0   :  { %15 = vsyncpa [#allocation3], 0  ;;  %s1023_s0 = inlined_call_operand.vmem [shape: bf16[8,64], index: 0, kind: input, shape index: {}]   ;;  %s1024_s1 = inlined_call_operand.hbm [shape: bf16[64,256], index: 1, kind: input, shape index: {}]   ;;  %s1025_s2 = inlined_call_operand.vmem [shape: f32[1,256], index: 2, kind: input, shape index: {}]   ;;  %s1026_s3 = inlined_call_operand.hbm [shape: bf16[256,256], index: 3, kind: input, shape index: {}]   ;;  %s1027_s4 = inlined_call_operand.vmem [shape: f32[1,256], index: 4, kind: input, shape index: {}]   ;;  %s1028_s5 = inlined_call_operand.vmem [shape: f32[1,256], index: 5, kind: input, shape index: {}]   ;;  %s1029_s6 = inlined_call_operand.hbm [shape: bf16[256,128], index: 6, kind: input, shape index: {}]   ;;  %s1030_s7 = inlined_call_operand.vmem [shape: f32[1,128], index: 7, kind: input, shape index: {}]   ;;  %s1031_s8 = inlined_call_operand.vmem [shape: bf16[8,256], index: 8, kind: output, shape index: {0}]   ;;  %s1032_s9 = inlined_call_operand.vmem [shape: bf16[8,128], index: 9, kind: output, shape index: {1}]  }
   0x1   :  { %16 = vsyncpa [#allocation5], 0  ;;  %s925_s30 = smov [#allocation4]   ;;  %s926_s11 = smov [#allocation2]  }
   0x2   :  { %s38_s10 = sshll.u32 %s925_s30, 4  ;;  %s24_s12 = sshll.u32 %s926_s11, 4  ;;  %s39_s10 = int_to_ptr.vmem [resolvable:$true] %s38_s10  ;;  %s25_s12 = int_to_ptr.vmem [resolvable:$true] %s24_s12 }
   0x3   :  { %s869_s13 = scalar_lea.vmem %s39_s10, 4096  ;;  %p874_p1 = scmp.lt.s32.totalorder %s39_s10, %s39_s10 }
   0x4   :  { %p870_p0 = scmp.ne.s32.totalorder %s39_s10, %s869_s13  ;;  %p875_p2 = scmp.lt.s32.totalorder %s869_s13, %s869_s13 }
   0x6   :  { %p876_p3 = por %p875_p2, %p874_p1 }
   0x8   :  { %p877_p4 = pnand %p876_p3, %p870_p0 }
   0xa   :  { %880 = shalt.err (!%p877_p4)
}
   0xb   :  { %s927_s14 = smov 128   ;;  %s928_s15 = smov 8  }
   0xc   :  { %44 = dma.hbm_to_vmem [thread:$0]  %s1026_s3, 4096, %s39_s10, [#allocation5], %s927_s14, %s927_s14, %s928_s15  }
   0xd   :  { %s889_s18 = scalar_lea.vmem %s25_s12, 1024  ;;  %p894_p6 = scmp.lt.s32.totalorder %s25_s12, %s25_s12 }
   0xe   :  { %p890_p5 = scmp.ne.s32.totalorder %s25_s12, %s889_s18  ;;  %p895_p7 = scmp.lt.s32.totalorder %s889_s18, %s889_s18 }
  0x10   :  { %p896_p8 = por %p895_p7, %p894_p6 }
  0x12   :  { %p897_p9 = pnand %p896_p8, %p890_p5 }
  0x14   :  { %900 = shalt.err (!%p897_p9)
}
  0x15   :  { %30 = dma.hbm_to_vmem [thread:$0]  %s1024_s1, 1024, %s25_s12, [#allocation3], %s927_s14, %s927_s14, %s928_s15  }
  0x16   :  { %s929_s21 = smov [#allocation6]  }
  0x17   :  { %s54_s22 = sshll.u32 %s929_s21, 4  ;;  %s55_s22 = int_to_ptr.vmem [resolvable:$true] %s54_s22 }
  0x18   :  { %s909_s23 = scalar_lea.vmem %s55_s22, 2048  ;;  %p914_p11 = scmp.lt.s32.totalorder %s55_s22, %s55_s22 }
  0x19   :  { %p910_p10 = scmp.ne.s32.totalorder %s55_s22, %s909_s23  ;;  %p915_p12 = scmp.lt.s32.totalorder %s909_s23, %s909_s23 }
  0x1b   :  { %p916_p13 = por %p915_p12, %p914_p11 }
  0x1d   :  { %p917_p0 = pnand %p916_p13, %p910_p10 }
  0x1f   :  { %920 = shalt.err (!%p917_p0)
}
  0x20   :  { %s930_s3 = smov 64   ;;  %s931_s24 = smov 4  }
  0x21   :  { %60 = dma.hbm_to_vmem [thread:$0]  %s1029_s6, 2048, %s55_s22, [#allocation5], %s930_s3, %s930_s3, %s931_s24  }
  0x22   :  { %921 = dma.done.wait [#allocation3], 1024  }
  0x23   :  { %922 = vsyncadd [#allocation3], 4294966272 }
  0x24   :  { %923 = dma.done.wait [#allocation5], 6144  }
  0x25   :  { %924 = vsyncadd [#allocation5], 4294961152  ;;  %v932_v0 = vmov 0   ;;  %v781_v1 = vld [vmem:[#allocation2 + $0x34] ss:$8 sps:$4 sm:$0xff]   ;;  %vm134_vm0 = vcmask 523264   ;;  %v84_v42 = vlaneseq }
  0x26   :  { %170 = vmatprep.mubr.bf16.mxu0 %v932_v0  ;;  %v783_v2 = vld [vmem:[#allocation2 + $0x30] ss:$8 sps:$4 sm:$0xff]   ;;  %146 = vmatprep.subr.bf16.mxu0 %v781_v1  ;;  %v784_v3 = vld [vmem:[#allocation2 + $0x24] ss:$8 sps:$4 sm:$0xff]   ;;  %v786_v4 = vld [vmem:[#allocation2 + $0x20] ss:$8 sps:$4 sm:$0xff]  }
  0x27   :  { %147 = vmatpush1.bf16.msra.mxu0 %v783_v2  ;;  %v787_v5 = vld [vmem:[#allocation2 + $0x14] ss:$8 sps:$4 sm:$0xff]   ;;  %v789_v6 = vld [vmem:[#allocation2 + $0x10] ss:$8 sps:$4 sm:$0xff]   ;;  %v796_v9 = vld [vmem:[#allocation4 + $0x64] ss:$8 sps:$4 sm:$0xff]  }
  0x28   :  { %148 = vmatprep.subr.bf16.mxu0 %v784_v3  ;;  %v793_v7 = vld [vmem:[#allocation4 + $0x74] ss:$8 sps:$4 sm:$0xff]   ;;  %v795_v8 = vld [vmem:[#allocation4 + $0x70] ss:$8 sps:$4 sm:$0xff]   ;;  %v790_v10 = vld [vmem:[#allocation2 + $0x4] ss:$8 sps:$4 sm:$0xff]  }
  0x29   :  { %375 = vmatprep.subr.bf16.mxu1 %v793_v7  ;;  %v798_v11 = vld [vmem:[#allocation4 + $0x60] ss:$8 sps:$4 sm:$0xff]   ;;  %v799_v12 = vld [vmem:[#allocation4 + $0x54] ss:$8 sps:$4 sm:$0xff]   ;;  %v801_v14 = vld [vmem:[#allocation4 + $0x50] ss:$8 sps:$4 sm:$0xff]  }
  0x2a   :  { %376 = vmatpush1.bf16.msra.mxu1 %v795_v8  ;;  %v792_v13 = vld [vmem:[#allocation2] ss:$8 sps:$4 sm:$0xff]   ;;  %v802_v15 = vld [vmem:[#allocation4 + $0x44] ss:$8 sps:$4 sm:$0xff]   ;;  %v805_v18 = vld [vmem:[#allocation4 + $0x34] ss:$8 sps:$4 sm:$0xff]  }
  0x2b   :  { %149 = vmatpush1.bf16.msra.mxu0 %v786_v4  ;;  %377 = vmatprep.subr.bf16.mxu1 %v796_v9  ;;  %v73_v16 = vld [vmem:[%s1023_s0] sm:$0xf]  ;;  %v807_v19 = vld [vmem:[#allocation4 + $0x30] ss:$8 sps:$4 sm:$0xff]   ;;  %v808_v20 = vld [vmem:[#allocation4 + $0x24] ss:$8 sps:$4 sm:$0xff]  }
  0x2c   :  { %150 = vmatprep.subr.bf16.mxu0 %v787_v5  ;;  %v804_v17 = vld [vmem:[#allocation4 + $0x40] ss:$8 sps:$4 sm:$0xff]   ;;  %v811_v22 = vld [vmem:[#allocation4 + $0x14] ss:$8 sps:$4 sm:$0xff]   ;;  %v813_v23 = vld [vmem:[#allocation4 + $0x10] ss:$8 sps:$4 sm:$0xff]  }
  0x2d   :  { %v810_v21 = vld [vmem:[#allocation4 + $0x20] ss:$8 sps:$4 sm:$0xff]   ;;  %v814_v24 = vld [vmem:[#allocation4 + $0x4] ss:$8 sps:$4 sm:$0xff]   ;;  %v817_v26 = vld [vmem:[#allocation4 + $0xf4] ss:$8 sps:$4 sm:$0xff]  }
  0x2e   :  { %378 = vmatpush1.bf16.msra.mxu1 %v798_v11  ;;  %v816_v25 = vld [vmem:[#allocation4] ss:$8 sps:$4 sm:$0xff]   ;;  %v819_v27 = vld [vmem:[#allocation4 + $0xf0] ss:$8 sps:$4 sm:$0xff]   ;;  %v820_v28 = vld [vmem:[#allocation4 + $0xe4] ss:$8 sps:$4 sm:$0xff]  }
  0x2f   :  { %151 = vmatpush1.bf16.msra.mxu0 %v789_v6  ;;  %379 = vmatprep.subr.bf16.mxu1 %v799_v12  ;;  %v822_v29 = vld [vmem:[#allocation4 + $0xe0] ss:$8 sps:$4 sm:$0xff]   ;;  %v823_v30 = vld [vmem:[#allocation4 + $0xd4] ss:$8 sps:$4 sm:$0xff]   ;;  %v825_v31 = vld [vmem:[#allocation4 + $0xd0] ss:$8 sps:$4 sm:$0xff]  }
  0x30   :  { %152 = vmatprep.subr.bf16.mxu0 %v790_v10  ;;  %v826_v32 = vld [vmem:[#allocation4 + $0xc4] ss:$8 sps:$4 sm:$0xff]   ;;  %v828_v33 = vld [vmem:[#allocation4 + $0xc0] ss:$8 sps:$4 sm:$0xff]   ;;  %v829_v34 = vld [vmem:[#allocation4 + $0xb4] ss:$8 sps:$4 sm:$0xff]  }
  0x31   :  { %v831_v35 = vld [vmem:[#allocation4 + $0xb0] ss:$8 sps:$4 sm:$0xff]   ;;  %v832_v36 = vld [vmem:[#allocation4 + $0xa4] ss:$8 sps:$4 sm:$0xff]   ;;  %v834_v37 = vld [vmem:[#allocation4 + $0xa0] ss:$8 sps:$4 sm:$0xff]  }
  0x32   :  { %380 = vmatpush1.bf16.msra.mxu1 %v801_v14  ;;  %v835_v38 = vld [vmem:[#allocation4 + $0x94] ss:$8 sps:$4 sm:$0xff]   ;;  %v837_v39 = vld [vmem:[#allocation4 + $0x90] ss:$8 sps:$4 sm:$0xff]   ;;  %v838_v40 = vld [vmem:[#allocation4 + $0x84] ss:$8 sps:$4 sm:$0xff]  }
  0x33   :  { %153 = vmatpush1.bf16.msra.mxu0 %v792_v13  ;;  %381 = vmatprep.subr.bf16.mxu1 %v802_v15  ;;  %v840_v41 = vld [vmem:[#allocation4 + $0x80] ss:$8 sps:$4 sm:$0xff]   ;;  %v85_v43 = vshrl.u32 %v84_v42, 7  ;;  %v841_v60 = vld [vmem:[#allocation6 + $0x78] sm:$0xff]  }
  0x34   :  { %422 = vmatprep.subr.bf16.mxu0 %v793_v7  ;;  %v82_v45 = vld [vmem:[%s1025_s2] sm:$0x3]  ;;  %v842_v61 = vld [vmem:[#allocation6 + $0x38] sm:$0xff]   ;;  %v845_v10 = vld [vmem:[#allocation6 + $0x68] sm:$0xff]  }
  0x35   :  { %v995_v44 = vsub.s32 0, %v85_v43  ;;  %v1000_v46 = vsub.s32 1, %v85_v43  ;;  %v848_v13 = vld [vmem:[#allocation6 + $0x20] sm:$0xff]  }
  0x36   :  { %699 = vmatmul.mubr.msk.bf16.vlgmr.msra.gmra.mxu0 %vm134_vm0, %v73_v16  ;;  %382 = vmatpush1.bf16.msra.mxu1 %v804_v17  ;;  %v851_v16 = vld [vmem:[#allocation6 + $0x50] sm:$0xff]  }
  0x37   :  { %423 = vmatpush1.bf16.msra.mxu0 %v795_v8  ;;  %383 = vmatprep.subr.bf16.mxu1 %v805_v18  ;;  %v87_v47 = vrot.slane %v82_v45, %v995_v44  ;;  %v91_v48 = vrot.slane %v82_v45, %v1000_v46  ;;  %v843_v8 = vld [vmem:[#allocation6 + $0x70] sm:$0xff]  }
  0x38   :  { %424 = vmatprep.subr.bf16.mxu0 %v796_v9  ;;  %v844_v9 = vld [vmem:[#allocation6 + $0x30] sm:$0xff]  }
  0x3a   :  { %384 = vmatpush1.bf16.msra.mxu1 %v807_v19 }
  0x3b   :  { %425 = vmatpush1.bf16.msra.mxu0 %v798_v11  ;;  %385 = vmatprep.subr.bf16.mxu1 %v808_v20  ;;  %v846_v11 = vld [vmem:[#allocation6 + $0x28] sm:$0xff]  }
  0x3c   :  { %426 = vmatprep.subr.bf16.mxu0 %v799_v12  ;;  %v847_v12 = vld [vmem:[#allocation6 + $0x60] sm:$0xff]  }
  0x3e   :  { %386 = vmatpush1.bf16.msra.mxu1 %v810_v21 }
  0x3f   :  { %427 = vmatpush1.bf16.msra.mxu0 %v801_v14  ;;  %387 = vmatprep.subr.bf16.mxu1 %v811_v22  ;;  %v849_v14 = vld [vmem:[#allocation6 + $0x58] sm:$0xff]  }
  0x40   :  { %428 = vmatprep.subr.bf16.mxu0 %v802_v15  ;;  %v850_v15 = vld [vmem:[#allocation6 + $0x18] sm:$0xff]  }
  0x42   :  { %388 = vmatpush1.bf16.msra.mxu1 %v813_v23 }
  0x43   :  { %429 = vmatpush1.bf16.msra.mxu0 %v804_v17  ;;  %389 = vmatprep.subr.bf16.mxu1 %v814_v24  ;;  %v852_v17 = vld [vmem:[#allocation6 + $0x10] sm:$0xff]  }
  0x44   :  { %430 = vmatprep.subr.bf16.mxu0 %v805_v18  ;;  %v853_v18 = vld [vmem:[#allocation6 + $0x48] sm:$0xff]  }
  0x46   :  { %390 = vmatpush1.bf16.msra.mxu1 %v816_v25 }
  0x47   :  { %431 = vmatpush1.bf16.msra.mxu0 %v807_v19  ;;  %391 = vmatprep.subr.bf16.mxu1 %v817_v26  ;;  %v854_v19 = vld [vmem:[#allocation6 + $0x8] sm:$0xff]  }
  0x48   :  { %432 = vmatprep.subr.bf16.mxu0 %v808_v20  ;;  %v855_v20 = vld [vmem:[#allocation6 + $0x40] sm:$0xff]  }
  0x4a   :  { %392 = vmatpush2.bf16.msra.mxu1 %v819_v27 }
  0x4b   :  { %433 = vmatpush1.bf16.msra.mxu0 %v810_v21  ;;  %393 = vmatprep.subr.bf16.mxu1 %v820_v28  ;;  %v856_v21 = vld [vmem:[#allocation6] sm:$0xff]  }
  0x4c   :  { %434 = vmatprep.subr.bf16.mxu0 %v811_v22 }
  0x4e   :  { %394 = vmatpush2.bf16.msra.mxu1 %v822_v29 }
  0x4f   :  { %435 = vmatpush1.bf16.msra.mxu0 %v813_v23  ;;  %395 = vmatprep.subr.bf16.mxu1 %v823_v30 }
  0x50   :  { %436 = vmatprep.subr.bf16.mxu0 %v814_v24 }
  0x52   :  { %396 = vmatpush2.bf16.msra.mxu1 %v825_v31 }
  0x53   :  { %437 = vmatpush1.bf16.msra.mxu0 %v816_v25  ;;  %397 = vmatprep.subr.bf16.mxu1 %v826_v32 }
  0x54   :  { %438 = vmatprep.subr.bf16.mxu0 %v817_v26 }
  0x56   :  { %398 = vmatpush2.bf16.msra.mxu1 %v828_v33 }
  0x57   :  { %439 = vmatpush2.bf16.msra.mxu0 %v819_v27  ;;  %399 = vmatprep.subr.bf16.mxu1 %v829_v34 }
  0x58   :  { %440 = vmatprep.subr.bf16.mxu0 %v820_v28  ;;  %v467_v28 = vld [vmem:[%s1027_s4] sm:$0x3] }
  0x5a   :  { %400 = vmatpush2.bf16.msra.mxu1 %v831_v35 }
  0x5b   :  { %441 = vmatpush2.bf16.msra.mxu0 %v822_v29  ;;  %401 = vmatprep.subr.bf16.mxu1 %v832_v36  ;;  %v472_v29 = vrot.slane %v467_v28, %v995_v44 }
  0x5c   :  { %442 = vmatprep.subr.bf16.mxu0 %v823_v30  ;;  %v481_v30 = vld [vmem:[%s1028_s5] sm:$0x3] }
  0x5e   :  { %402 = vmatpush2.bf16.msra.mxu1 %v834_v37 }
  0x5f   :  { %443 = vmatpush2.bf16.msra.mxu0 %v825_v31  ;;  %403 = vmatprep.subr.bf16.mxu1 %v835_v38 }
  0x60   :  { %444 = vmatprep.subr.bf16.mxu0 %v826_v32  ;;  %v476_v32 = vrot.slane %v467_v28, %v1000_v46 }
  0x62   :  { %404 = vmatpush2.bf16.msra.mxu1 %v837_v39 }
  0x63   :  { %445 = vmatpush2.bf16.msra.mxu0 %v828_v33  ;;  %405 = vmatprep.subr.bf16.mxu1 %v838_v40 }
  0x64   :  { %446 = vmatprep.subr.bf16.mxu0 %v829_v34 }
  0x66   :  { %406 = vmatpush2.bf16.msra.mxu1 %v840_v41 }
  0x67   :  { %447 = vmatpush2.bf16.msra.mxu0 %v831_v35  ;;  %751 = vmatprep.subr.bf16.mxu1 %v841_v60  ;;  %v486_v35 = vrot.slane %v481_v30, %v995_v44 }
  0x68   :  { %448 = vmatprep.subr.bf16.mxu0 %v832_v36 }
  0x6b   :  { %449 = vmatpush2.bf16.msra.mxu0 %v834_v37  ;;  %v490_v37 = vrot.slane %v481_v30, %v1000_v46 }
  0x6c   :  { %450 = vmatprep.subr.bf16.mxu0 %v835_v38 }
  0x6f   :  { %451 = vmatpush2.bf16.msra.mxu0 %v837_v39 }
  0x70   :  { %452 = vmatprep.subr.bf16.mxu0 %v838_v40 }
  0x73   :  { %453 = vmatpush2.bf16.msra.mxu0 %v840_v41 }
  0xf6   :  { %v172_v49 = vpop.f32.mrf.mxu0 }
  0xf7   :  { %v173_v50 = vadd.f32 %v172_v49, %v87_v47  ;;  %v732_v47 = vld [vmem:[%s1030_s7] ss:$0 sm:$0xff] }
  0xf8   :  { %v174_v51 = vpop.f32.mrf.mxu0 }
  0xf9   :  { %v175_v52 = vadd.f32 %v174_v51, %v91_v48  ;;  %v179_v53 = vmax.f32 %v173_v50, 0.0 }
  0xfa   :  { %v176_v54 = vpop.f32.mrf.mxu0 }
  0xfb   :  { %v180_v55 = vmax.f32 %v175_v52, 0.0  ;;  %v181_v59 = vpack.c.bf16 %v179_v53, %v179_v53 }
  0xfc   :  { %v177_v56 = vpop.f32.mrf.mxu0 }
  0xfd   :  { %v750_v57 = vpack.c.bf16 %v180_v55, %v179_v53  ;;  %v182_v58 = vpack.c.bf16 %v180_v55, %v180_v55 }
  0xff   :  { %678 = vst [vmem:[%s1031_s8] sm:$0xff] %v750_v57  ;;  %407 = vmatprep.mubr.bf16.mxu1 %v182_v58 }
 0x100   :  { %408 = vmatmul.mubr.bf16.vlgmr.msra.gmra.mxu1 %v181_v59 }
 0x101   :  { %752 = vmatpush3.bf16.msra.mxu1 %v842_v61 }
 0x102   :  { %753 = vmatprep.subr.bf16.mxu1 %v843_v8 }
 0x105   :  { %754 = vmatpush3.bf16.msra.mxu1 %v844_v9 }
 0x106   :  { %755 = vmatprep.subr.bf16.mxu1 %v845_v10 }
 0x109   :  { %756 = vmatpush3.bf16.msra.mxu1 %v846_v11 }
 0x10a   :  { %757 = vmatprep.subr.bf16.mxu1 %v847_v12 }
 0x10d   :  { %758 = vmatpush3.bf16.msra.mxu1 %v848_v13 }
 0x10e   :  { %759 = vmatprep.subr.bf16.mxu1 %v849_v14 }
 0x111   :  { %760 = vmatpush3.bf16.msra.mxu1 %v850_v15 }
 0x112   :  { %761 = vmatprep.subr.bf16.mxu1 %v851_v16 }
 0x115   :  { %762 = vmatpush3.bf16.msra.mxu1 %v852_v17 }
 0x116   :  { %763 = vmatprep.subr.bf16.mxu1 %v853_v18 }
 0x119   :  { %764 = vmatpush3.bf16.msra.mxu1 %v854_v19 }
 0x11a   :  { %765 = vmatprep.subr.bf16.mxu1 %v855_v20 }
 0x11d   :  { %766 = vmatpush3.bf16.msra.mxu1 %v856_v21 }
 0x1c0   :  { %v409_v62 = vpop.f32.mrf.mxu1 }
 0x1c1   :  { %v416_v63 = vsub.f32 %v179_v53, %v409_v62 }
 0x1c2   :  { %v411_v0 = vpop.f32.mrf.mxu1 }
 0x1c3   :  { %v417_v1 = vsub.f32 %v180_v55, %v411_v0  ;;  %v418_v2 = vmul.f32 %v416_v63, %v416_v63 }
 0x1c4   :  { %v413_v3 = vpop.f32.mrf.mxu1 }
 0x1c5   :  { %v419_v4 = vmul.f32 %v417_v1, %v417_v1  ;;  %v420_v7 = vpack.c.bf16 %v418_v2, %v418_v2 }
 0x1c6   :  { %v414_v5 = vpop.f32.mrf.mxu1 }
 0x1c7   :  { %v421_v6 = vpack.c.bf16 %v419_v4, %v419_v4 }
 0x1c9   :  { %454 = vmatprep.mubr.bf16.mxu0 %v421_v6 }
 0x1ca   :  { %455 = vmatmul.mubr.bf16.vlgmr.msra.gmra.mxu0 %v420_v7 }
 0x28a   :  { %v456_v22 = vpop.f32.mrf.mxu0 }
 0x28b   :  { %v457_v23 = vadd.f32 1e-05, %v456_v22 }
 0x28c   :  { %v458_v24 = vpop.f32.mrf.mxu0 }
 0x28d   :  { %857 = vrsqrt.f32 %v457_v23  ;;  %v459_v25 = vadd.f32 1e-05, %v458_v24 }
 0x28e   :  { %v460_v26 = vpop.f32.mrf.mxu0 }
 0x28f   :  { %859 = vrsqrt.f32 %v459_v25 }
 0x290   :  { %v461_v27 = vpop.f32.mrf.mxu0 }
 0x29a   :  { %v858_v31 = vpop.eup %857 }
 0x29b   :  { %v465_v33 = vmul.f32 %v858_v31, %v416_v63 }
 0x29c   :  { %v860_v34 = vpop.eup %859 }
 0x29d   :  { %v466_v36 = vmul.f32 %v860_v34, %v417_v1  ;;  %v479_v38 = vmul.f32 %v472_v29, %v465_v33 }
 0x29f   :  { %v480_v39 = vmul.f32 %v476_v32, %v466_v36  ;;  %v493_v40 = vadd.f32 %v486_v35, %v479_v38 }
 0x2a1   :  { %v494_v41 = vadd.f32 %v490_v37, %v480_v39  ;;  %v495_v43 = vpack.c.bf16 %v493_v40, %v493_v40 }
 0x2a3   :  { %v496_v42 = vpack.c.bf16 %v494_v41, %v494_v41 }
 0x2a5   :  { %664 = vmatprep.mubr.bf16.mxu1 %v496_v42 }
 0x2a6   :  { %665 = vmatmul.mubr.bf16.vlgmr.msra.gmra.mxu1 %v495_v43 }
 0x366   :  { %v767_v45 = vpop.f32.mrf.mxu1 }
 0x368   :  { %v768_v48 = vpop.f32.mrf.mxu1 }
 0x369   :  { %v769_v49 = vadd.f32 %v768_v48, %v767_v45 }
 0x36a   :  { %v770_v50 = vpop.f32.mrf.mxu1 }
 0x36b   :  { %v667_v44 = vadd.f32 %v769_v49, %v732_v47 }
 0x36c   :  { %v771_v51 = vpop.f32.mrf.mxu1 }
 0x36d   :  { %v679_v52 = vpack.c.bf16 %v667_v44, %v667_v44 }
 0x36f   :  { %680 = vst [vmem:[%s1032_s9] sm:$0xf] %v679_v52 }
 0x370   :  { %689 = vsyncpa [#allocation3], 1 }
 0x371   :  { %690 = vsyncpa [#allocation5], 1 }

// kernel: model_forward.5
= control target key start
LH: loop header
LB: loop body
LE: loop exit
PB: predicated region body
PF: predicated region fallthrough
CT: control target
= control target key end

     0   :  { %16 = vsyncpa [#allocation4], 0  ;;  %s1345_s0 = inlined_call_operand.vmem [shape: bf16[2,8,32], index: 0, kind: input, shape index: {}]   ;;  %s1346_s1 = inlined_call_operand.vmem [shape: f32[1,32], index: 1, kind: input, shape index: {}]   ;;  %s1347_s2 = inlined_call_operand.vmem [shape: f32[1,32], index: 2, kind: input, shape index: {}]   ;;  %s1348_s3 = inlined_call_operand.vmem [shape: bf16[32,32], index: 3, kind: input, shape index: {}]   ;;  %s1349_s4 = inlined_call_operand.vmem [shape: f32[1,32], index: 4, kind: input, shape index: {}]   ;;  %s1350_s5 = inlined_call_operand.hbm [shape: bf16[32,32], index: 5, kind: input, shape index: {}]   ;;  %s1351_s6 = inlined_call_operand.vmem [shape: f32[1,32], index: 6, kind: input, shape index: {}]   ;;  %s1352_s7 = inlined_call_operand.vmem [shape: f32[8,8,32], index: 7, kind: input, shape index: {}]   ;;  %s1353_s8 = inlined_call_operand.vmem [shape: f32[8,32], index: 8, kind: input, shape index: {}]   ;;  %s1354_s9 = inlined_call_operand.hbm [shape: bf16[32,32], index: 9, kind: input, shape index: {}]   ;;  %s1355_s10 = inlined_call_operand.hbm [shape: f32[1,32], index: 10, kind: input, shape index: {}]   ;;  %s1356_s11 = inlined_call_operand.vmem [shape: bf16[2,8,32], index: 11, kind: output, shape index: {}]  }
   0x1   :  { %17 = vsyncpa [#allocation6], 0  ;;  %s1005_s17 = smov [#allocation5]   ;;  %s1006_s19 = smov [#allocation3]  }
   0x2   :  { %s51_s18 = sshll.u32 %s1005_s17, 4  ;;  %s33_s20 = sshll.u32 %s1006_s19, 4  ;;  %s52_s18 = int_to_ptr.vmem [resolvable:$true] %s51_s18  ;;  %s34_s20 = int_to_ptr.vmem [resolvable:$true] %s33_s20 }
   0x3   :  { %s949_s21 = scalar_lea.vmem %s52_s18, 256  ;;  %p954_p1 = scmp.lt.s32.totalorder %s52_s18, %s52_s18 }
   0x4   :  { %p950_p0 = scmp.ne.s32.totalorder %s52_s18, %s949_s21  ;;  %p955_p2 = scmp.lt.s32.totalorder %s949_s21, %s949_s21 }
   0x6   :  { %p956_p3 = por %p955_p2, %p954_p1 }
   0x8   :  { %p957_p4 = pnand %p956_p3, %p950_p0 }
   0xa   :  { %960 = shalt.err (!%p957_p4)
}
   0xb   :  { %s1007_s22 = smov 64   ;;  %s1008_s23 = smov 4  }
   0xc   :  { %57 = dma.hbm_to_vmem [thread:$0]  %s1354_s9, 256, %s52_s18, [#allocation6], %s1007_s22, %s1007_s22, %s1008_s23  }
   0xd   :  { %s969_s26 = scalar_lea.vmem %s34_s20, 256  ;;  %p974_p6 = scmp.lt.s32.totalorder %s34_s20, %s34_s20 }
   0xe   :  { %p970_p5 = scmp.ne.s32.totalorder %s34_s20, %s969_s26  ;;  %p975_p7 = scmp.lt.s32.totalorder %s969_s26, %s969_s26 }
  0x10   :  { %p976_p8 = por %p975_p7, %p974_p6 }
  0x12   :  { %p977_p9 = pnand %p976_p8, %p970_p5 }
  0x14   :  { %980 = shalt.err (!%p977_p9)
}
  0x15   :  { %39 = dma.hbm_to_vmem [thread:$0]  %s1350_s5, 256, %s34_s20, [#allocation4], %s1007_s22, %s1007_s22, %s1008_s23  }
  0x16   :  { %s1009_s29 = smov [#allocation7]  }
  0x17   :  { %s64_s30 = sshll.u32 %s1009_s29, 4  ;;  %s65_s30 = int_to_ptr.vmem [resolvable:$true] %s64_s30 }
  0x18   :  { %s989_s12 = scalar_lea.vmem %s65_s30, 16  ;;  %s993_s13 = scalar_lea.vmem %s65_s30, 32 }
  0x19   :  { %p990_p10 = scmp.ne.s32.totalorder %s65_s30, %s989_s12  ;;  %p994_p11 = scmp.lt.s32.totalorder %s65_s30, %s65_s30 }
  0x1a   :  { %p995_p12 = scmp.lt.s32.totalorder %s993_s13, %s989_s12 }
  0x1c   :  { %p996_p13 = por %p995_p12, %p994_p11 }
  0x1e   :  { %p997_p0 = pnand %p996_p13, %p990_p10 }
  0x20   :  { %1000 = shalt.err (!%p997_p0)
}
  0x21   :  { %67 = dma.hbm_to_vmem [thread:$0]  %s1355_s10, 16, %s65_s30, [#allocation6]  }
  0x22   :  { %1001 = dma.done.wait [#allocation4], 256  }
  0x23   :  { %1002 = vsyncadd [#allocation4], 4294967040 }
  0x24   :  { %1003 = dma.done.wait [#allocation6], 272  }
  0x25   :  { %1004 = vsyncadd [#allocation6], 4294967024  ;;  %v102_v0 = vld [vmem:[%s1345_s0] sm:$0xff]   ;;  %vm104_vm0 = vcmask 261120   ;;  %v923_v15 = vld [vmem:[%s1348_s3 + $0x8] sm:$0xff]   ;;  %v1010_v17 = vmov 0.0  }
  0x26   :  { %v1084_v1 = vunpack.c.l.bf16 %v102_v0  ;;  %v1086_v2 = vunpack.c.h.bf16 %v102_v0  ;;  %v1099_v16 = vld [vmem:[#allocation3 + $0x8] sm:$0xff]   ;;  %868 = vmatprep.subr.bf16.mxu0 %v1010_v17  ;;  %876 = vmatprep.subr.bf16.mxu1 %v1010_v17  ;;  %v925_v18 = vld [vmem:[%s1348_s3] sm:$0xff]   ;;  %vm1011_vm1 = vmmov 0   ;;  %vm82_vm2 = vcmask 254976   ;;  %v928_v39 = vld [vmem:[#allocation5] sm:$0xff]  }
  0x27   :  { %869 = vmatpush3.bf16.msra.mxu0 %v923_v15  ;;  %877 = vmatpush3.bf16.msra.mxu1 %v1099_v16  ;;  %v1107_v19 = vld [vmem:[#allocation3] sm:$0xff]   ;;  %v827_v27 = vld [vmem:[%s1346_s1] ss:$0 sm:$0xff]  ;;  %83 = vst.msk [vmem:[#allocation2] sm:$0x3] %vm82_vm2, %v1010_v17  ;;  %v1170_v49 = vld [vmem:[%s1352_s7 + $0x10] sm:$0xff] }
  0x28   :  { %v105_v3 = vsel %vm104_vm0, %v1084_v1, 0.0  ;;  %v502_v4 = vsel %vm104_vm0, %v1086_v2, 0.0  ;;  %870 = vmatprep.subr.bf16.mxu0 %v1010_v17  ;;  %878 = vmatprep.subr.bf16.mxu1 %v1010_v17  ;;  %v828_v30 = vld [vmem:[%s1347_s2] ss:$0 sm:$0xff]  ;;  %v1165_v48 = vld [vmem:[%s1352_s7 + $0x8] sm:$0xff]  ;;  %v1175_v50 = vld [vmem:[%s1352_s7 + $0x18] sm:$0xff] }
  0x29   :  { %106 = vadd.xlane.f32.xlu0 %v105_v3  ;;  %503 = vadd.xlane.f32.xlu1 %v502_v4  ;;  %v927_v38 = vld [vmem:[#allocation5 + $0x8] sm:$0xff]   ;;  %v1188_v56 = vld [vmem:[%s1352_s7 + $0x28] sm:$0xff]  ;;  %v1196_v58 = vld [vmem:[%s1352_s7 + $0x30] sm:$0xff]  ;;  %vm362_vm3 = vcmask 253952   ;;  %vm419_vm4 = vcmask 1041409   ;;  %vm422_vm5 = vcmask 1042434  }
  0x2a   :  { %872 = vmatprep.mubr.msk.bf16.mxu0 %vm1011_vm1, %v1010_v17  ;;  %880 = vmatprep.mubr.msk.bf16.mxu1 %vm1011_vm1, %v1010_v17  ;;  %v101_v40 = vld [vmem:[%s1353_s8] sm:$0xff]  ;;  %vm425_vm6 = vcmask 1043459   ;;  %vm428_vm7 = vcmask 1044484   ;;  %vm431_vm8 = vcmask 1045509   ;;  %vm434_vm9 = vcmask 1046534  }
  0x2b   :  { %871 = vmatpush3.bf16.msra.mxu0 %v925_v18  ;;  %879 = vmatpush3.bf16.msra.mxu1 %v1107_v19  ;;  %v1150_v43 = vld [vmem:[%s1349_s4] ss:$0 sm:$0xff]  ;;  %vm437_vm10 = vcmask 1047559   ;;  %vm497_vm11 = vcmask 257024  }
  0x2c   :  { %892 = vmatprep.subr.bf16.mxu1 %v1010_v17  ;;  %884 = vmatprep.subr.bf16.mxu0 %v1010_v17  ;;  %v1155_v44 = vld [vmem:[%s1351_s6] ss:$0 sm:$0xff] }
  0x2d   :  { %v1160_v45 = vld [vmem:[%s1352_s7] sm:$0xff] }
  0x2e   :  { %v838_v41 = vld [vmem:[#allocation2] ss:$0 sm:$0xff]  ;;  %v847_v46 = vld [vmem:[#allocation2 + $0x1] ss:$0 sm:$0xff] }
  0x2f   :  { %v1145_v42 = vmul.f32 %v838_v41, %v101_v40  ;;  %v1183_v55 = vld [vmem:[%s1352_s7 + $0x20] sm:$0xff]  ;;  %v1203_v4 = vmul.f32 %v847_v46, %v101_v40 }
  0x31   :  { %v339_v52 = vrot.slane %v1145_v42, 1  ;;  %v340_v53 = vrot.slane %v1145_v42, 2  ;;  %v341_v59 = vrot.slane %v1145_v42, 3  ;;  %v342_v60 = vrot.slane %v1145_v42, 4 }
  0x32   :  { %v343_v63 = vrot.slane %v1145_v42, 5  ;;  %v344_v0 = vrot.slane %v1145_v42, 6  ;;  %v345_v3 = vrot.slane %v1145_v42, 7 }
  0xb2   :  { %v107_v5 = vpop.xlane.xlu0 %106  ;;  %v504_v6 = vpop.xlane.xlu1 %503 }
  0xb3   :  { %v109_v7 = vmul.f32 0.03125, %v107_v5  ;;  %v505_v8 = vmul.f32 0.03125, %v504_v6 }
  0xb5   :  { %v110_v9 = vsub.f32 %v1084_v1, %v109_v7  ;;  %v506_v10 = vsub.f32 %v1086_v2, %v505_v8 }
  0xb7   :  { %v111_v11 = vmul.f32 %v110_v9, %v110_v9  ;;  %v507_v12 = vmul.f32 %v506_v10, %v506_v10 }
  0xb9   :  { %v112_v13 = vsel %vm104_vm0, %v111_v11, 0.0  ;;  %v508_v14 = vsel %vm104_vm0, %v507_v12, 0.0 }
  0xba   :  { %113 = vadd.xlane.f32.xlu0 %v112_v13  ;;  %509 = vadd.xlane.f32.xlu1 %v508_v14  ;;  %v1215_v14 = vld [vmem:[%s1352_s7 + $0x38] sm:$0xff] }
 0x143   :  { %v114_v20 = vpop.xlane.xlu0 %113  ;;  %v510_v21 = vpop.xlane.xlu1 %509 }
 0x144   :  { %v115_v22 = vmul.f32 0.03125, %v114_v20  ;;  %v511_v23 = vmul.f32 0.03125, %v510_v21 }
 0x146   :  { %v116_v24 = vadd.f32 1e-05, %v115_v22  ;;  %v512_v25 = vadd.f32 1e-05, %v511_v23 }
 0x148   :  { %929 = vrsqrt.f32 %v116_v24 }
 0x149   :  { %931 = vrsqrt.f32 %v512_v25 }
 0x155   :  { %v930_v26 = vpop.eup %929 }
 0x156   :  { %v932_v28 = vpop.eup %931  ;;  %v118_v29 = vmul.f32 %v930_v26, %v110_v9 }
 0x157   :  { %v514_v31 = vmul.f32 %v932_v28, %v506_v10 }
 0x158   :  { %v125_v32 = vmul.f32 %v827_v27, %v118_v29 }
 0x159   :  { %v515_v34 = vmul.f32 %v827_v27, %v514_v31 }
 0x15a   :  { %v132_v33 = vadd.f32 %v828_v30, %v125_v32 }
 0x15b   :  { %v516_v36 = vadd.f32 %v828_v30, %v515_v34 }
 0x15c   :  { %v133_v35 = vpack.c.bf16 %v132_v33, %v132_v33 }
 0x15d   :  { %v1131_v37 = vpack.c.bf16 %v516_v36, %v516_v36 }
 0x15e   :  { %873 = vmatmul.mubr.msk.bf16.vlgmr.msra.gmra.mxu0 %vm104_vm0, %v133_v35  ;;  %881 = vmatmul.mubr.msk.bf16.vlgmr.msra.gmra.mxu1 %vm104_vm0, %v133_v35 }
 0x15f   :  { %893 = vmatpush3.bf16.msra.mxu1 %v923_v15  ;;  %896 = vmatprep.mubr.msk.bf16.mxu1 %vm1011_vm1, %v1010_v17 }
 0x160   :  { %894 = vmatprep.subr.bf16.mxu1 %v1010_v17  ;;  %888 = vmatprep.mubr.msk.bf16.mxu0 %vm1011_vm1, %v1010_v17 }
 0x161   :  { %885 = vmatpush3.bf16.msra.mxu0 %v927_v38 }
 0x162   :  { %886 = vmatprep.subr.bf16.mxu0 %v1010_v17 }
 0x163   :  { %895 = vmatpush3.bf16.msra.mxu1 %v925_v18 }
 0x164   :  { %908 = vmatprep.subr.bf16.mxu1 %v1010_v17 }
 0x165   :  { %887 = vmatpush3.bf16.msra.mxu0 %v928_v39 }
 0x166   :  { %897 = vmatmul.mubr.msk.bf16.vlgmr.msra.gmra.mxu1 %vm104_vm0, %v1131_v37  ;;  %900 = vmatprep.subr.bf16.mxu0 %v1010_v17 }
 0x167   :  { %912 = vmatprep.mubr.msk.bf16.mxu1 %vm1011_vm1, %v1010_v17  ;;  %909 = vmatpush3.bf16.msra.mxu1 %v927_v38 }
 0x168   :  { %910 = vmatprep.subr.bf16.mxu1 %v1010_v17 }
 0x16b   :  { %911 = vmatpush3.bf16.msra.mxu1 %v928_v39 }
 0x21e   :  { %v189_v47 = vpop.f32.mrf.mxu0  ;;  %v247_v51 = vpop.f32.mrf.mxu1 }
 0x21f   :  { %v190_v54 = vadd.f32 %v1150_v43, %v189_v47  ;;  %v1191_v57 = vadd.f32 %v1155_v44, %v247_v51 }
 0x220   :  { %v874_v61 = vpop.f32.mrf.mxu0  ;;  %v882_v62 = vpop.f32.mrf.mxu1 }
 0x221   :  { %v268_v5 = vmul.f32 %v1160_v45, %v190_v54  ;;  %v269_v6 = vmul.f32 %v1165_v48, %v190_v54  ;;  %v270_v7 = vmul.f32 %v1170_v49, %v190_v54  ;;  %v271_v8 = vmul.f32 %v1175_v50, %v190_v54 }
 0x222   :  { %v272_v9 = vmul.f32 %v1183_v55, %v190_v54  ;;  %v273_v10 = vmul.f32 %v1188_v56, %v190_v54  ;;  %v837_v11 = vmul.f32 -1.442695, %v1191_v57  ;;  %v192_v12 = vpop.f32.mrf.mxu0  ;;  %v250_v13 = vpop.f32.mrf.mxu1  ;;  %v274_v15 = vmul.f32 %v1196_v58, %v190_v54 }
 0x223   :  { %v276_v18 = vsel %vm104_vm0, %v268_v5, 0.0  ;;  %v283_v20 = vsel %vm104_vm0, %v269_v6, 0.0  ;;  %v290_v21 = vsel %vm104_vm0, %v270_v7, 0.0  ;;  %v297_v22 = vsel %vm104_vm0, %v271_v8, 0.0 }
 0x224   :  { %v277_v23 = vrot.slane %v276_v18, 4  ;;  %v284_v24 = vrot.slane %v283_v20, 4  ;;  %v291_v25 = vrot.slane %v290_v21, 4  ;;  %v298_v26 = vrot.slane %v297_v22, 4  ;;  %v875_v27 = vpop.f32.mrf.mxu0  ;;  %v883_v28 = vpop.f32.mrf.mxu1 }
 0x225   :  { %933 = vpow2.f32 %v837_v11  ;;  %v275_v29 = vmul.f32 %v1215_v14, %v190_v54  ;;  %v304_v30 = vsel %vm104_vm0, %v272_v9, 0.0  ;;  %v311_v31 = vsel %vm104_vm0, %v273_v10, 0.0 }
 0x226   :  { %v278_v32 = vadd.f32 %v277_v23, %v276_v18  ;;  %v285_v33 = vadd.f32 %v284_v24, %v283_v20  ;;  %v292_v34 = vadd.f32 %v291_v25, %v290_v21  ;;  %v299_v35 = vadd.f32 %v298_v26, %v297_v22  ;;  %v555_v36 = vpop.f32.mrf.mxu1 }
 0x227   :  { %v305_v38 = vrot.slane %v304_v30, 4  ;;  %v312_v39 = vrot.slane %v311_v31, 4  ;;  %v318_v40 = vsel %vm104_vm0, %v274_v15, 0.0  ;;  %v325_v41 = vsel %vm104_vm0, %v275_v29, 0.0 }
 0x228   :  { %v279_v46 = vrot.slane %v278_v32, 2  ;;  %v286_v47 = vrot.slane %v285_v33, 2  ;;  %v293_v51 = vrot.slane %v292_v34, 2  ;;  %v300_v61 = vrot.slane %v299_v35, 2  ;;  %v898_v54 = vpop.f32.mrf.mxu1 }
 0x229   :  { %v306_v62 = vadd.f32 %v305_v38, %v304_v30  ;;  %v313_v5 = vadd.f32 %v312_v39, %v311_v31  ;;  %v319_v6 = vrot.slane %v318_v40, 4  ;;  %v326_v7 = vrot.slane %v325_v41, 4 }
 0x22a   :  { %v287_v8 = vadd.f32 %v286_v47, %v285_v33  ;;  %v280_v9 = vadd.f32 %v279_v46, %v278_v32  ;;  %v294_v10 = vadd.f32 %v293_v51, %v292_v34  ;;  %v301_v11 = vadd.f32 %v300_v61, %v299_v35  ;;  %v558_v12 = vpop.f32.mrf.mxu1 }
 0x22b   :  { %v307_v13 = vrot.slane %v306_v62, 2  ;;  %v314_v18 = vrot.slane %v313_v5, 2  ;;  %v320_v20 = vadd.f32 %v319_v6, %v318_v40  ;;  %v327_v15 = vadd.f32 %v326_v7, %v325_v41 }
 0x22c   :  { %v281_v21 = vrot.slane %v280_v9, 1  ;;  %v288_v22 = vrot.slane %v287_v8, 1  ;;  %v295_v23 = vrot.slane %v294_v10, 1  ;;  %v302_v24 = vrot.slane %v301_v11, 1  ;;  %v899_v25 = vpop.f32.mrf.mxu1 }
 0x22d   :  { %v308_v26 = vadd.f32 %v307_v13, %v306_v62  ;;  %v315_v27 = vadd.f32 %v314_v18, %v313_v5  ;;  %v321_v28 = vrot.slane %v320_v20, 2  ;;  %v328_v29 = vrot.slane %v327_v15, 2 }
 0x22e   :  { %v282_v30 = vadd.f32 %v281_v21, %v280_v9  ;;  %v289_v31 = vadd.f32 %v288_v22, %v287_v8  ;;  %v296_v32 = vadd.f32 %v295_v23, %v294_v10  ;;  %v687_v33 = vrot.slane %v1203_v4, 1 }
 0x22f   :  { %v303_v34 = vadd.f32 %v302_v24, %v301_v11  ;;  %v309_v35 = vrot.slane %v308_v26, 1  ;;  %v322_v38 = vadd.f32 %v321_v28, %v320_v20  ;;  %v329_v39 = vadd.f32 %v328_v29, %v327_v15 }
 0x230   :  { %v316_v40 = vrot.slane %v315_v27, 1  ;;  %v688_v41 = vrot.slane %v1203_v4, 2  ;;  %v689_v46 = vrot.slane %v1203_v4, 3  ;;  %v690_v47 = vrot.slane %v1203_v4, 4 }
 0x231   :  { %v323_v51 = vrot.slane %v322_v38, 1  ;;  %v330_v61 = vrot.slane %v329_v39, 1  ;;  %v691_v54 = vrot.slane %v1203_v4, 5  ;;  %v692_v62 = vrot.slane %v1203_v4, 6 }
 0x232   :  { %v934_v5 = vpop.eup %933  ;;  %v1234_v6 = vadd.f32 %v1145_v42, %v282_v30  ;;  %v1238_v7 = vadd.f32 %v339_v52, %v289_v31  ;;  %v1242_v8 = vadd.f32 %v340_v53, %v296_v32  ;;  %v556_v9 = vadd.f32 %v1150_v43, %v555_v36 }
 0x233   :  { %v256_v10 = vadd.f32 1.0, %v934_v5  ;;  %v310_v11 = vadd.f32 %v309_v35, %v308_v26  ;;  %v331_v12 = vadd.f32 %v330_v61, %v329_v39  ;;  %v1247_v13 = vadd.f32 %v341_v59, %v303_v34 }
 0x234   :  { %v317_v18 = vadd.f32 %v316_v40, %v315_v27  ;;  %v616_v20 = vmul.f32 %v556_v9, %v1160_v45  ;;  %v617_v15 = vmul.f32 %v556_v9, %v1165_v48  ;;  %v618_v52 = vmul.f32 %v556_v9, %v1170_v49 }
 0x235   :  { %935 = vrcp.f32 %v256_v10  ;;  %v324_v21 = vadd.f32 %v323_v51, %v322_v38  ;;  %v1254_v53 = vadd.f32 %v345_v3, %v331_v12  ;;  %v619_v43 = vmul.f32 %v556_v9, %v1175_v50 }
 0x236   :  { %v620_v36 = vmul.f32 %v556_v9, %v1183_v55  ;;  %v621_v59 = vmul.f32 %v556_v9, %v1188_v56  ;;  %v624_v22 = vsel %vm104_vm0, %v616_v20, 0.0  ;;  %v631_v45 = vsel %vm104_vm0, %v617_v15, 0.0 }
 0x237   :  { %363 = vst.msk [vmem:[#allocation2] sm:$0x1] %vm362_vm3, %v1254_v53  ;;  %v625_v48 = vrot.slane %v624_v22, 4  ;;  %v632_v49 = vrot.slane %v631_v45, 4  ;;  %v638_v23 = vsel %vm104_vm0, %v618_v52, 0.0  ;;  %v645_v3 = vsel %vm104_vm0, %v619_v43, 0.0 }
 0x238   :  { %v639_v24 = vrot.slane %v638_v23, 4  ;;  %v646_v25 = vrot.slane %v645_v3, 4  ;;  %v622_v50 = vmul.f32 %v556_v9, %v1196_v58  ;;  %v623_v55 = vmul.f32 %v556_v9, %v1215_v14 }
 0x239   :  { %v626_v56 = vadd.f32 %v625_v48, %v624_v22  ;;  %v633_v26 = vadd.f32 %v632_v49, %v631_v45  ;;  %v652_v27 = vsel %vm104_vm0, %v620_v36, 0.0  ;;  %v659_v28 = vsel %vm104_vm0, %v621_v59, 0.0 }
 0x23a   :  { %v640_v29 = vadd.f32 %v639_v24, %v638_v23  ;;  %v647_v30 = vadd.f32 %v646_v25, %v645_v3  ;;  %v653_v31 = vrot.slane %v652_v27, 4  ;;  %v660_v32 = vrot.slane %v659_v28, 4 }
 0x23b   :  { %v627_v34 = vrot.slane %v626_v56, 2  ;;  %v634_v35 = vrot.slane %v633_v26, 2  ;;  %v666_v38 = vsel %vm104_vm0, %v622_v50, 0.0  ;;  %v673_v39 = vsel %vm104_vm0, %v623_v55, 0.0 }
 0x23c   :  { %v641_v40 = vrot.slane %v640_v29, 2  ;;  %v648_v58 = vrot.slane %v647_v30, 2  ;;  %v654_v51 = vadd.f32 %v653_v31, %v652_v27  ;;  %v661_v14 = vadd.f32 %v660_v32, %v659_v28 }
 0x23d   :  { %v635_v61 = vadd.f32 %v634_v35, %v633_v26  ;;  %v628_v5 = vadd.f32 %v627_v34, %v626_v56  ;;  %v667_v9 = vrot.slane %v666_v38, 4  ;;  %v674_v10 = vrot.slane %v673_v39, 4 }
 0x23e   :  { %v642_v12 = vadd.f32 %v641_v40, %v640_v29  ;;  %v649_v20 = vadd.f32 %v648_v58, %v647_v30  ;;  %v655_v15 = vrot.slane %v654_v51, 2  ;;  %v662_v52 = vrot.slane %v661_v14, 2 }
 0x23f   :  { %v629_v43 = vrot.slane %v628_v5, 1  ;;  %v636_v36 = vrot.slane %v635_v61, 1  ;;  %v668_v59 = vadd.f32 %v667_v9, %v666_v38  ;;  %v675_v22 = vadd.f32 %v674_v10, %v673_v39 }
 0x240   :  { %v643_v45 = vrot.slane %v642_v12, 1  ;;  %v650_v48 = vrot.slane %v649_v20, 1  ;;  %v656_v49 = vadd.f32 %v655_v15, %v654_v51  ;;  %v663_v23 = vadd.f32 %v662_v52, %v661_v14 }
 0x241   :  { %v358_v3 = vadd.f32 %v342_v60, %v310_v11  ;;  %v630_v24 = vadd.f32 %v629_v43, %v628_v5  ;;  %v637_v25 = vadd.f32 %v636_v36, %v635_v61  ;;  %v669_v50 = vrot.slane %v668_v59, 2 }
 0x242   :  { %v936_v55 = vpop.eup %935  ;;  %v359_v56 = vadd.f32 %v343_v63, %v317_v18  ;;  %v360_v26 = vadd.f32 %v344_v0, %v324_v21  ;;  %v644_v27 = vadd.f32 %v643_v45, %v642_v12  ;;  %v676_v28 = vrot.slane %v675_v22, 2 }
 0x243   :  { %v259_v29 = vmul.f32 %v936_v55, %v1191_v57  ;;  %v651_v30 = vadd.f32 %v650_v48, %v649_v20  ;;  %v657_v31 = vrot.slane %v656_v49, 1  ;;  %v1279_v32 = vadd.f32 %v1203_v4, %v630_v24 }
 0x244   :  { %v664_v60 = vrot.slane %v663_v23, 1  ;;  %v670_v11 = vadd.f32 %v669_v50, %v668_v59  ;;  %v1283_v34 = vadd.f32 %v687_v33, %v637_v25  ;;  %v1287_v42 = vadd.f32 %v688_v41, %v644_v27 }
 0x245   :  { %v365_v63 = vrot.slane %v259_v29, 1  ;;  %v366_v0 = vrot.slane %v259_v29, 2  ;;  %v367_v18 = vrot.slane %v259_v29, 3  ;;  %v368_v57 = vrot.slane %v259_v29, 4 }
 0x246   :  { %v369_v21 = vrot.slane %v259_v29, 5  ;;  %v370_v35 = vrot.slane %v259_v29, 6  ;;  %v371_v38 = vrot.slane %v259_v29, 7  ;;  %v380_v39 = vmul.f32 %v1234_v6, %v259_v29 }
 0x247   :  { %v381_v40 = vmul.f32 %v365_v63, %v1238_v7  ;;  %v382_v33 = vmul.f32 %v366_v0, %v1242_v8  ;;  %v383_v58 = vmul.f32 %v367_v18, %v1247_v13  ;;  %v384_v51 = vmul.f32 %v368_v57, %v358_v3 }
 0x248   :  { %v385_v41 = vmul.f32 %v369_v21, %v359_v56  ;;  %v386_v14 = vmul.f32 %v370_v35, %v360_v26  ;;  %v387_v61 = vmul.f32 %v371_v38, %v1254_v53  ;;  %v388_v5 = vpack.c.bf16 %v380_v39, %v380_v39 }
 0x249   :  { %v389_v9 = vpack.c.bf16 %v381_v40, %v381_v40  ;;  %v390_v10 = vpack.c.bf16 %v382_v33, %v382_v33  ;;  %v391_v12 = vpack.c.bf16 %v383_v58, %v383_v58  ;;  %v392_v20 = vpack.c.bf16 %v384_v51, %v384_v51 }
 0x24a   :  { %v393_v6 = vpack.c.bf16 %v385_v41, %v385_v41  ;;  %v394_v15 = vpack.c.bf16 %v386_v14, %v386_v14  ;;  %v395_v52 = vpack.c.bf16 %v387_v61, %v387_v61  ;;  %v677_v7 = vadd.f32 %v676_v28, %v675_v22 }
 0x24b   :  { %v411_v43 = vunpack.c.l.b16 %v389_v9  ;;  %v412_v8 = vunpack.c.l.b16 %v390_v10  ;;  %v413_v36 = vunpack.c.l.b16 %v391_v12  ;;  %v658_v13 = vadd.f32 %v657_v31, %v656_v49 }
 0x24c   :  { %v414_v59 = vunpack.c.l.b16 %v392_v20  ;;  %v665_v45 = vadd.f32 %v664_v60, %v663_v23  ;;  %v671_v48 = vrot.slane %v670_v11, 1  ;;  %v693_v3 = vrot.slane %v1203_v4, 7 }
 0x24d   :  { %v410_v53 = vunpack.c.l.b16 %v388_v5  ;;  %v415_v24 = vunpack.c.l.b16 %v393_v6  ;;  %v418_v25 = vrot.slane %v411_v43, 7  ;;  %v421_v50 = vrot.slane %v412_v8, 6 }
 0x24e   :  { %v416_v55 = vunpack.c.l.b16 %v394_v15  ;;  %v417_v56 = vunpack.c.l.b16 %v395_v52  ;;  %v424_v26 = vrot.slane %v413_v36, 5  ;;  %v672_v27 = vadd.f32 %v671_v48, %v670_v11 }
 0x24f   :  { %v420_v29 = vsel %vm419_vm4, %v418_v25, %v410_v53  ;;  %v678_v22 = vrot.slane %v677_v7, 1  ;;  %v705_v28 = vadd.f32 %v689_v46, %v651_v30  ;;  %v706_v49 = vadd.f32 %v690_v47, %v658_v13 }
 0x250   :  { %v423_v23 = vsel %vm422_vm5, %v421_v50, %v420_v29  ;;  %v427_v31 = vrot.slane %v414_v59, 4  ;;  %v707_v60 = vadd.f32 %v691_v54, %v665_v45  ;;  %v708_v63 = vadd.f32 %v692_v62, %v672_v27  ;;  %v1319_v62 = vld [vmem:[#allocation7] ss:$0 sm:$0xff] }
 0x251   :  { %v426_v11 = vsel %vm425_vm6, %v424_v26, %v423_v23  ;;  %v430_v0 = vrot.slane %v415_v24, 3  ;;  %v679_v18 = vadd.f32 %v678_v22, %v677_v7  ;;  %v433_v46 = vrot.slane %v416_v55, 2 }
 0x252   :  { %v429_v57 = vsel %vm428_vm7, %v427_v31, %v426_v11  ;;  %v436_v30 = vrot.slane %v417_v56, 1 }
 0x253   :  { %v432_v47 = vsel %vm431_vm8, %v430_v0, %v429_v57  ;;  %v709_v21 = vadd.f32 %v693_v3, %v679_v18 }
 0x254   :  { %v435_v35 = vsel %vm434_vm9, %v433_v46, %v432_v47 }
 0x255   :  { %v438_v54 = vsel %vm437_vm10, %v436_v30, %v435_v35  ;;  %710 = vst.msk [vmem:[#allocation2 + $0x1] sm:$0x1] %vm362_vm3, %v709_v21 }
 0x256   :  { %v439_v4 = vpack.c.b16 %v438_v54, %v438_v54 }
 0x258   :  { %889 = vmatmul.mubr.msk.bf16.vlgmr.msra.gmra.mxu0 %vm104_vm0, %v439_v4 }
 0x259   :  { %901 = vmatpush3.bf16.msra.mxu0 %v1099_v16  ;;  %904 = vmatprep.mubr.msk.bf16.mxu0 %vm1011_vm1, %v1010_v17 }
 0x25a   :  { %902 = vmatprep.subr.bf16.mxu0 %v1010_v17 }
 0x25d   :  { %903 = vmatpush3.bf16.msra.mxu0 %v1107_v19 }
 0x260   :  { %905 = vmatmul.mubr.msk.bf16.vlgmr.msra.gmra.mxu0 %vm104_vm0, %v1131_v37 }
 0x318   :  { %v489_v38 = vpop.f32.mrf.mxu0 }
 0x319   :  { %v490_v39 = vadd.f32 %v1319_v62, %v489_v38 }
 0x31a   :  { %v890_v40 = vpop.f32.mrf.mxu0 }
 0x31b   :  { %v495_v33 = vadd.f32 %v490_v39, %v1084_v1 }
 0x31c   :  { %v492_v16 = vpop.f32.mrf.mxu0 }
 0x31d   :  { %v496_v58 = vpack.c.bf16 %v495_v33, %v495_v33 }
 0x31e   :  { %v891_v51 = vpop.f32.mrf.mxu0 }
 0x31f   :  { %498 = vst.msk [vmem:[%s1356_s11] sm:$0xf] %vm497_vm11, %v496_v58 }
 0x320   :  { %v595_v17 = vpop.f32.mrf.mxu0 }
 0x321   :  { %v596_v19 = vadd.f32 %v1155_v44, %v595_v17 }
 0x322   :  { %v906_v37 = vpop.f32.mrf.mxu0 }
 0x323   :  { %v846_v41 = vmul.f32 -1.442695, %v596_v19 }
 0x324   :  { %v598_v14 = vpop.f32.mrf.mxu0 }
 0x325   :  { %937 = vpow2.f32 %v846_v41 }
 0x326   :  { %v907_v61 = vpop.f32.mrf.mxu0 }
 0x332   :  { %v938_v5 = vpop.eup %937 }
 0x333   :  { %v604_v9 = vadd.f32 1.0, %v938_v5 }
 0x335   :  { %939 = vrcp.f32 %v604_v9 }
 0x342   :  { %v940_v1 = vpop.eup %939 }
 0x343   :  { %v607_v10 = vmul.f32 %v940_v1, %v596_v19 }
 0x345   :  { %v712_v12 = vrot.slane %v607_v10, 1  ;;  %v713_v20 = vrot.slane %v607_v10, 2  ;;  %v714_v6 = vrot.slane %v607_v10, 3  ;;  %v715_v15 = vrot.slane %v607_v10, 4 }
 0x346   :  { %v716_v52 = vrot.slane %v607_v10, 5  ;;  %v717_v7 = vrot.slane %v607_v10, 6  ;;  %v718_v43 = vrot.slane %v607_v10, 7  ;;  %v727_v8 = vmul.f32 %v1279_v32, %v607_v10 }
 0x347   :  { %v728_v44 = vmul.f32 %v712_v12, %v1283_v34  ;;  %v729_v36 = vmul.f32 %v713_v20, %v1287_v42  ;;  %v730_v13 = vmul.f32 %v714_v6, %v705_v28  ;;  %v731_v59 = vmul.f32 %v715_v15, %v706_v49 }
 0x348   :  { %v732_v45 = vmul.f32 %v716_v52, %v707_v60  ;;  %v733_v48 = vmul.f32 %v717_v7, %v708_v63  ;;  %v734_v3 = vmul.f32 %v718_v43, %v709_v21  ;;  %v735_v53 = vpack.c.bf16 %v727_v8, %v727_v8 }
 0x349   :  { %v736_v24 = vpack.c.bf16 %v728_v44, %v728_v44  ;;  %v737_v25 = vpack.c.bf16 %v729_v36, %v729_v36  ;;  %v738_v50 = vpack.c.bf16 %v730_v13, %v730_v13  ;;  %v739_v55 = vpack.c.bf16 %v731_v59, %v731_v59 }
 0x34a   :  { %v740_v56 = vpack.c.bf16 %v732_v45, %v732_v45  ;;  %v741_v26 = vpack.c.bf16 %v733_v48, %v733_v48  ;;  %v742_v27 = vpack.c.bf16 %v734_v3, %v734_v3  ;;  %v751_v34 = vunpack.c.l.b16 %v735_v53 }
 0x34b   :  { %v752_v29 = vunpack.c.l.b16 %v736_v24  ;;  %v753_v22 = vunpack.c.l.b16 %v737_v25  ;;  %v754_v32 = vunpack.c.l.b16 %v738_v50  ;;  %v755_v23 = vunpack.c.l.b16 %v739_v55 }
 0x34c   :  { %v756_v31 = vunpack.c.l.b16 %v740_v56  ;;  %v757_v49 = vunpack.c.l.b16 %v741_v26  ;;  %v758_v60 = vunpack.c.l.b16 %v742_v27 }
 0x34d   :  { %v759_v42 = vrot.slane %v752_v29, 7  ;;  %v761_v28 = vrot.slane %v753_v22, 6  ;;  %v763_v11 = vrot.slane %v754_v32, 5  ;;  %v765_v18 = vrot.slane %v755_v23, 4 }
 0x34e   :  { %v767_v46 = vrot.slane %v756_v31, 3  ;;  %v769_v30 = vrot.slane %v757_v49, 2  ;;  %v771_v35 = vrot.slane %v758_v60, 1 }
 0x34f   :  { %v760_v63 = vsel %vm419_vm4, %v759_v42, %v751_v34 }
 0x350   :  { %v762_v0 = vsel %vm422_vm5, %v761_v28, %v760_v63 }
 0x351   :  { %v764_v57 = vsel %vm425_vm6, %v763_v11, %v762_v0 }
 0x352   :  { %v766_v47 = vsel %vm428_vm7, %v765_v18, %v764_v57 }
 0x353   :  { %v768_v21 = vsel %vm431_vm8, %v767_v46, %v766_v47 }
 0x354   :  { %v770_v54 = vsel %vm434_vm9, %v769_v30, %v768_v21 }
 0x355   :  { %v772_v4 = vsel %vm437_vm10, %v771_v35, %v770_v54 }
 0x356   :  { %v773_v38 = vpack.c.b16 %v772_v4, %v772_v4 }
 0x358   :  { %913 = vmatmul.mubr.msk.bf16.vlgmr.msra.gmra.mxu1 %vm104_vm0, %v773_v38 }
 0x418   :  { %v811_v39 = vpop.f32.mrf.mxu1 }
 0x419   :  { %v812_v40 = vadd.f32 %v1319_v62, %v811_v39 }
 0x41a   :  { %v914_v33 = vpop.f32.mrf.mxu1 }
 0x41b   :  { %v817_v16 = vadd.f32 %v812_v40, %v1086_v2 }
 0x41c   :  { %v814_v58 = vpop.f32.mrf.mxu1 }
 0x41d   :  { %v818_v51 = vpack.c.bf16 %v817_v16, %v817_v16 }
 0x41e   :  { %v915_v17 = vpop.f32.mrf.mxu1 }
 0x41f   :  { %849 = vst.msk [vmem:[%s1356_s11 + $0x4] sm:$0xf] %vm497_vm11, %v818_v51 }
 0x420   :  { %825 = vsyncpa [#allocation4], 1 }
 0x421   :  { %826 = vsyncpa [#allocation6], 1 }

// kernel: model_forward.6
= control target key start
LH: loop header
LB: loop body
LE: loop exit
PB: predicated region body
PF: predicated region fallthrough
CT: control target
= control target key end

     0   :  { %16 = vsyncpa [#allocation4], 0  ;;  %s1254_s0 = inlined_call_operand.vmem [shape: bf16[2,4,32], index: 0, kind: input, shape index: {}]   ;;  %s1255_s1 = inlined_call_operand.hbm [shape: f32[1,32], index: 1, kind: input, shape index: {}]   ;;  %s1256_s2 = inlined_call_operand.hbm [shape: f32[1,32], index: 2, kind: input, shape index: {}]   ;;  %s1257_s3 = inlined_call_operand.hbm [shape: bf16[32,32], index: 3, kind: input, shape index: {}]   ;;  %s1258_s4 = inlined_call_operand.hbm [shape: f32[1,32], index: 4, kind: input, shape index: {}]   ;;  %s1259_s5 = inlined_call_operand.hbm [shape: bf16[32,32], index: 5, kind: input, shape index: {}]   ;;  %s1260_s6 = inlined_call_operand.hbm [shape: f32[1,32], index: 6, kind: input, shape index: {}]   ;;  %s1261_s7 = inlined_call_operand.vmem [shape: f32[4,4,32], index: 7, kind: input, shape index: {}]   ;;  %s1262_s8 = inlined_call_operand.vmem [shape: f32[4,32], index: 8, kind: input, shape index: {}]   ;;  %s1263_s9 = inlined_call_operand.hbm [shape: bf16[32,32], index: 9, kind: input, shape index: {}]   ;;  %s1264_s10 = inlined_call_operand.hbm [shape: f32[1,32], index: 10, kind: input, shape index: {}]   ;;  %s1265_s11 = inlined_call_operand.vmem [shape: bf16[2,4,32], index: 11, kind: output, shape index: {}]  }
   0x1   :  { %17 = vsyncpa [#allocation6], 0 }
   0x2   :  { %18 = vsyncpa [#allocation9], 0 }
   0x3   :  { %19 = vsyncpa [#allocation12], 0 }
   0x4   :  { %20 = vsyncpa [#allocation15], 0  ;;  %s1016_s17 = smov [#allocation5]   ;;  %s1017_s19 = smov [#allocation8]  }
   0x5   :  { %s39_s18 = sshll.u32 %s1016_s17, 4  ;;  %s61_s20 = sshll.u32 %s1017_s19, 4  ;;  %s40_s18 = int_to_ptr.vmem [resolvable:$true] %s39_s18  ;;  %s62_s20 = int_to_ptr.vmem [resolvable:$true] %s61_s20 }
   0x6   :  { %s854_s21 = scalar_lea.vmem %s40_s18, 16  ;;  %s858_s22 = scalar_lea.vmem %s40_s18, 32 }
   0x7   :  { %p855_p0 = scmp.ne.s32.totalorder %s40_s18, %s854_s21  ;;  %p859_p1 = scmp.lt.s32.totalorder %s40_s18, %s40_s18 }
   0x8   :  { %p860_p2 = scmp.lt.s32.totalorder %s858_s22, %s854_s21 }
   0xa   :  { %p861_p3 = por %p860_p2, %p859_p1 }
   0xc   :  { %p862_p4 = pnand %p861_p3, %p855_p0 }
   0xe   :  { %865 = shalt.err (!%p862_p4)
}
   0xf   :  { %42 = dma.hbm_to_vmem [thread:$0]  %s1256_s2, 16, %s40_s18, [#allocation6]  }
  0x10   :  { %s874_s25 = scalar_lea.vmem %s62_s20, 16  ;;  %s878_s26 = scalar_lea.vmem %s62_s20, 32 }
  0x11   :  { %p875_p5 = scmp.ne.s32.totalorder %s62_s20, %s874_s25  ;;  %p879_p6 = scmp.lt.s32.totalorder %s62_s20, %s62_s20 }
  0x12   :  { %p880_p7 = scmp.lt.s32.totalorder %s878_s26, %s874_s25 }
  0x14   :  { %p881_p8 = por %p880_p7, %p879_p6 }
  0x16   :  { %p882_p9 = pnand %p881_p8, %p875_p5 }
  0x18   :  { %885 = shalt.err (!%p882_p9)
}
  0x19   :  { %64 = dma.hbm_to_vmem [thread:$0]  %s1258_s4, 16, %s62_s20, [#allocation9]  }
  0x1a   :  { %s1018_s29 = smov [#allocation11]   ;;  %s1019_s12 = smov [#allocation3]  }
  0x1b   :  { %s83_s30 = sshll.u32 %s1018_s29, 4  ;;  %s29_s13 = sshll.u32 %s1019_s12, 4  ;;  %s84_s30 = int_to_ptr.vmem [resolvable:$true] %s83_s30  ;;  %s30_s13 = int_to_ptr.vmem [resolvable:$true] %s29_s13 }
  0x1c   :  { %s894_s14 = scalar_lea.vmem %s84_s30, 16  ;;  %s898_s2 = scalar_lea.vmem %s84_s30, 32 }
  0x1d   :  { %p895_p10 = scmp.ne.s32.totalorder %s84_s30, %s894_s14  ;;  %p899_p11 = scmp.lt.s32.totalorder %s84_s30, %s84_s30 }
  0x1e   :  { %p900_p12 = scmp.lt.s32.totalorder %s898_s2, %s894_s14 }
  0x20   :  { %p901_p13 = por %p900_p12, %p899_p11 }
  0x22   :  { %p902_p0 = pnand %p901_p13, %p895_p10 }
  0x24   :  { %905 = shalt.err (!%p902_p0)
}
  0x25   :  { %86 = dma.hbm_to_vmem [thread:$0]  %s1260_s6, 16, %s84_s30, [#allocation12]  }
  0x26   :  { %s914_s17 = scalar_lea.vmem %s30_s13, 16  ;;  %s918_s4 = scalar_lea.vmem %s30_s13, 32 }
  0x27   :  { %p915_p1 = scmp.ne.s32.totalorder %s30_s13, %s914_s17  ;;  %p919_p2 = scmp.lt.s32.totalorder %s30_s13, %s30_s13 }
  0x28   :  { %p920_p3 = scmp.lt.s32.totalorder %s918_s4, %s914_s17 }
  0x2a   :  { %p921_p4 = por %p920_p3, %p919_p2 }
  0x2c   :  { %p922_p5 = pnand %p921_p4, %p915_p1 }
  0x2e   :  { %925 = shalt.err (!%p922_p5)
}
  0x2f   :  { %32 = dma.hbm_to_vmem [thread:$0]  %s1255_s1, 16, %s30_s13, [#allocation4]  }
  0x30   :  { %s1020_s20 = smov [#allocation7]  }
  0x31   :  { %s48_s21 = sshll.u32 %s1020_s20, 4  ;;  %s49_s21 = int_to_ptr.vmem [resolvable:$true] %s48_s21 }
  0x32   :  { %s934_s22 = scalar_lea.vmem %s49_s21, 256  ;;  %p939_p7 = scmp.lt.s32.totalorder %s49_s21, %s49_s21 }
  0x33   :  { %p935_p6 = scmp.ne.s32.totalorder %s49_s21, %s934_s22  ;;  %p940_p8 = scmp.lt.s32.totalorder %s934_s22, %s934_s22 }
  0x35   :  { %p941_p9 = por %p940_p8, %p939_p7 }
  0x37   :  { %p942_p10 = pnand %p941_p9, %p935_p6 }
  0x39   :  { %945 = shalt.err (!%p942_p10)
}
  0x3a   :  { %s1021_s6 = smov 64   ;;  %s1022_s23 = smov 4  }
  0x3b   :  { %54 = dma.hbm_to_vmem [thread:$0]  %s1257_s3, 256, %s49_s21, [#allocation6], %s1021_s6, %s1021_s6, %s1022_s23  }
  0x3c   :  { %s1023_s26 = smov [#allocation10]   ;;  %s1024_s1 = smov [#allocation13]  }
  0x3d   :  { %s70_s27 = sshll.u32 %s1023_s26, 4  ;;  %s96_s28 = sshll.u32 %s1024_s1, 4  ;;  %s71_s27 = int_to_ptr.vmem [resolvable:$true] %s70_s27  ;;  %s97_s28 = int_to_ptr.vmem [resolvable:$true] %s96_s28 }
  0x3e   :  { %s954_s29 = scalar_lea.vmem %s71_s27, 256  ;;  %p959_p12 = scmp.lt.s32.totalorder %s71_s27, %s71_s27 }
  0x3f   :  { %p955_p11 = scmp.ne.s32.totalorder %s71_s27, %s954_s29  ;;  %p960_p13 = scmp.lt.s32.totalorder %s954_s29, %s954_s29 }
  0x41   :  { %p961_p0 = por %p960_p13, %p959_p12 }
  0x43   :  { %p962_p1 = pnand %p961_p0, %p955_p11 }
  0x45   :  { %965 = shalt.err (!%p962_p1)
}
  0x46   :  { %76 = dma.hbm_to_vmem [thread:$0]  %s1259_s5, 256, %s71_s27, [#allocation9], %s1021_s6, %s1021_s6, %s1022_s23  }
  0x47   :  { %s974_s13 = scalar_lea.vmem %s97_s28, 256  ;;  %p979_p3 = scmp.lt.s32.totalorder %s97_s28, %s97_s28 }
  0x48   :  { %p975_p2 = scmp.ne.s32.totalorder %s97_s28, %s974_s13  ;;  %p980_p4 = scmp.lt.s32.totalorder %s974_s13, %s974_s13 }
  0x4a   :  { %p981_p5 = por %p980_p4, %p979_p3 }
  0x4c   :  { %p982_p6 = pnand %p981_p5, %p975_p2 }
  0x4e   :  { %985 = shalt.err (!%p982_p6)
}
  0x4f   :  { %102 = dma.hbm_to_vmem [thread:$0]  %s1263_s9, 256, %s97_s28, [#allocation12], %s1021_s6, %s1021_s6, %s1022_s23  }
  0x50   :  { %s1025_s2 = smov [#allocation14]  }
  0x51   :  { %s109_s15 = sshll.u32 %s1025_s2, 4  ;;  %s110_s15 = int_to_ptr.vmem [resolvable:$true] %s109_s15 }
  0x52   :  { %s994_s16 = scalar_lea.vmem %s110_s15, 16  ;;  %s998_s17 = scalar_lea.vmem %s110_s15, 32 }
  0x53   :  { %p995_p7 = scmp.ne.s32.totalorder %s110_s15, %s994_s16  ;;  %p999_p8 = scmp.lt.s32.totalorder %s110_s15, %s110_s15 }
  0x54   :  { %p1000_p9 = scmp.lt.s32.totalorder %s998_s17, %s994_s16 }
  0x56   :  { %p1001_p10 = por %p1000_p9, %p999_p8 }
  0x58   :  { %p1002_p11 = pnand %p1001_p10, %p995_p7 }
  0x5a   :  { %1005 = shalt.err (!%p1002_p11)
}
  0x5b   :  { %112 = dma.hbm_to_vmem [thread:$0]  %s1264_s10, 16, %s110_s15, [#allocation15]  }
  0x5c   :  { %1006 = dma.done.wait [#allocation4], 16  }
  0x5d   :  { %1007 = vsyncadd [#allocation4], 4294967280 }
  0x5e   :  { %1008 = dma.done.wait [#allocation6], 272  }
  0x5f   :  { %1009 = vsyncadd [#allocation6], 4294967024 }
  0x60   :  { %1010 = dma.done.wait [#allocation9], 272  }
  0x61   :  { %1011 = vsyncadd [#allocation9], 4294967024 }
  0x62   :  { %1012 = dma.done.wait [#allocation12], 272  }
  0x63   :  { %1013 = vsyncadd [#allocation12], 4294967024 }
  0x64   :  { %1014 = dma.done.wait [#allocation15], 16  }
  0x65   :  { %1015 = vsyncadd [#allocation15], 4294967280  ;;  %vm164_vm0 = vcmask 257024   ;;  %v162_v0 = vld [vmem:[%s1254_s0] sm:$0x3]  ;;  %v828_v16 = vld [vmem:[#allocation7 + $0x8] sm:$0xff]  }
  0x66   :  { %v743_v1 = vld [vmem:[%s1254_s0 + $0x2] sm:$0x3]  ;;  %v1118_v2 = vunpack.c.l.bf16 %v162_v0  ;;  %v1026_v18 = vmov 0.0   ;;  %v830_v19 = vld [vmem:[#allocation7] sm:$0xff]   ;;  %v1135_v20 = vld [vmem:[#allocation10] sm:$0xff]   ;;  %vm1027_vm1 = vmmov 0  }
  0x67   :  { %v1120_v3 = vunpack.c.l.bf16 %v743_v1  ;;  %v1130_v17 = vld [vmem:[#allocation10 + $0x8] sm:$0xff]   ;;  %768 = vmatprep.subr.bf16.mxu0 %v1026_v18  ;;  %776 = vmatprep.subr.bf16.mxu1 %v1026_v18  ;;  %vm212_vm2 = vcmask 261120   ;;  %vm142_vm3 = vcmask 254976   ;;  %v832_v39 = vld [vmem:[#allocation13 + $0x8] sm:$0xff]   ;;  %v833_v40 = vld [vmem:[#allocation13] sm:$0xff]   ;;  %vm375_vm4 = vcmask 253952  }
  0x68   :  { %v165_v4 = vsel %vm164_vm0, %v1118_v2, 0.0  ;;  %769 = vmatpush3.bf16.msra.mxu0 %v828_v16  ;;  %777 = vmatpush3.bf16.msra.mxu1 %v1130_v17  ;;  %v727_v28 = vld [vmem:[#allocation3] ss:$0 sm:$0xff]  ;;  %v728_v31 = vld [vmem:[#allocation5] ss:$0 sm:$0xff]  ;;  %vm408_vm5 = vcmask 1041409  }
  0x69   :  { %v479_v5 = vsel %vm164_vm0, %v1120_v3, 0.0  ;;  %166 = vadd.xlane.f32.xlu0 %v165_v4  ;;  %770 = vmatprep.subr.bf16.mxu0 %v1026_v18  ;;  %143 = vst.msk [vmem:[#allocation2] sm:$0x3] %vm142_vm3, %v1026_v18  ;;  %v729_v41 = vld [vmem:[#allocation8] ss:$0 sm:$0xff]  ;;  %vm411_vm6 = vcmask 1042434  }
  0x6a   :  { %480 = vadd.xlane.f32.xlu1 %v479_v5  ;;  %778 = vmatprep.subr.bf16.mxu1 %v1026_v18  ;;  %v1165_v42 = vld [vmem:[#allocation11] ss:$0 sm:$0xff]  ;;  %v324_v44 = vld [vmem:[%s1261_s7 + $0xc] sm:$0xf]  ;;  %v321_v48 = vld [vmem:[%s1261_s7] sm:$0xf] }
  0x6b   :  { %772 = vmatprep.mubr.msk.bf16.mxu0 %vm1027_vm1, %v1026_v18  ;;  %780 = vmatprep.mubr.msk.bf16.mxu1 %vm1027_vm1, %v1026_v18  ;;  %v322_v51 = vld [vmem:[%s1261_s7 + $0x4] sm:$0xf]  ;;  %v323_v52 = vld [vmem:[%s1261_s7 + $0x8] sm:$0xf]  ;;  %v161_v0 = vld [vmem:[%s1262_s8] sm:$0xf] }
  0x6c   :  { %771 = vmatpush3.bf16.msra.mxu0 %v830_v19  ;;  %779 = vmatpush3.bf16.msra.mxu1 %v1135_v20  ;;  %v585_v4 = vld [vmem:[%s1261_s7] sm:$0xf]  ;;  %vm414_vm7 = vcmask 1043459  }
  0x6d   :  { %792 = vmatprep.subr.bf16.mxu1 %v1026_v18  ;;  %784 = vmatprep.subr.bf16.mxu0 %v1026_v18 }
  0x70   :  { %v738_v1 = vld [vmem:[#allocation2] ss:$0 sm:$0xff] }
  0xf2   :  { %v167_v6 = vpop.xlane.xlu0 %166 }
  0xf3   :  { %v481_v7 = vpop.xlane.xlu1 %480  ;;  %v169_v8 = vmul.f32 0.03125, %v167_v6 }
  0xf4   :  { %v482_v9 = vmul.f32 0.03125, %v481_v7  ;;  %v586_v7 = vld [vmem:[%s1261_s7 + $0x4] sm:$0xf] }
  0xf5   :  { %v170_v10 = vsub.f32 %v1118_v2, %v169_v8  ;;  %v587_v8 = vld [vmem:[%s1261_s7 + $0x8] sm:$0xf] }
  0xf6   :  { %v483_v11 = vsub.f32 %v1120_v3, %v482_v9  ;;  %v588_v9 = vld [vmem:[%s1261_s7 + $0xc] sm:$0xf] }
  0xf7   :  { %v171_v12 = vmul.f32 %v170_v10, %v170_v10 }
  0xf8   :  { %v484_v13 = vmul.f32 %v483_v11, %v483_v11 }
  0xf9   :  { %v172_v14 = vsel %vm164_vm0, %v171_v12, 0.0 }
  0xfa   :  { %v485_v15 = vsel %vm164_vm0, %v484_v13, 0.0  ;;  %173 = vadd.xlane.f32.xlu0 %v172_v14 }
  0xfb   :  { %486 = vadd.xlane.f32.xlu1 %v485_v15  ;;  %v1202_v15 = vmul.f32 %v738_v1, %v161_v0 }
 0x183   :  { %v174_v21 = vpop.xlane.xlu0 %173 }
 0x184   :  { %v487_v22 = vpop.xlane.xlu1 %486  ;;  %v175_v23 = vmul.f32 0.03125, %v174_v21 }
 0x185   :  { %v488_v24 = vmul.f32 0.03125, %v487_v22 }
 0x186   :  { %v176_v25 = vadd.f32 1e-05, %v175_v23 }
 0x187   :  { %v489_v26 = vadd.f32 1e-05, %v488_v24 }
 0x188   :  { %834 = vrsqrt.f32 %v176_v25 }
 0x189   :  { %836 = vrsqrt.f32 %v489_v26 }
 0x195   :  { %v835_v27 = vpop.eup %834 }
 0x196   :  { %v837_v29 = vpop.eup %836  ;;  %v178_v30 = vmul.f32 %v835_v27, %v170_v10 }
 0x197   :  { %v491_v32 = vmul.f32 %v837_v29, %v483_v11 }
 0x198   :  { %v185_v33 = vmul.f32 %v727_v28, %v178_v30 }
 0x199   :  { %v492_v35 = vmul.f32 %v727_v28, %v491_v32 }
 0x19a   :  { %v192_v34 = vadd.f32 %v728_v31, %v185_v33 }
 0x19b   :  { %v493_v37 = vadd.f32 %v728_v31, %v492_v35  ;;  %v747_v31 = vld [vmem:[#allocation2 + $0x1] ss:$0 sm:$0xff]  ;;  %v366_v35 = vrot.slane %v1202_v15, 3 }
 0x19c   :  { %v193_v36 = vpack.c.bf16 %v192_v34, %v192_v34 }
 0x19d   :  { %v1153_v38 = vpack.c.bf16 %v493_v37, %v493_v37 }
 0x19e   :  { %773 = vmatmul.mubr.msk.bf16.vlgmr.msra.gmra.mxu0 %vm212_vm2, %v193_v36  ;;  %781 = vmatmul.mubr.msk.bf16.vlgmr.msra.gmra.mxu1 %vm212_vm2, %v193_v36 }
 0x19f   :  { %793 = vmatpush3.bf16.msra.mxu1 %v828_v16  ;;  %796 = vmatprep.mubr.msk.bf16.mxu1 %vm1027_vm1, %v1026_v18 }
 0x1a0   :  { %794 = vmatprep.subr.bf16.mxu1 %v1026_v18  ;;  %788 = vmatprep.mubr.msk.bf16.mxu0 %vm1027_vm1, %v1026_v18 }
 0x1a1   :  { %785 = vmatpush3.bf16.msra.mxu0 %v832_v39 }
 0x1a2   :  { %786 = vmatprep.subr.bf16.mxu0 %v1026_v18 }
 0x1a3   :  { %795 = vmatpush3.bf16.msra.mxu1 %v830_v19 }
 0x1a4   :  { %808 = vmatprep.subr.bf16.mxu1 %v1026_v18 }
 0x1a5   :  { %787 = vmatpush3.bf16.msra.mxu0 %v833_v40 }
 0x1a6   :  { %797 = vmatmul.mubr.msk.bf16.vlgmr.msra.gmra.mxu1 %vm212_vm2, %v1153_v38  ;;  %800 = vmatprep.subr.bf16.mxu0 %v1026_v18 }
 0x1a7   :  { %812 = vmatprep.mubr.msk.bf16.mxu1 %vm1027_vm1, %v1026_v18  ;;  %809 = vmatpush3.bf16.msra.mxu1 %v832_v39 }
 0x1a8   :  { %810 = vmatprep.subr.bf16.mxu1 %v1026_v18 }
 0x1ab   :  { %811 = vmatpush3.bf16.msra.mxu1 %v833_v40 }
 0x25e   :  { %v250_v43 = vpop.f32.mrf.mxu0  ;;  %v308_v45 = vpop.f32.mrf.mxu1 }
 0x25f   :  { %v251_v46 = vadd.f32 %v729_v41, %v250_v43  ;;  %v1171_v47 = vadd.f32 %v1165_v42, %v308_v45  ;;  %v626_v45 = vmul.f32 %v747_v31, %v161_v0 }
 0x260   :  { %v774_v49 = vpop.f32.mrf.mxu0  ;;  %v782_v50 = vpop.f32.mrf.mxu1 }
 0x261   :  { %v328_v53 = vmul.f32 %v324_v44, %v251_v46  ;;  %v737_v54 = vmul.f32 -1.442695, %v1171_v47  ;;  %v325_v57 = vmul.f32 %v321_v48, %v251_v46  ;;  %v326_v59 = vmul.f32 %v322_v51, %v251_v46 }
 0x262   :  { %v253_v55 = vpop.f32.mrf.mxu0  ;;  %v311_v56 = vpop.f32.mrf.mxu1  ;;  %v327_v60 = vmul.f32 %v323_v52, %v251_v46 }
 0x263   :  { %v350_v58 = vsel %vm164_vm0, %v328_v53, 0.0  ;;  %838 = vpow2.f32 %v737_v54  ;;  %v329_v10 = vsel %vm164_vm0, %v325_v57, 0.0  ;;  %v336_v12 = vsel %vm164_vm0, %v326_v59, 0.0 }
 0x264   :  { %v351_v61 = vrot.slane %v350_v58, 4  ;;  %v775_v62 = vpop.f32.mrf.mxu0  ;;  %v783_v63 = vpop.f32.mrf.mxu1  ;;  %v343_v13 = vsel %vm164_vm0, %v327_v60, 0.0  ;;  %v330_v24 = vrot.slane %v329_v10, 4  ;;  %v337_v32 = vrot.slane %v336_v12, 4 }
 0x265   :  { %v344_v33 = vrot.slane %v343_v13, 4  ;;  %v628_v60 = vrot.slane %v626_v45, 1 }
 0x266   :  { %v352_v5 = vadd.f32 %v351_v61, %v350_v58  ;;  %v532_v6 = vpop.f32.mrf.mxu1  ;;  %v331_v43 = vadd.f32 %v330_v24, %v329_v10  ;;  %v338_v51 = vadd.f32 %v337_v32, %v336_v12 }
 0x267   :  { %v533_v11 = vadd.f32 %v729_v41, %v532_v6  ;;  %v345_v52 = vadd.f32 %v344_v33, %v343_v13  ;;  %v629_v6 = vrot.slane %v626_v45, 2  ;;  %v364_v33 = vrot.slane %v1202_v15, 1 }
 0x268   :  { %v353_v14 = vrot.slane %v352_v5, 2  ;;  %v798_v16 = vpop.f32.mrf.mxu1  ;;  %v332_v59 = vrot.slane %v331_v43, 2  ;;  %v339_v1 = vrot.slane %v338_v51, 2 }
 0x269   :  { %v589_v19 = vmul.f32 %v585_v4, %v533_v11  ;;  %v590_v21 = vmul.f32 %v586_v7, %v533_v11  ;;  %v591_v22 = vmul.f32 %v587_v8, %v533_v11  ;;  %v592_v23 = vmul.f32 %v588_v9, %v533_v11 }
 0x26a   :  { %v354_v25 = vadd.f32 %v353_v14, %v352_v5  ;;  %v535_v26 = vpop.f32.mrf.mxu1  ;;  %v346_v4 = vrot.slane %v345_v52, 2  ;;  %v630_v11 = vrot.slane %v626_v45, 3  ;;  %v333_v12 = vadd.f32 %v332_v59, %v331_v43 }
 0x26b   :  { %v593_v27 = vsel %vm164_vm0, %v589_v19, 0.0  ;;  %v600_v28 = vsel %vm164_vm0, %v590_v21, 0.0  ;;  %v607_v29 = vsel %vm164_vm0, %v591_v22, 0.0  ;;  %v614_v30 = vsel %vm164_vm0, %v592_v23, 0.0 }
 0x26c   :  { %v355_v34 = vrot.slane %v354_v25, 1  ;;  %v799_v36 = vpop.f32.mrf.mxu1  ;;  %v594_v37 = vrot.slane %v593_v27, 4  ;;  %v601_v39 = vrot.slane %v600_v28, 4  ;;  %v608_v40 = vrot.slane %v607_v29, 4 }
 0x26d   :  { %v615_v41 = vrot.slane %v614_v30, 4  ;;  %v340_v19 = vadd.f32 %v339_v1, %v338_v51  ;;  %v347_v21 = vadd.f32 %v346_v4, %v345_v52 }
 0x26e   :  { %v356_v44 = vadd.f32 %v355_v34, %v354_v25  ;;  %v595_v46 = vadd.f32 %v594_v37, %v593_v27  ;;  %v602_v48 = vadd.f32 %v601_v39, %v600_v28  ;;  %v609_v49 = vadd.f32 %v608_v40, %v607_v29 }
 0x26f   :  { %v616_v50 = vadd.f32 %v615_v41, %v614_v30  ;;  %v334_v27 = vrot.slane %v333_v12, 1  ;;  %v341_v28 = vrot.slane %v340_v19, 1  ;;  %v348_v29 = vrot.slane %v347_v21, 1 }
 0x270   :  { %v374_v53 = vadd.f32 %v366_v35, %v356_v44  ;;  %v596_v54 = vrot.slane %v595_v46, 2  ;;  %v603_v55 = vrot.slane %v602_v48, 2  ;;  %v610_v56 = vrot.slane %v609_v49, 2  ;;  %v839_v58 = vpop.eup %838 }
 0x271   :  { %v617_v57 = vrot.slane %v616_v50, 2  ;;  %v317_v61 = vadd.f32 1.0, %v839_v58  ;;  %v335_v30 = vadd.f32 %v334_v27, %v333_v12  ;;  %v342_v31 = vadd.f32 %v341_v28, %v340_v19 }
 0x272   :  { %376 = vst.msk [vmem:[#allocation2] sm:$0x1] %vm375_vm4, %v374_v53  ;;  %v597_v62 = vadd.f32 %v596_v54, %v595_v46  ;;  %v604_v63 = vadd.f32 %v603_v55, %v602_v48  ;;  %v611_v0 = vadd.f32 %v610_v56, %v609_v49  ;;  %v349_v32 = vadd.f32 %v348_v29, %v347_v21 }
 0x273   :  { %v618_v5 = vadd.f32 %v617_v57, %v616_v50  ;;  %840 = vrcp.f32 %v317_v61  ;;  %v365_v34 = vrot.slane %v1202_v15, 2  ;;  %v371_v37 = vadd.f32 %v1202_v15, %v335_v30 }
 0x274   :  { %v598_v7 = vrot.slane %v597_v62, 1  ;;  %v605_v8 = vrot.slane %v604_v63, 1  ;;  %v612_v9 = vrot.slane %v611_v0, 1  ;;  %v372_v39 = vadd.f32 %v364_v33, %v342_v31 }
 0x275   :  { %v619_v10 = vrot.slane %v618_v5, 1  ;;  %v373_v40 = vadd.f32 %v365_v34, %v349_v32 }
 0x276   :  { %v606_v13 = vadd.f32 %v605_v8, %v604_v63  ;;  %v613_v14 = vadd.f32 %v612_v9, %v611_v0  ;;  %v599_v16 = vadd.f32 %v598_v7, %v597_v62  ;;  %v739_v63 = vld [vmem:[#allocation14] ss:$0 sm:$0xff] }
 0x277   :  { %v620_v22 = vadd.f32 %v619_v10, %v618_v5 }
 0x278   :  { %v1210_v23 = vadd.f32 %v626_v45, %v599_v16  ;;  %v1212_v24 = vadd.f32 %v628_v60, %v606_v13  ;;  %v1214_v25 = vadd.f32 %v629_v6, %v613_v14 }
 0x279   :  { %v1216_v26 = vadd.f32 %v630_v11, %v620_v22 }
 0x27b   :  { %639 = vst.msk [vmem:[#allocation2 + $0x1] sm:$0x1] %vm375_vm4, %v1216_v26 }
 0x280   :  { %v841_v35 = vpop.eup %840 }
 0x281   :  { %v320_v36 = vmul.f32 %v841_v35, %v1171_v47 }
 0x283   :  { %v378_v41 = vrot.slane %v320_v36, 1  ;;  %v379_v43 = vrot.slane %v320_v36, 2  ;;  %v380_v44 = vrot.slane %v320_v36, 3  ;;  %v385_v45 = vmul.f32 %v371_v37, %v320_v36 }
 0x285   :  { %v386_v46 = vmul.f32 %v378_v41, %v372_v39  ;;  %v387_v48 = vmul.f32 %v379_v43, %v373_v40  ;;  %v388_v49 = vmul.f32 %v380_v44, %v374_v53  ;;  %v389_v50 = vpack.c.bf16 %v385_v45, %v385_v45 }
 0x287   :  { %v390_v51 = vpack.c.bf16 %v386_v46, %v386_v46  ;;  %v391_v52 = vpack.c.bf16 %v387_v48, %v387_v48  ;;  %v392_v54 = vpack.c.bf16 %v388_v49, %v388_v49  ;;  %v403_v47 = vunpack.c.l.b16 %v389_v50 }
 0x289   :  { %v404_v55 = vunpack.c.l.b16 %v390_v51  ;;  %v405_v56 = vunpack.c.l.b16 %v391_v52  ;;  %v406_v57 = vunpack.c.l.b16 %v392_v54 }
 0x28b   :  { %v407_v58 = vrot.slane %v404_v55, 7  ;;  %v410_v15 = vrot.slane %v405_v56, 6  ;;  %v413_v60 = vrot.slane %v406_v57, 5 }
 0x28d   :  { %v409_v59 = vsel %vm408_vm5, %v407_v58, %v403_v47 }
 0x28e   :  { %v412_v61 = vsel %vm411_vm6, %v410_v15, %v409_v59 }
 0x28f   :  { %v415_v53 = vsel %vm414_vm7, %v413_v60, %v412_v61 }
 0x290   :  { %v416_v62 = vpack.c.b16 %v415_v53, %v415_v53 }
 0x292   :  { %789 = vmatmul.mubr.msk.bf16.vlgmr.msra.gmra.mxu0 %vm212_vm2, %v416_v62 }
 0x293   :  { %801 = vmatpush3.bf16.msra.mxu0 %v1130_v17  ;;  %804 = vmatprep.mubr.msk.bf16.mxu0 %vm1027_vm1, %v1026_v18 }
 0x294   :  { %802 = vmatprep.subr.bf16.mxu0 %v1026_v18 }
 0x297   :  { %803 = vmatpush3.bf16.msra.mxu0 %v1135_v20 }
 0x29a   :  { %805 = vmatmul.mubr.msk.bf16.vlgmr.msra.gmra.mxu0 %vm212_vm2, %v1153_v38 }
 0x352   :  { %v466_v0 = vpop.f32.mrf.mxu0 }
 0x353   :  { %v467_v1 = vadd.f32 %v739_v63, %v466_v0 }
 0x354   :  { %v790_v4 = vpop.f32.mrf.mxu0 }
 0x355   :  { %v472_v5 = vadd.f32 %v467_v1, %v1118_v2 }
 0x356   :  { %v469_v6 = vpop.f32.mrf.mxu0 }
 0x357   :  { %v473_v7 = vpack.c.bf16 %v472_v5, %v472_v5 }
 0x358   :  { %v791_v8 = vpop.f32.mrf.mxu0 }
 0x359   :  { %475 = vst.msk [vmem:[%s1265_s11] sm:$0x3] %vm142_vm3, %v473_v7 }
 0x35a   :  { %v572_v17 = vpop.f32.mrf.mxu0 }
 0x35b   :  { %v573_v18 = vadd.f32 %v1165_v42, %v572_v17 }
 0x35c   :  { %v806_v20 = vpop.f32.mrf.mxu0 }
 0x35d   :  { %v746_v9 = vmul.f32 -1.442695, %v573_v18 }
 0x35e   :  { %v575_v38 = vpop.f32.mrf.mxu0 }
 0x35f   :  { %842 = vpow2.f32 %v746_v9 }
 0x360   :  { %v807_v10 = vpop.f32.mrf.mxu0 }
 0x36c   :  { %v843_v11 = vpop.eup %842 }
 0x36d   :  { %v581_v12 = vadd.f32 1.0, %v843_v11 }
 0x36f   :  { %844 = vrcp.f32 %v581_v12 }
 0x37c   :  { %v845_v2 = vpop.eup %844 }
 0x37d   :  { %v584_v13 = vmul.f32 %v845_v2, %v573_v18 }
 0x37f   :  { %v641_v14 = vrot.slane %v584_v13, 1  ;;  %v642_v16 = vrot.slane %v584_v13, 2  ;;  %v643_v19 = vrot.slane %v584_v13, 3  ;;  %v648_v21 = vmul.f32 %v1210_v23, %v584_v13 }
 0x381   :  { %v649_v22 = vmul.f32 %v641_v14, %v1212_v24  ;;  %v650_v27 = vmul.f32 %v642_v16, %v1214_v25  ;;  %v651_v42 = vmul.f32 %v643_v19, %v1216_v26  ;;  %v652_v28 = vpack.c.bf16 %v648_v21, %v648_v21 }
 0x383   :  { %v653_v29 = vpack.c.bf16 %v649_v22, %v649_v22  ;;  %v654_v30 = vpack.c.bf16 %v650_v27, %v650_v27  ;;  %v655_v31 = vpack.c.bf16 %v651_v42, %v651_v42  ;;  %v660_v35 = vunpack.c.l.b16 %v652_v28 }
 0x385   :  { %v661_v32 = vunpack.c.l.b16 %v653_v29  ;;  %v662_v33 = vunpack.c.l.b16 %v654_v30  ;;  %v663_v34 = vunpack.c.l.b16 %v655_v31 }
 0x387   :  { %v664_v36 = vrot.slane %v661_v32, 7  ;;  %v666_v37 = vrot.slane %v662_v33, 6  ;;  %v668_v40 = vrot.slane %v663_v34, 5 }
 0x389   :  { %v665_v39 = vsel %vm408_vm5, %v664_v36, %v660_v35 }
 0x38a   :  { %v667_v23 = vsel %vm411_vm6, %v666_v37, %v665_v39 }
 0x38b   :  { %v669_v24 = vsel %vm414_vm7, %v668_v40, %v667_v23 }
 0x38c   :  { %v670_v25 = vpack.c.b16 %v669_v24, %v669_v24 }
 0x38e   :  { %813 = vmatmul.mubr.msk.bf16.vlgmr.msra.gmra.mxu1 %vm212_vm2, %v670_v25 }
 0x44e   :  { %v708_v26 = vpop.f32.mrf.mxu1 }
 0x44f   :  { %v709_v41 = vadd.f32 %v739_v63, %v708_v26 }
 0x450   :  { %v814_v43 = vpop.f32.mrf.mxu1 }
 0x451   :  { %v714_v44 = vadd.f32 %v709_v41, %v1120_v3 }
 0x452   :  { %v711_v45 = vpop.f32.mrf.mxu1 }
 0x453   :  { %v715_v46 = vpack.c.bf16 %v714_v44, %v714_v44 }
 0x454   :  { %v815_v48 = vpop.f32.mrf.mxu1 }
 0x455   :  { %749 = vst.msk [vmem:[%s1265_s11 + $0x2] sm:$0x3] %vm142_vm3, %v715_v46 }
 0x456   :  { %722 = vsyncpa [#allocation4], 1 }
 0x457   :  { %723 = vsyncpa [#allocation6], 1 }
 0x458   :  { %724 = vsyncpa [#allocation9], 1 }
 0x459   :  { %725 = vsyncpa [#allocation12], 1 }
 0x45a   :  { %726 = vsyncpa [#allocation15], 1 }

// kernel: model_forward.7
= control target key start
LH: loop header
LB: loop body
LE: loop exit
PB: predicated region body
PF: predicated region fallthrough
CT: control target
= control target key end

     0   :  { %s2772_s0 = inlined_call_operand.hbm [shape: f32[3], index: 0, kind: input, shape index: {}]   ;;  %s2773_s1 = inlined_call_operand.vmem [shape: bf16[3,8,128], index: 1, kind: input, shape index: {}]   ;;  %s2774_s2 = inlined_call_operand.vmem [shape: bf16[8,256], index: 2, kind: input, shape index: {}]   ;;  %s2775_s3 = inlined_call_operand.vmem [shape: bf16[3,128,512], index: 3, kind: input, shape index: {}]   ;;  %s2776_s4 = inlined_call_operand.hbm [shape: f32[3,1,512], index: 4, kind: input, shape index: {}]   ;;  %s2777_s5 = inlined_call_operand.vmem [shape: bf16[256,512], index: 5, kind: input, shape index: {}]   ;;  %s2778_s6 = inlined_call_operand.hbm [shape: bf16[3,512,128], index: 6, kind: input, shape index: {}]   ;;  %s2779_s7 = inlined_call_operand.vmem [shape: f32[3,8,128], index: 7, kind: output, shape index: {}]  }
   0x1   :  { %2781 = sst [smem:[#allocation12_spill]] %s2772_s0 }
   0x2   :  { %2782 = sst [smem:[#allocation13_spill]] %s2776_s4 }
   0x3   :  { %12 = vsyncpa [#allocation4], 0 }
   0x4   :  { %13 = vsyncpa [#allocation3], 0 }
   0x5   :  { %15 = vsyncpa [#allocation3 + $0x1], 0 }
   0x6   :  { %16 = vsyncpa [#allocation7], 0 }
   0x7   :  { %18 = vsyncpa [#allocation7 + $0x1], 0  ;;  %s2347_s24 = smov 0   ;;  %s2349_s25 = smov 0  }
   0x8   :  { %s2351_s26 = smov 0   ;;  %s2353_s27 = smov 0  }
   0x9   :  { %s2355_s28 = smov 0   ;;  %s2357_s29 = smov 0  }
   0xa LB: > { %2783 = sst [smem:[#allocation11_spill]] %s2299_s29  ;;  %s1723_s30 = sadd.s32 4294967295, %s2299_s29   ;;  %s2299_s29 = sphi %s2357_s29, %s24_s29   ;;  %s2295_s28 = sphi %s2355_s28, %s2796_s28   ;;  %s2291_s27 = sphi %s2353_s27, %s2795_s27   ;;  %s2287_s26 = sphi %s2351_s26, %s2794_s26   ;;  %s2283_s25 = sphi %s2349_s25, %s2793_s25   ;;  %s2279_s24 = sphi %s2347_s24, %s2792_s24  }
   0xb   : > { %s144_s8 = sadd.s32 1, %s2287_s26  ;;  %p151_p0 = scmp.ne.s32.totalorder %s2287_s26, %s2283_s25 }
   0xc   : > { %p157_p1 = scmp.ne.s32.totalorder %s2283_s25, %s2279_s24  ;;  %p2380_p2 = scmp.eq.s32.totalorder %s1723_s30, 0 }
   0xd   : > { %p1725_p3 = scmp.ge.s32.totalorder %s2299_s29, 1  ;;  %p243_p4 = scmp.lt.s32.totalorder %s2299_s29, 4 }
   0xe   : > { %p2388_p5 = por %p2380_p2, %p157_p1  ;;  %p152_p7 = scmp.eq.s32.totalorder %s2299_s29, 0 }
   0xf   : > { %p2392_p6 = pnand %p1725_p3, %p243_p4  ;;  %s33_s12 = sadd.s32 1, %s2295_s28 }
  0x10   : > { %p2400_p9 = por %p152_p7, %p151_p0  ;;  %p34_p11 = scmp.ge.s32.totalorder %s33_s12, 3 }
  0x11   : > { %p1930_p8 = pneg %p2392_p6  ;;  %p1942_p12 = scmp.lt.s32.totalorder %s2299_s29, 3 }
  0x12   : > { %s2408_s14 = sand.u32 1, %s2287_s26   ;;  %s2301_s15 = smov [#allocation2]  }
  0x13   : > { %p1931_p10 = pnand %p1930_p8, %p2380_p2  ;;  %s2788_s0 = sld [smem:[#allocation12_spill]] }
  0x14   : > { %s2798_s12 = smov (%p34_p11, %s33_s12), 0  ;;  %s1729_s18 = sshll.u32 %s2408_s14, 2 }
  0x15   : > { %s1875_s19 = sshll.u32 %s2295_s28, 6  ;;  %s141_s20 = ssub.s32 %s2295_s28, %s2798_s12 }
  0x16   : > { %p142_p13 = scmp.eq.s32.totalorder %s141_s20, 0  ;;  %s2789_s4 = sld [smem:[#allocation13_spill]] }
  0x17   : > { %s298_s24 = scalar_lea.vmem [#allocation5], %s1729_s18  ;;  %p2424_p0 = pnand %p1942_p12, %p2400_p9 }
  0x18   : > { %s306_s30 = sshll.u32 %s298_s24, 4  ;;  %s295_s16 = scalar_lea.sflag [#allocation3], %s2408_s14  ;;  %s307_s30 = int_to_ptr.vmem [resolvable:$true] %s306_s30 }
  0x19   : > { %1933 = dma.hbm_to_smem (!%p1931_p10), %s2788_s0, 16, %s2301_s15, [#allocation4]  }
  0x1a   : > { %s2429_s15 = scalar_select %p142_p13, %s2287_s26, %s144_s8  }
  0x1b   : > { %p2187_p1 = pneg %p2424_p0  ;;  %s2198_s17 = scalar_lea.vmem %s307_s30, 64 }
  0x1c   : > { %s304_s23 = scalar_lea.hbm %s2789_s4, %s1875_s19  ;;  %p2199_p3 = scmp.ne.s32.totalorder %s307_s30, %s2198_s17 }
  0x1d   : > { %s2302_s18 = smov [#allocation5]  }
  0x1e   : > { %p2201_p4 = pnand %p2199_p3, %p2187_p1  ;;  %s2203_s13 = sshll.u32 %s2302_s18, 4  ;;  %s2204_s13 = int_to_ptr.vmem [resolvable:$false] %s2203_s13 }
  0x1f   : > { %s2205_s19 = scalar_lea.vmem %s2204_s13, 128  ;;  %p2206_p8 = scmp.lt.s32.totalorder %s307_s30, %s2204_s13 }
  0x20   : > { %p2202_p7 = pneg %p2201_p4  ;;  %p2207_p9 = scmp.lt.s32.totalorder %s2205_s19, %s2198_s17 }
  0x22   : > { %p2208_p10 = por %p2207_p9, %p2206_p8 }
  0x24   : > { %p2209_p11 = pnand %p2208_p10, %p2202_p7 }
  0x26   : > { %2212 = shalt.err (!%p2209_p11)
}
  0x27   : > { %1937 = dma.hbm_to_vmem [thread:$0]  (!%p2424_p0), %s304_s23, 64, %s307_s30, %s295_s16  }
  0x28   : > { %s1732_s8 = sshll.u32 %s2408_s14, 8  ;;  %s1876_s20 = sshll.u32 %s2295_s28, 12 }
  0x29   : > { %s323_s24 = scalar_lea.hbm %s2778_s6, %s1876_s20  ;;  %s317_s18 = scalar_lea.vmem [#allocation6], %s1732_s8 }
  0x2a   : > { %s324_s0 = sshll.u32 %s317_s18, 4  ;;  %s314_s17 = scalar_lea.sflag [#allocation7], %s2408_s14  ;;  %s325_s0 = int_to_ptr.vmem [resolvable:$true] %s324_s0 }
  0x2b   : > { %s2226_s13 = scalar_lea.vmem %s325_s0, 4096  ;;  %s2303_s19 = smov [#allocation6]  }
  0x2c   : > { %p2227_p12 = scmp.ne.s32.totalorder %s325_s0, %s2226_s13  ;;  %s2231_s4 = sshll.u32 %s2303_s19, 4  ;;  %s2232_s4 = int_to_ptr.vmem [resolvable:$false] %s2231_s4 }
  0x2d   : > { %s2233_s23 = scalar_lea.vmem %s2232_s4, 8192  ;;  %p2234_p4 = scmp.lt.s32.totalorder %s325_s0, %s2232_s4 }
  0x2e   : > { %p2229_p13 = pnand %p2227_p12, %p2187_p1  ;;  %p2235_p7 = scmp.lt.s32.totalorder %s2233_s23, %s2226_s13 }
  0x30   : > { %p2230_p3 = pneg %p2229_p13  ;;  %p2236_p8 = por %p2235_p7, %p2234_p4 }
  0x32   : > { %p2237_p9 = pnand %p2236_p8, %p2230_p3 }
  0x34   : > { %2240 = shalt.err (!%p2237_p9)
}
  0x35   : > { %s2304_s30 = smov 64   ;;  %s2305_s16 = smov 4  }
  0x36   : > { %1940 = dma.hbm_to_vmem [thread:$0]  (!%p2424_p0), %s323_s24, 4096, %s325_s0, %s314_s17, %s2304_s30, %s2304_s30, %s2305_s16  }
  0x37   : > { %336 = sbr.rel (%p2392_p6) target bundleno = 573 (0x23d), region = 48 }
  0x3c   : > { %2266 = dma.done.wait (%p2380_p2), [#allocation4], 16  }
  0x3d   : > { %2268 = vsyncadd (%p2380_p2), [#allocation4], 4294967280  ;;  %s342_s4 = sand.u32 1, %s2283_s25  }
  0x3e   : > { %s1737_s14 = sshll.u32 %s342_s4, 2  ;;  %s343_s8 = scalar_lea.sflag [#allocation3], %s342_s4 }
  0x3f   : > { %s2457_s20 = scalar_lea.vmem [#allocation5], %s1737_s14 }
  0x40   : > { %2270 = dma.done.wait (%p2388_p5), %s343_s8, 64  }
  0x41   : > { %2272 = vsyncadd (%p2388_p5), %s343_s8, 4294967232  ;;  %s1738_s0 = sshll.u32 %s342_s4, 8  ;;  %s352_s29 = scalar_lea.sflag [#allocation7], %s342_s4 }
  0x42   : > { %s2463_s11 = scalar_lea.vmem [#allocation6], %s1738_s0 }
  0x43   : > { %2274 = dma.done.wait (%p2388_p5), %s352_s29, 4096  }
  0x44   : > { %2276 = vsyncadd (%p2388_p5), %s352_s29, 4294963200 }
  0x45   : > { %360 = sfence }
  0x46   : > { %p411_p2 = scmp.lt.s32.totalorder %s2291_s27, 2  ;;  %v2306_v0 = vmov 0   ;;  %s436_s10 = sld [smem:[#allocation2 + %s2291_s27]]  ;;  %v2046_v35 = vld [vmem:[%s2777_s5 + $0xe4] ss:$16 sps:$4 sm:$0xff]  }
  0x47   : > { %690 = vmatprep.mubr.bf16.mxu0 %v2306_v0  ;;  %731 = vmatprep.mubr.bf16.mxu1 %v2306_v0  ;;  %v2049_v39 = vld [vmem:[%s2777_s5 + $0xec] ss:$16 sps:$4 sm:$0xff]   ;;  %v2044_v41 = vld [vmem:[%s2777_s5 + $0xe0] ss:$16 sps:$4 sm:$0xff]   ;;  %v2047_v42 = vld [vmem:[%s2777_s5 + $0xe8] ss:$16 sps:$4 sm:$0xff]  }
  0x48   : > { %s2471_s9 = scalar_select %p411_p2, %s2291_s27, 2  ;;  %v2052_v43 = vld [vmem:[%s2777_s5 + $0xc4] ss:$16 sps:$4 sm:$0xff]   ;;  %v2055_v44 = vld [vmem:[%s2777_s5 + $0xcc] ss:$16 sps:$4 sm:$0xff]  }
  0x49   : > { %v2050_v45 = vld [vmem:[%s2777_s5 + $0xc0] ss:$16 sps:$4 sm:$0xff]   ;;  %v2053_v46 = vld [vmem:[%s2777_s5 + $0xc8] ss:$16 sps:$4 sm:$0xff]   ;;  %v2058_v47 = vld [vmem:[%s2777_s5 + $0xa4] ss:$16 sps:$4 sm:$0xff]  }
  0x4a   : > { %s1877_s21 = sshll.u32 %s2471_s9, 8  ;;  %s1739_s17 = sshll.u32 %s2471_s9, 2  ;;  %v2061_v48 = vld [vmem:[%s2777_s5 + $0xac] ss:$16 sps:$4 sm:$0xff]   ;;  %v2056_v49 = vld [vmem:[%s2777_s5 + $0xa0] ss:$16 sps:$4 sm:$0xff]  }
  0x4b   : > { %s2477_s18 = scalar_lea.vmem %s2775_s3, %s1877_s21  ;;  %s417_s23 = scalar_lea.vmem %s2773_s1, %s1739_s17  ;;  %v2059_v50 = vld [vmem:[%s2777_s5 + $0xa8] ss:$16 sps:$4 sm:$0xff]   ;;  %v2064_v51 = vld [vmem:[%s2777_s5 + $0x84] ss:$16 sps:$4 sm:$0xff]   ;;  %v2067_v52 = vld [vmem:[%s2777_s5 + $0x8c] ss:$16 sps:$4 sm:$0xff]  }
  0x4c   : > { %v1996_v1 = vld [vmem:[%s2477_s18 + $0xe4] ss:$16 sps:$4 sm:$0xff]   ;;  %v1998_v2 = vld [vmem:[%s2477_s18 + $0xec] ss:$16 sps:$4 sm:$0xff]   ;;  %v2000_v3 = vld [vmem:[%s2477_s18 + $0xe0] ss:$16 sps:$4 sm:$0xff]   ;;  %v440_v28 = vstv %s436_s10 }
  0x4d   : > { %658 = vmatprep.subr.bf16.mxu0 %v1996_v1  ;;  %v2001_v4 = vld [vmem:[%s2477_s18 + $0xe8] ss:$16 sps:$4 sm:$0xff]   ;;  %699 = vmatprep.subr.bf16.mxu1 %v1998_v2  ;;  %v2002_v5 = vld [vmem:[%s2477_s18 + $0xc4] ss:$16 sps:$4 sm:$0xff]   ;;  %v2004_v6 = vld [vmem:[%s2477_s18 + $0xcc] ss:$16 sps:$4 sm:$0xff]  }
  0x4e   : > { %659 = vmatpush1.bf16.msra.mxu0 %v2000_v3  ;;  %700 = vmatpush1.bf16.msra.mxu1 %v2001_v4  ;;  %v2006_v7 = vld [vmem:[%s2477_s18 + $0xc0] ss:$16 sps:$4 sm:$0xff]   ;;  %v2007_v8 = vld [vmem:[%s2477_s18 + $0xc8] ss:$16 sps:$4 sm:$0xff]   ;;  %v2008_v9 = vld [vmem:[%s2477_s18 + $0xa4] ss:$16 sps:$4 sm:$0xff]  }
  0x4f   : > { %660 = vmatprep.subr.bf16.mxu0 %v2002_v5  ;;  %701 = vmatprep.subr.bf16.mxu1 %v2004_v6  ;;  %v2010_v10 = vld [vmem:[%s2477_s18 + $0xac] ss:$16 sps:$4 sm:$0xff]   ;;  %v2012_v11 = vld [vmem:[%s2477_s18 + $0xa0] ss:$16 sps:$4 sm:$0xff]   ;;  %v2013_v12 = vld [vmem:[%s2477_s18 + $0xa8] ss:$16 sps:$4 sm:$0xff]  }
  0x50   : > { %v2014_v13 = vld [vmem:[%s2477_s18 + $0x84] ss:$16 sps:$4 sm:$0xff]   ;;  %v2016_v14 = vld [vmem:[%s2477_s18 + $0x8c] ss:$16 sps:$4 sm:$0xff]   ;;  %v2018_v15 = vld [vmem:[%s2477_s18 + $0x80] ss:$16 sps:$4 sm:$0xff]  }
  0x51   : > { %v2019_v16 = vld [vmem:[%s2477_s18 + $0x88] ss:$16 sps:$4 sm:$0xff]   ;;  %v2020_v17 = vld [vmem:[%s2477_s18 + $0x64] ss:$16 sps:$4 sm:$0xff]   ;;  %v2022_v18 = vld [vmem:[%s2477_s18 + $0x6c] ss:$16 sps:$4 sm:$0xff]  }
  0x52   : > { %661 = vmatpush1.bf16.msra.mxu0 %v2006_v7  ;;  %702 = vmatpush1.bf16.msra.mxu1 %v2007_v8  ;;  %v2024_v19 = vld [vmem:[%s2477_s18 + $0x60] ss:$16 sps:$4 sm:$0xff]   ;;  %v2025_v20 = vld [vmem:[%s2477_s18 + $0x68] ss:$16 sps:$4 sm:$0xff]   ;;  %v2026_v21 = vld [vmem:[%s2477_s18 + $0x44] ss:$16 sps:$4 sm:$0xff]  }
  0x53   : > { %662 = vmatprep.subr.bf16.mxu0 %v2008_v9  ;;  %703 = vmatprep.subr.bf16.mxu1 %v2010_v10  ;;  %v2028_v22 = vld [vmem:[%s2477_s18 + $0x4c] ss:$16 sps:$4 sm:$0xff]   ;;  %v2030_v23 = vld [vmem:[%s2477_s18 + $0x40] ss:$16 sps:$4 sm:$0xff]   ;;  %v2031_v24 = vld [vmem:[%s2477_s18 + $0x48] ss:$16 sps:$4 sm:$0xff]  }
  0x54   : > { %v2032_v25 = vld [vmem:[%s2477_s18 + $0x24] ss:$16 sps:$4 sm:$0xff]   ;;  %v2034_v26 = vld [vmem:[%s2477_s18 + $0x2c] ss:$16 sps:$4 sm:$0xff]   ;;  %v437_v27 = vld [vmem:[%s417_s23] sm:$0xf] }
  0x55   : > { %v438_v29 = vunpack.c.l.bf16 %v437_v27  ;;  %v2036_v30 = vld [vmem:[%s2477_s18 + $0x20] ss:$16 sps:$4 sm:$0xff]   ;;  %v2037_v31 = vld [vmem:[%s2477_s18 + $0x28] ss:$16 sps:$4 sm:$0xff]   ;;  %v2038_v32 = vld [vmem:[%s2477_s18 + $0x4] ss:$16 sps:$4 sm:$0xff]  }
  0x56   : > { %663 = vmatpush1.bf16.msra.mxu0 %v2012_v11  ;;  %704 = vmatpush1.bf16.msra.mxu1 %v2013_v12  ;;  %v2040_v34 = vld [vmem:[%s2477_s18 + $0xc] ss:$16 sps:$4 sm:$0xff]   ;;  %v2042_v36 = vld [vmem:[%s2477_s18] ss:$16 sps:$4 sm:$0xff]   ;;  %v2043_v37 = vld [vmem:[%s2477_s18 + $0x8] ss:$16 sps:$4 sm:$0xff]  }
  0x57   : > { %664 = vmatprep.subr.bf16.mxu0 %v2014_v13  ;;  %705 = vmatprep.subr.bf16.mxu1 %v2016_v14  ;;  %v441_v33 = vmul.f32 %v440_v28, %v438_v29  ;;  %vm439_vm0 = vcmp.gt.f32.partialorder %v438_v29, 0.0  ;;  %v2062_v53 = vld [vmem:[%s2777_s5 + $0x80] ss:$16 sps:$4 sm:$0xff]   ;;  %v2065_v54 = vld [vmem:[%s2777_s5 + $0x88] ss:$16 sps:$4 sm:$0xff]  }
  0x58   : > { %v2070_v55 = vld [vmem:[%s2777_s5 + $0x64] ss:$16 sps:$4 sm:$0xff]   ;;  %v2073_v56 = vld [vmem:[%s2777_s5 + $0x6c] ss:$16 sps:$4 sm:$0xff]   ;;  %v2068_v57 = vld [vmem:[%s2777_s5 + $0x60] ss:$16 sps:$4 sm:$0xff]  }
  0x59   : > { %v442_v38 = vsel %vm439_vm0, %v438_v29, %v441_v33  ;;  %v2071_v58 = vld [vmem:[%s2777_s5 + $0x68] ss:$16 sps:$4 sm:$0xff]   ;;  %v2076_v59 = vld [vmem:[%s2777_s5 + $0x44] ss:$16 sps:$4 sm:$0xff]   ;;  %v2079_v60 = vld [vmem:[%s2777_s5 + $0x4c] ss:$16 sps:$4 sm:$0xff]  }
  0x5a   : > { %665 = vmatpush1.bf16.msra.mxu0 %v2018_v15  ;;  %706 = vmatpush1.bf16.msra.mxu1 %v2019_v16  ;;  %v443_v40 = vpack.c.bf16 %v442_v38, %v442_v38  ;;  %v2074_v61 = vld [vmem:[%s2777_s5 + $0x40] ss:$16 sps:$4 sm:$0xff]   ;;  %v2077_v62 = vld [vmem:[%s2777_s5 + $0x48] ss:$16 sps:$4 sm:$0xff]   ;;  %v2082_v63 = vld [vmem:[%s2777_s5 + $0x24] ss:$16 sps:$4 sm:$0xff]  }
  0x5b   : > { %666 = vmatprep.subr.bf16.mxu0 %v2020_v17  ;;  %707 = vmatprep.subr.bf16.mxu1 %v2022_v18  ;;  %v2085_v0 = vld [vmem:[%s2777_s5 + $0x2c] ss:$16 sps:$4 sm:$0xff]   ;;  %v2080_v1 = vld [vmem:[%s2777_s5 + $0x20] ss:$16 sps:$4 sm:$0xff]   ;;  %v2083_v2 = vld [vmem:[%s2777_s5 + $0x28] ss:$16 sps:$4 sm:$0xff]  }
  0x5c   : > { %v2088_v3 = vld [vmem:[%s2777_s5 + $0x4] ss:$16 sps:$4 sm:$0xff]   ;;  %v2091_v4 = vld [vmem:[%s2777_s5 + $0xc] ss:$16 sps:$4 sm:$0xff]   ;;  %v2086_v5 = vld [vmem:[%s2777_s5] ss:$16 sps:$4 sm:$0xff]  }
  0x5d   : > { %v2089_v6 = vld [vmem:[%s2777_s5 + $0x8] ss:$16 sps:$4 sm:$0xff]   ;;  %v2615_v7 = vld [vmem:[%s2774_s2] sm:$0xff]  ;;  %v2097_v9 = vld [vmem:[%s2777_s5 + $0x1ec] ss:$16 sps:$4 sm:$0xff]  }
  0x5e   : > { %667 = vmatpush1.bf16.msra.mxu0 %v2024_v19  ;;  %708 = vmatpush1.bf16.msra.mxu1 %v2025_v20  ;;  %v2094_v8 = vld [vmem:[%s2777_s5 + $0x1e4] ss:$16 sps:$4 sm:$0xff]   ;;  %v1776_v10 = vcombine.high %v2615_v7, %v2615_v7  ;;  %v2092_v11 = vld [vmem:[%s2777_s5 + $0x1e0] ss:$16 sps:$4 sm:$0xff]   ;;  %v2095_v12 = vld [vmem:[%s2777_s5 + $0x1e8] ss:$16 sps:$4 sm:$0xff]  }
  0x5f   : > { %668 = vmatprep.subr.bf16.mxu0 %v2026_v21  ;;  %709 = vmatprep.subr.bf16.mxu1 %v2028_v22  ;;  %v2100_v13 = vld [vmem:[%s2777_s5 + $0x1c4] ss:$16 sps:$4 sm:$0xff]   ;;  %v2103_v14 = vld [vmem:[%s2777_s5 + $0x1cc] ss:$16 sps:$4 sm:$0xff]   ;;  %v2098_v15 = vld [vmem:[%s2777_s5 + $0x1c0] ss:$16 sps:$4 sm:$0xff]  }
  0x60   : > { %v2101_v16 = vld [vmem:[%s2777_s5 + $0x1c8] ss:$16 sps:$4 sm:$0xff]   ;;  %v2106_v17 = vld [vmem:[%s2777_s5 + $0x1a4] ss:$16 sps:$4 sm:$0xff]   ;;  %v2109_v18 = vld [vmem:[%s2777_s5 + $0x1ac] ss:$16 sps:$4 sm:$0xff]  }
  0x61   : > { %v2104_v19 = vld [vmem:[%s2777_s5 + $0x1a0] ss:$16 sps:$4 sm:$0xff]   ;;  %v2107_v20 = vld [vmem:[%s2777_s5 + $0x1a8] ss:$16 sps:$4 sm:$0xff]   ;;  %v2112_v21 = vld [vmem:[%s2777_s5 + $0x184] ss:$16 sps:$4 sm:$0xff]  }
  0x62   : > { %669 = vmatpush1.bf16.msra.mxu0 %v2030_v23  ;;  %710 = vmatpush1.bf16.msra.mxu1 %v2031_v24  ;;  %v2115_v22 = vld [vmem:[%s2777_s5 + $0x18c] ss:$16 sps:$4 sm:$0xff]   ;;  %v2110_v23 = vld [vmem:[%s2777_s5 + $0x180] ss:$16 sps:$4 sm:$0xff]   ;;  %v2113_v24 = vld [vmem:[%s2777_s5 + $0x188] ss:$16 sps:$4 sm:$0xff]  }
  0x63   : > { %670 = vmatprep.subr.bf16.mxu0 %v2032_v25  ;;  %711 = vmatprep.subr.bf16.mxu1 %v2034_v26  ;;  %v2118_v25 = vld [vmem:[%s2777_s5 + $0x164] ss:$16 sps:$4 sm:$0xff]   ;;  %v2121_v26 = vld [vmem:[%s2777_s5 + $0x16c] ss:$16 sps:$4 sm:$0xff]   ;;  %v2116_v27 = vld [vmem:[%s2777_s5 + $0x160] ss:$16 sps:$4 sm:$0xff]  }
  0x64   : > { %v2119_v28 = vld [vmem:[%s2777_s5 + $0x168] ss:$16 sps:$4 sm:$0xff]   ;;  %v2124_v29 = vld [vmem:[%s2777_s5 + $0x144] ss:$16 sps:$4 sm:$0xff]   ;;  %v2139_v38 = vld [vmem:[%s2777_s5 + $0x10c] ss:$16 sps:$4 sm:$0xff]  }
  0x65   : > { %v2130_v33 = vld [vmem:[%s2777_s5 + $0x124] ss:$16 sps:$4 sm:$0xff]  }
  0x66   : > { %671 = vmatpush1.bf16.msra.mxu0 %v2036_v30  ;;  %712 = vmatpush1.bf16.msra.mxu1 %v2037_v31  ;;  %v2127_v30 = vld [vmem:[%s2777_s5 + $0x14c] ss:$16 sps:$4 sm:$0xff]   ;;  %v2122_v31 = vld [vmem:[%s2777_s5 + $0x140] ss:$16 sps:$4 sm:$0xff]  }
  0x67   : > { %672 = vmatprep.subr.bf16.mxu0 %v2038_v32  ;;  %713 = vmatprep.subr.bf16.mxu1 %v2040_v34  ;;  %v2125_v32 = vld [vmem:[%s2777_s5 + $0x148] ss:$16 sps:$4 sm:$0xff]   ;;  %v2133_v34 = vld [vmem:[%s2777_s5 + $0x12c] ss:$16 sps:$4 sm:$0xff]  }
  0x6a   : > { %673 = vmatpush1.bf16.msra.mxu0 %v2042_v36  ;;  %714 = vmatpush1.bf16.msra.mxu1 %v2043_v37  ;;  %v2131_v36 = vld [vmem:[%s2777_s5 + $0x128] ss:$16 sps:$4 sm:$0xff]   ;;  %v2136_v37 = vld [vmem:[%s2777_s5 + $0x104] ss:$16 sps:$4 sm:$0xff]  }
  0x6b   : > { %1136 = vmatprep.subr.bf16.mxu0 %v2046_v35  ;;  %1177 = vmatprep.subr.bf16.mxu1 %v2049_v39  ;;  %v2128_v35 = vld [vmem:[%s2777_s5 + $0x120] ss:$16 sps:$4 sm:$0xff]  }
  0x6c   : > { %v2134_v39 = vld [vmem:[%s2777_s5 + $0x100] ss:$16 sps:$4 sm:$0xff]  }
  0x6d   : > { %691 = vmatmul.mubr.bf16.vlgmr.msra.gmra.mxu0 %v443_v40  ;;  %732 = vmatmul.mubr.bf16.vlgmr.msra.gmra.mxu1 %v443_v40  ;;  %v2137_v40 = vld [vmem:[%s2777_s5 + $0x108] ss:$16 sps:$4 sm:$0xff]  }
  0x6e   : > { %1137 = vmatpush1.bf16.msra.mxu0 %v2044_v41  ;;  %1178 = vmatpush1.bf16.msra.mxu1 %v2047_v42  ;;  %v1775_v41 = vcombine.low %v2615_v7, %v2615_v7  ;;  %v2142_v42 = vld [vmem:[%s2463_s11 + $0x78] sm:$0xff]   ;;  %v2171_v7 = vld [vmem:[%s2463_s11 + $0xc0] sm:$0xff]  }
  0x6f   : > { %1138 = vmatprep.subr.bf16.mxu0 %v2052_v43  ;;  %1179 = vmatprep.subr.bf16.mxu1 %v2055_v44  ;;  %v2143_v43 = vld [vmem:[%s2463_s11 + $0xf8] sm:$0xff]  }
  0x70   : > { %1168 = vmatprep.mubr.bf16.mxu0 %v1776_v10  ;;  %1209 = vmatprep.mubr.bf16.mxu1 %v1776_v10  ;;  %v2144_v44 = vld [vmem:[%s2463_s11 + $0x38] sm:$0xff]  }
  0x72   : > { %1139 = vmatpush1.bf16.msra.mxu0 %v2050_v45  ;;  %1180 = vmatpush1.bf16.msra.mxu1 %v2053_v46  ;;  %v2145_v45 = vld [vmem:[%s2463_s11 + $0xb8] sm:$0xff]   ;;  %v2146_v46 = vld [vmem:[%s2463_s11 + $0x70] sm:$0xff]  }
  0x73   : > { %1140 = vmatprep.subr.bf16.mxu0 %v2058_v47  ;;  %1181 = vmatprep.subr.bf16.mxu1 %v2061_v48  ;;  %v2147_v47 = vld [vmem:[%s2463_s11 + $0xf0] sm:$0xff]  }
  0x74   : > { %v2148_v48 = vld [vmem:[%s2463_s11 + $0x30] sm:$0xff]  }
  0x76   : > { %1141 = vmatpush1.bf16.msra.mxu0 %v2056_v49  ;;  %1182 = vmatpush1.bf16.msra.mxu1 %v2059_v50  ;;  %v2149_v49 = vld [vmem:[%s2463_s11 + $0xb0] sm:$0xff]   ;;  %v2150_v50 = vld [vmem:[%s2463_s11 + $0x68] sm:$0xff]  }
  0x77   : > { %1142 = vmatprep.subr.bf16.mxu0 %v2064_v51  ;;  %1183 = vmatprep.subr.bf16.mxu1 %v2067_v52  ;;  %v2151_v51 = vld [vmem:[%s2463_s11 + $0xe8] sm:$0xff]  }
  0x78   : > { %v2152_v52 = vld [vmem:[%s2463_s11 + $0x28] sm:$0xff]  }
  0x7a   : > { %1143 = vmatpush1.bf16.msra.mxu0 %v2062_v53  ;;  %1184 = vmatpush1.bf16.msra.mxu1 %v2065_v54  ;;  %v2153_v53 = vld [vmem:[%s2463_s11 + $0xa8] sm:$0xff]   ;;  %v2154_v54 = vld [vmem:[%s2463_s11 + $0x60] sm:$0xff]  }
  0x7b   : > { %1144 = vmatprep.subr.bf16.mxu0 %v2070_v55  ;;  %1185 = vmatprep.subr.bf16.mxu1 %v2073_v56  ;;  %v2155_v55 = vld [vmem:[%s2463_s11 + $0xe0] sm:$0xff]  }
  0x7c   : > { %v2156_v56 = vld [vmem:[%s2463_s11 + $0x20] sm:$0xff]  }
  0x7e   : > { %1145 = vmatpush1.bf16.msra.mxu0 %v2068_v57  ;;  %1186 = vmatpush1.bf16.msra.mxu1 %v2071_v58  ;;  %v2157_v57 = vld [vmem:[%s2463_s11 + $0xa0] sm:$0xff]   ;;  %v2158_v58 = vld [vmem:[%s2463_s11 + $0x58] sm:$0xff]  }
  0x7f   : > { %1146 = vmatprep.subr.bf16.mxu0 %v2076_v59  ;;  %1187 = vmatprep.subr.bf16.mxu1 %v2079_v60  ;;  %v2159_v59 = vld [vmem:[%s2463_s11 + $0xd8] sm:$0xff]  }
  0x80   : > { %v2160_v60 = vld [vmem:[%s2463_s11 + $0x18] sm:$0xff]  }
  0x82   : > { %1147 = vmatpush1.bf16.msra.mxu0 %v2074_v61  ;;  %1188 = vmatpush1.bf16.msra.mxu1 %v2077_v62  ;;  %v2161_v61 = vld [vmem:[%s2463_s11 + $0x98] sm:$0xff]   ;;  %v2162_v62 = vld [vmem:[%s2463_s11 + $0x50] sm:$0xff]  }
  0x83   : > { %1148 = vmatprep.subr.bf16.mxu0 %v2082_v63  ;;  %1189 = vmatprep.subr.bf16.mxu1 %v2085_v0  ;;  %v2163_v63 = vld [vmem:[%s2463_s11 + $0xd0] sm:$0xff]  }
  0x84   : > { %v2164_v0 = vld [vmem:[%s2463_s11 + $0x10] sm:$0xff]  }
  0x86   : > { %1149 = vmatpush1.bf16.msra.mxu0 %v2080_v1  ;;  %1190 = vmatpush1.bf16.msra.mxu1 %v2083_v2  ;;  %v2165_v1 = vld [vmem:[%s2463_s11 + $0x90] sm:$0xff]   ;;  %v2166_v2 = vld [vmem:[%s2463_s11 + $0x48] sm:$0xff]  }
  0x87   : > { %1150 = vmatprep.subr.bf16.mxu0 %v2088_v3  ;;  %1191 = vmatprep.subr.bf16.mxu1 %v2091_v4  ;;  %v2167_v3 = vld [vmem:[%s2463_s11 + $0xc8] sm:$0xff]  }
  0x88   : > { %v2168_v4 = vld [vmem:[%s2463_s11 + $0x8] sm:$0xff]  }
  0x8a   : > { %1151 = vmatpush1.bf16.msra.mxu0 %v2086_v5  ;;  %1192 = vmatpush1.bf16.msra.mxu1 %v2089_v6  ;;  %v2169_v5 = vld [vmem:[%s2463_s11 + $0x88] sm:$0xff]   ;;  %v2170_v6 = vld [vmem:[%s2463_s11 + $0x40] sm:$0xff]  }
  0x8b   : > { %1152 = vmatprep.subr.bf16.mxu0 %v2094_v8  ;;  %1193 = vmatprep.subr.bf16.mxu1 %v2097_v9  ;;  %v2172_v8 = vld [vmem:[%s2463_s11] sm:$0xff]  }
  0x8c   : > { %v2173_v9 = vld [vmem:[%s2463_s11 + $0x80] sm:$0xff]  }
  0x8e   : > { %1153 = vmatpush2.bf16.msra.mxu0 %v2092_v11  ;;  %1194 = vmatpush2.bf16.msra.mxu1 %v2095_v12 }
  0x8f   : > { %1154 = vmatprep.subr.bf16.mxu0 %v2100_v13  ;;  %1195 = vmatprep.subr.bf16.mxu1 %v2103_v14 }
  0x92   : > { %1155 = vmatpush2.bf16.msra.mxu0 %v2098_v15  ;;  %1196 = vmatpush2.bf16.msra.mxu1 %v2101_v16 }
  0x93   : > { %1156 = vmatprep.subr.bf16.mxu0 %v2106_v17  ;;  %1197 = vmatprep.subr.bf16.mxu1 %v2109_v18  ;;  %v478_v18 = vlaneseq }
  0x96   : > { %1157 = vmatpush2.bf16.msra.mxu0 %v2104_v19  ;;  %1198 = vmatpush2.bf16.msra.mxu1 %v2107_v20  ;;  %v479_v19 = vshrl.u32 %v478_v18, 7 }
  0x97   : > { %1158 = vmatprep.subr.bf16.mxu0 %v2112_v21  ;;  %1199 = vmatprep.subr.bf16.mxu1 %v2115_v22  ;;  %v476_v22 = vld [vmem:[%s2457_s20] sm:$0xf]  ;;  %s1742_s20 = sshll.u32 %s2471_s9, 3 }
  0x98   : > { %v480_v20 = vsub.s32 0, %v479_v19  ;;  %v488_v21 = vsub.s32 2, %v479_v19  ;;  %s434_s10 = scalar_lea.vmem %s2779_s7, %s1742_s20 }
  0x9a   : > { %1159 = vmatpush2.bf16.msra.mxu0 %v2110_v23  ;;  %1200 = vmatpush2.bf16.msra.mxu1 %v2113_v24  ;;  %v484_v23 = vsub.s32 1, %v479_v19  ;;  %v492_v24 = vsub.s32 3, %v479_v19 }
  0x9b   : > { %1160 = vmatprep.subr.bf16.mxu0 %v2118_v25  ;;  %1201 = vmatprep.subr.bf16.mxu1 %v2121_v26  ;;  %v481_v25 = vrot.slane %v476_v22, %v480_v20  ;;  %v489_v26 = vrot.slane %v476_v22, %v488_v21 }
  0x9e   : > { %1161 = vmatpush2.bf16.msra.mxu0 %v2116_v27  ;;  %1202 = vmatpush2.bf16.msra.mxu1 %v2119_v28  ;;  %v485_v27 = vrot.slane %v476_v22, %v484_v23  ;;  %v493_v28 = vrot.slane %v476_v22, %v492_v24 }
  0x9f   : > { %1162 = vmatprep.subr.bf16.mxu0 %v2124_v29  ;;  %1203 = vmatprep.subr.bf16.mxu1 %v2127_v30 }
  0xa2   : > { %1163 = vmatpush2.bf16.msra.mxu0 %v2122_v31  ;;  %1204 = vmatpush2.bf16.msra.mxu1 %v2125_v32 }
  0xa3   : > { %1164 = vmatprep.subr.bf16.mxu0 %v2130_v33  ;;  %1205 = vmatprep.subr.bf16.mxu1 %v2133_v34 }
  0xa6   : > { %1165 = vmatpush2.bf16.msra.mxu0 %v2128_v35  ;;  %1206 = vmatpush2.bf16.msra.mxu1 %v2131_v36 }
  0xa7   : > { %1166 = vmatprep.subr.bf16.mxu0 %v2136_v37  ;;  %1207 = vmatprep.subr.bf16.mxu1 %v2139_v38 }
  0xaa   : > { %1167 = vmatpush2.bf16.msra.mxu0 %v2134_v39  ;;  %1208 = vmatpush2.bf16.msra.mxu1 %v2137_v40 }
  0xab   : > { %1878 = vmatprep.subr.bf16.mxu0 %v2142_v42  ;;  %1900 = vmatprep.subr.bf16.mxu1 %v2143_v43 }
  0xad   : > { %1169 = vmatmul.mubr.bf16.vlgmr.msra.gmra.mxu0 %v1775_v41  ;;  %1210 = vmatmul.mubr.bf16.vlgmr.msra.gmra.mxu1 %v1775_v41 }
  0xae   : > { %1879 = vmatpush3.bf16.msra.mxu0 %v2144_v44  ;;  %1901 = vmatpush3.bf16.msra.mxu1 %v2145_v45 }
  0xaf   : > { %1880 = vmatprep.subr.bf16.mxu0 %v2146_v46  ;;  %1902 = vmatprep.subr.bf16.mxu1 %v2147_v47 }
  0xb2   : > { %1881 = vmatpush3.bf16.msra.mxu0 %v2148_v48  ;;  %1903 = vmatpush3.bf16.msra.mxu1 %v2149_v49 }
  0xb3   : > { %1882 = vmatprep.subr.bf16.mxu0 %v2150_v50  ;;  %1904 = vmatprep.subr.bf16.mxu1 %v2151_v51 }
  0xb6   : > { %1883 = vmatpush3.bf16.msra.mxu0 %v2152_v52  ;;  %1905 = vmatpush3.bf16.msra.mxu1 %v2153_v53 }
  0xb7   : > { %1884 = vmatprep.subr.bf16.mxu0 %v2154_v54  ;;  %1906 = vmatprep.subr.bf16.mxu1 %v2155_v55 }
  0xba   : > { %1885 = vmatpush3.bf16.msra.mxu0 %v2156_v56  ;;  %1907 = vmatpush3.bf16.msra.mxu1 %v2157_v57 }
  0xbb   : > { %1886 = vmatprep.subr.bf16.mxu0 %v2158_v58  ;;  %1908 = vmatprep.subr.bf16.mxu1 %v2159_v59 }
  0xbe   : > { %1887 = vmatpush3.bf16.msra.mxu0 %v2160_v60  ;;  %1909 = vmatpush3.bf16.msra.mxu1 %v2161_v61 }
  0xbf   : > { %1888 = vmatprep.subr.bf16.mxu0 %v2162_v62  ;;  %1910 = vmatprep.subr.bf16.mxu1 %v2163_v63 }
  0xc2   : > { %1889 = vmatpush3.bf16.msra.mxu0 %v2164_v0  ;;  %1911 = vmatpush3.bf16.msra.mxu1 %v2165_v1 }
  0xc3   : > { %1890 = vmatprep.subr.bf16.mxu0 %v2166_v2  ;;  %1912 = vmatprep.subr.bf16.mxu1 %v2167_v3 }
  0xc6   : > { %1891 = vmatpush3.bf16.msra.mxu0 %v2168_v4  ;;  %1913 = vmatpush3.bf16.msra.mxu1 %v2169_v5 }
  0xc7   : > { %1892 = vmatprep.subr.bf16.mxu0 %v2170_v6  ;;  %1914 = vmatprep.subr.bf16.mxu1 %v2171_v7 }
  0xca   : > { %1893 = vmatpush3.bf16.msra.mxu0 %v2172_v8  ;;  %1915 = vmatpush3.bf16.msra.mxu1 %v2173_v9 }
 0x12d   : > { %v692_v10 = vpop.f32.mrf.mxu0  ;;  %v733_v11 = vpop.f32.mrf.mxu1 }
 0x12e   : > { %v693_v29 = vadd.f32 %v692_v10, %v481_v25  ;;  %v734_v30 = vadd.f32 %v733_v11, %v489_v26 }
 0x12f   : > { %v694_v12 = vpop.f32.mrf.mxu0  ;;  %v735_v13 = vpop.f32.mrf.mxu1 }
 0x130   : > { %v695_v31 = vadd.f32 %v694_v12, %v485_v27  ;;  %v736_v32 = vadd.f32 %v735_v13, %v493_v28  ;;  %v740_v33 = vmax.f32 %v693_v29, 0.0  ;;  %v742_v34 = vmax.f32 %v734_v30, 0.0 }
 0x131   : > { %v696_v14 = vpop.f32.mrf.mxu0  ;;  %v737_v15 = vpop.f32.mrf.mxu1 }
 0x132   : > { %v741_v37 = vmax.f32 %v695_v31, 0.0  ;;  %v743_v38 = vmax.f32 %v736_v32, 0.0 }
 0x133   : > { %v697_v16 = vpop.f32.mrf.mxu0  ;;  %v738_v17 = vpop.f32.mrf.mxu1 }
 0x16d   : > { %v1170_v35 = vpop.f32.mrf.mxu0  ;;  %v1211_v36 = vpop.f32.mrf.mxu1 }
 0x16e   : > { %v1218_v39 = vmul.f32 %v1170_v35, %v740_v33  ;;  %v1220_v40 = vmul.f32 %v1211_v36, %v742_v34 }
 0x16f   : > { %v1172_v41 = vpop.f32.mrf.mxu0  ;;  %v1213_v42 = vpop.f32.mrf.mxu1 }
 0x170   : > { %v1219_v43 = vmul.f32 %v1172_v41, %v741_v37  ;;  %v1221_v44 = vmul.f32 %v1213_v42, %v743_v38  ;;  %v1222_v49 = vpack.c.bf16 %v1218_v39, %v1218_v39  ;;  %v1224_v50 = vpack.c.bf16 %v1220_v40, %v1220_v40 }
 0x171   : > { %v1174_v45 = vpop.f32.mrf.mxu0  ;;  %v1215_v46 = vpop.f32.mrf.mxu1 }
 0x172   : > { %v1223_v47 = vpack.c.bf16 %v1219_v43, %v1219_v43  ;;  %v1225_v48 = vpack.c.bf16 %v1221_v44, %v1221_v44 }
 0x173   : > { %v1175_v51 = vpop.f32.mrf.mxu0  ;;  %v1216_v52 = vpop.f32.mrf.mxu1 }
 0x174   : > { %1514 = vmatprep.mubr.bf16.mxu0 %v1223_v47  ;;  %1554 = vmatprep.mubr.bf16.mxu1 %v1225_v48 }
 0x175   : > { %1515 = vmatmul.mubr.bf16.vlgmr.msra.gmra.mxu0 %v1222_v49  ;;  %1555 = vmatmul.mubr.bf16.vlgmr.msra.gmra.mxu1 %v1224_v50 }
 0x235   : > { %v1894_v53 = vpop.f32.mrf.mxu0  ;;  %v1916_v54 = vpop.f32.mrf.mxu1 }
 0x237   : > { %v1895_v55 = vpop.f32.mrf.mxu0  ;;  %v1917_v56 = vpop.f32.mrf.mxu1 }
 0x238   : > { %v1896_v57 = vadd.f32 %v1895_v55, %v1894_v53  ;;  %v1918_v58 = vadd.f32 %v1917_v56, %v1916_v54 }
 0x239   : > { %v1897_v59 = vpop.f32.mrf.mxu0  ;;  %v1919_v60 = vpop.f32.mrf.mxu1 }
 0x23a   : > { %v1557_v61 = vadd.f32 %v1918_v58, %v1896_v57 }
 0x23b   : > { %v1898_v62 = vpop.f32.mrf.mxu0  ;;  %v1920_v63 = vpop.f32.mrf.mxu1 }
 0x23c   : > { %1562 = vst [vmem:[%s434_s10] sm:$0xff] %v1557_v61 }
 0x23d PF: > { %s2791_s17 = sld [smem:[#allocation11_spill]]  ;;  %s2792_s24 = smov %s2283_s25 }
 0x23e   : > { %s2793_s25 = smov %s2287_s26  ;;  %s2794_s26 = smov %s2429_s15 }
 0x23f   : > { %s2795_s27 = smov %s2295_s28  ;;  %s2796_s28 = smov %s2798_s12 }
 0x243   : > { %s24_s29 = sadd.s32 1, %s2791_s17  }
 0x244   : > { %p21_p5 = scmp.ge.s32.totalorder %s24_s29, 5  }
 0x246   :  { %23 = sbr.rel (!%p21_p5) target bundleno = 10 (0xa), region = 115 }
 0x24b   :  { %1588 = vsyncpa [#allocation3], 1 }
 0x24c   :  { %1590 = vsyncpa [#allocation3 + $0x1], 1 }
 0x24d   :  { %1591 = vsyncpa [#allocation7], 1 }
 0x24e   :  { %1593 = vsyncpa [#allocation7 + $0x1], 1 }
 0x24f   :  { %1594 = vsyncpa [#allocation4], 1 }
 0x250   :  { %1596 = vsyncpa [#allocation4 + $0x1], 1 }

</bundles_post_ra>
